<compile_context>
chip_gen: v7x
topology: tpu7x:2x2x1
jax: 0.10.0
libtpu: 0.0.40
codegen_flags: <defaults>
</compile_context>

<pallas_src>
import math
from functools import partial

import jax
import jax.numpy as jnp
from jax import lax
from jax.experimental import pallas as pl
from jax.experimental.pallas import tpu as pltpu


# ----------------------------- config (self.c) -----------------------------
class Config:
    n = 2
    T = 4
    channels = 1
    width = 16
    height = 16
    num_obj = 2
    patch_width = 8
    patch_height = 8
    scale_var = 0.3
    pos_var = 0.3
    min_obj_scale = 0.1
    max_obj_scale = 0.8
    min_y_scale = 0.2
    max_y_scale = 0.8
    obj_pos_bound = 0.9
    overlap_beta = 10.0
    enc_hidden = 64


LOG2PI = math.log(2.0 * math.pi)
LANES = 128


def _num_tensorcores():
    """Best-effort TensorCore count; defaults to 1 (correct for v5e/v6e)."""
    try:
        info = pltpu.get_tpu_info()
    except Exception:
        return 1
    for attr in ("num_cores", "core_count", "num_tensorcores", "tensor_core_count"):
        v = getattr(info, attr, None)
        if isinstance(v, int) and v > 0:
            return v
    return 1


# --------------------------- fused SuPAIR kernel ----------------------------
def _supair_kernel(x_flat_ref, eps_ref, x_img_ref, w1b_ref, w2_ref, cst_ref,
                   bg_ref, obj_ref, out_ref, *, cfg, frames_per_step):
    W, H = cfg.width, cfg.height
    PW, PH = cfg.patch_width, cfg.patch_height
    NO = cfg.num_obj
    NO4 = NO * 4
    F = frames_per_step
    beta = float(cfg.overlap_beta)
    log_beta = math.log(beta)
    beta_pix = beta / float(PW * PH)

    # ---- coordinate grids (built once per kernel invocation) ---------------
    def iotaf(shape, dim):
        return lax.broadcasted_iota(jnp.int32, shape, dim).astype(jnp.float32)

    cpr = 2.0 * iotaf((PW, W), 0) / float(PW - 1) - 1.0    # patch-row out coords
    widx = iotaf((PW, W), 1)                               # image-row index
    cqc = 2.0 * iotaf((H, PH), 1) / float(PH - 1) - 1.0    # patch-col out coords
    hidx = iotaf((H, PH), 0)                               # image-col index
    colw = 2.0 * iotaf((W, 1), 0) / float(W - 1) - 1.0     # image-row out coords
    rowh = 2.0 * iotaf((1, H), 1) / float(H - 1) - 1.0     # image-col out coords

    # ---- packed constants ---------------------------------------------------
    cst = cst_ref[...]                                     # (4, NO*8)
    b2_row = cst[0:1, :]
    scale_row = cst[1:2, :]
    off_row = cst[2:3, :]
    logvar_std = cst[3:4, NO4:]                            # (1, NO*4)
    bgc = bg_ref[...]                                      # (3, W, H)
    bg_mu, bg_istd, bg_cst = bgc[0], bgc[1], bgc[2]
    objc = obj_ref[...]                                    # (3, PW, PH)
    obj_mu, obj_istd, obj_cst = objc[0], objc[1], objc[2]

    # ---- encoder MLP surrogate (layer-1 bias folded into w1b / ones column) -
    x2 = x_flat_ref[...]                                   # (F, D+1)
    eps2 = eps_ref[...]                                    # (F, NO*4)
    h1 = jnp.maximum(
        jnp.dot(x2, w1b_ref[...], preferred_element_type=jnp.float32), 0.0)
    codes = (jnp.dot(h1, w2_ref[...], preferred_element_type=jnp.float32)
             + b2_row)                                     # (F, NO*8): [means | stds]

    # ---- constrain_zp + rsample + log q(z|x), vectorized over all codes -----
    sig = 1.0 / (1.0 + jnp.exp(-codes))                    # (F, NO*8)
    zp = sig * scale_row + off_row                         # means | stds
    mean = zp[:, :NO4]                                     # (F, NO*4)
    std = zp[:, NO4:]                                      # (F, NO*4)
    z = mean + std * eps2                                  # per-obj [sx, sy/sx, tx, ty]
    # log std = log(var_const) + log_sigmoid(code), numerically stable.
    std_code = codes[:, NO4:]
    log_sig = (jnp.minimum(std_code, 0.0)
               - jnp.log(1.0 + jnp.exp(-jnp.abs(std_code))))
    log_std = logvar_std + log_sig
    logq = (jnp.sum(-0.5 * eps2 * eps2 - log_std, axis=-1, keepdims=True)
            - NO4 * 0.5 * LOG2PI)                          # (F, 1)

    # ---- likelihood: batched over frames, sequential over objects ----------
    xf = x_img_ref[...]                                    # (F, W, H)
    cur_bg = jnp.zeros((F, W, H), jnp.float32)             # marginalise_bg
    acc_pp = jnp.zeros((F, PW, PH), jnp.float32)           # obj + overlap acc

    for o in range(NO):
        sx = z[:, 4 * o + 0:4 * o + 1].reshape(F, 1, 1)
        syq = z[:, 4 * o + 1:4 * o + 2].reshape(F, 1, 1)
        tx = z[:, 4 * o + 2:4 * o + 3].reshape(F, 1, 1)
        ty = z[:, 4 * o + 3:4 * o + 4].reshape(F, 1, 1)
        sy = sx * syq                                      # sy_from_quotient

        # forward transform weights: patch grid -> image coords (batched over F)
        src_r = (sy * cpr + ty + 1.0) * (0.5 * (W - 1))    # (F, PW, W)
        wr = jnp.maximum(0.0, 1.0 - jnp.abs(src_r - widx))
        src_c = (sx * cqc + tx + 1.0) * (0.5 * (H - 1))    # (F, H, PH)
        wcT = jnp.maximum(0.0, 1.0 - jnp.abs(src_c - hidx))

        inv_bg = 1.0 - cur_bg
        t1 = jnp.einsum('fwh,fhq->fwq', inv_bg, wcT,
                        preferred_element_type=jnp.float32)
        marg = 1.0 - jnp.einsum('fpw,fwq->fpq', wr, t1,
                                preferred_element_type=jnp.float32)   # (F,PW,PH)
        t2 = jnp.einsum('fwh,fhq->fwq', xf, wcT,
                        preferred_element_type=jnp.float32)
        patch = jnp.einsum('fpw,fwq->fpq', wr, t2,
                           preferred_element_type=jnp.float32)        # (F,PW,PH)

        # closed-form footprint of grid_sample(ones, inverse theta)
        inv_sy = 1.0 / sy
        inv_sx = 1.0 / sx
        src_ri = (inv_sy * colw + (-ty * inv_sy) + 1.0) * (0.5 * (W - 1))  # (F,W,1)
        rcov = jnp.clip(jnp.minimum(src_ri + 1.0, float(W) - src_ri), 0.0, 1.0)
        src_ci = (inv_sx * rowh + (-tx * inv_sx) + 1.0) * (0.5 * (H - 1))  # (F,1,H)
        ccov = jnp.clip(jnp.minimum(src_ci + 1.0, float(H) - src_ci), 0.0, 1.0)
        cur_bg = jnp.clip(cur_bg + rcov * ccov, 0.0, 1.0)

        # object SPN surrogate (factorized Gaussian leaves + marginalisation)
        # plus the Exponential overlap prior, folded into one matrix accumulator.
        lp = -0.5 * jnp.square((patch - obj_mu) * obj_istd) + obj_cst
        acc_pp = acc_pp + (sx * sy) * (1.0 - marg) * lp - beta_pix * marg

    # background SPN surrogate with cut-out marginalisation
    bg_lp = -0.5 * jnp.square((xf - bg_mu) * bg_istd) + bg_cst        # (F, W, H)
    bg_term = (1.0 - cur_bg) * bg_lp

    sum_obj = jnp.sum(jnp.sum(acc_pp, axis=2), axis=1, keepdims=True)  # (F, 1)
    sum_bg = jnp.sum(jnp.sum(bg_term, axis=2), axis=1, keepdims=True)  # (F, 1)
    elbo = sum_obj + sum_bg + (NO * log_beta) - logq                   # (F, 1)
    out_ref[...] = jnp.broadcast_to(elbo, (F, LANES))                  # one dense store


# ------------------------------- JAX wrapper --------------------------------
def supair_forward(x, enc_params, spn_params, cfg, key):
    n, T = x.shape[0], x.shape[1]
    nT = n * T
    W, H = cfg.width, cfg.height
    PW, PH = cfg.patch_width, cfg.patch_height
    D = cfg.channels * W * H
    NO = cfg.num_obj
    assert cfg.channels == 1  # single channel, as in the reference config

    x = x.astype(jnp.float32)
    x_img = x.reshape(nT, W, H)
    x_flat = x.reshape(nT, D)
    # ones column folds the layer-1 bias into the weight matrix (1 fewer DMA)
    x_flat_aug = jnp.concatenate([x_flat, jnp.ones((nT, 1), jnp.float32)], axis=1)

    # reparameterisation noise (torch rsample equivalent)
    eps = jax.random.normal(key, (nT, NO * 4), jnp.float32)

    # encoder weights: fold b1, permute layer-2 columns so means occupy
    # columns [0, NO*4) and stds occupy [NO*4, NO*8)
    w1b = jnp.concatenate([enc_params["w1"], enc_params["b1"]], axis=0)  # (D+1, hid)
    perm = ([o * 8 + k for o in range(NO) for k in range(4)]
            + [o * 8 + 4 + k for o in range(NO) for k in range(4)])
    perm = jnp.asarray(perm, jnp.int32)
    w2p = jnp.take(enc_params["w2"], perm, axis=1)
    b2p = jnp.take(enc_params["b2"], perm, axis=1)                       # (1, NO*8)

    # constrain_zp constants (permuted layout), packed with b2 into one array
    osd = cfg.max_obj_scale - cfg.min_obj_scale
    ysd = cfg.max_y_scale - cfg.min_y_scale
    pb = cfg.obj_pos_bound
    mean_scale = [osd, ysd, 2.0 * pb, 2.0 * pb]
    mean_off = [cfg.min_obj_scale, cfg.min_y_scale, -pb, -pb]
    std_scale = [cfg.scale_var, cfg.scale_var, cfg.pos_var, cfg.pos_var]
    scale_row = jnp.asarray([mean_scale * NO + std_scale * NO], jnp.float32)
    off_row = jnp.asarray([mean_off * NO + [0.0] * (4 * NO)], jnp.float32)
    logvar_row = jnp.asarray(
        [[0.0] * (4 * NO) + [math.log(v) for v in std_scale] * NO], jnp.float32)
    const_pack = jnp.concatenate([b2p, scale_row, off_row, logvar_row], axis=0)

    # SPN-leaf constants packed (no in-kernel transcendentals on constants)
    bg_istd = jnp.exp(-spn_params["bg_logstd"])
    bg_cst = -spn_params["bg_logstd"] - 0.5 * LOG2PI
    bg_pack = jnp.stack([spn_params["bg_mu"], bg_istd, bg_cst], axis=0)   # (3,W,H)
    obj_istd = jnp.exp(-spn_params["obj_logstd"])
    obj_cst = -spn_params["obj_logstd"] - 0.5 * LOG2PI
    obj_pack = jnp.stack([spn_params["obj_mu"], obj_istd, obj_cst], axis=0)  # (3,PW,PH)

    # grid: single step on single-TensorCore chips; core-count steps only when
    # frames split into 8-aligned blocks (never pay a redundant serial step).
    num_tc = _num_tensorcores()
    n_steps = 1
    if num_tc > 1 and nT % num_tc == 0 and (nT // num_tc) % 8 == 0:
        n_steps = num_tc
    F = nT // n_steps

    def full_spec(arr):
        nd = arr.ndim
        return pl.BlockSpec(arr.shape, lambda i, _nd=nd: (0,) * _nd)

    out = pl.pallas_call(
        partial(_supair_kernel, cfg=cfg, frames_per_step=F),
        grid=(n_steps,),
        in_specs=[
            pl.BlockSpec((F, D + 1), lambda i: (i, 0)),        # x_flat (+ones col)
            pl.BlockSpec((F, NO * 4), lambda i: (i, 0)),       # eps
            pl.BlockSpec((F, W, H), lambda i: (i, 0, 0)),      # x images
            full_spec(w1b),                                    # encoder layer 1
            full_spec(w2p),                                    # encoder layer 2
            full_spec(const_pack),                             # b2|scale|off|logvar
            full_spec(bg_pack),                                # bg mu/istd/cst
            full_spec(obj_pack),                               # obj mu/istd/cst
        ],
        out_specs=pl.BlockSpec((F, LANES), lambda i: (i, 0)),
        out_shape=jax.ShapeDtypeStruct((nT, LANES), jnp.float32),
        compiler_params=pltpu.CompilerParams(
            dimension_semantics=(("parallel",) if n_steps > 1 else ("arbitrary",))),
    )(x_flat_aug, eps, x_img, w1b, w2p, const_pack, bg_pack, obj_pack)

    elbo = out[:, 0]                    # (nT,) per-frame ELBO
    return jnp.mean(elbo)


# --------------------------------- main --------------------------------------
if __name__ == "__main__":
    cfg = Config()
    key = jax.random.PRNGKey(0)
    k_x, k_w1, k_w2, k_bg, k_obj, k_s = jax.random.split(key, 6)

    x = jax.random.uniform(
        k_x, (cfg.n, cfg.T, cfg.channels, cfg.width, cfg.height), jnp.float32)

    in_dim = cfg.channels * cfg.width * cfg.height
    enc_params = {
        "w1": 0.05 * jax.random.normal(k_w1, (in_dim, cfg.enc_hidden), jnp.float32),
        "b1": jnp.zeros((1, cfg.enc_hidden), jnp.float32),
        "w2": 0.05 * jax.random.normal(k_w2, (cfg.enc_hidden, cfg.num_obj * 8),
                                       jnp.float32),
        "b2": jnp.zeros((1, cfg.num_obj * 8), jnp.float32),
    }
    spn_params = {
        "bg_mu": 0.5 + 0.1 * jax.random.normal(
            k_bg, (cfg.width, cfg.height), jnp.float32),
        "bg_logstd": jnp.full((cfg.width, cfg.height), math.log(0.3), jnp.float32),
        "obj_mu": 0.5 + 0.1 * jax.random.normal(
            k_obj, (cfg.patch_width, cfg.patch_height), jnp.float32),
        "obj_logstd": jnp.full((cfg.patch_width, cfg.patch_height),
                               math.log(0.3), jnp.float32),
    }

    avg_elbo = supair_forward(x, enc_params, spn_params, cfg, k_s)
    jax.block_until_ready(avg_elbo)
    print("KERNEL_OK")
</pallas_src>

<mosaic_0001>
module attributes {stable_mosaic.version = 11 : i64} {
  func.func @_supair_kernel(%arg0: i32, %arg1: memref<8x257xf32, #tpu.memory_space<vmem>>, %arg2: memref<8x8xf32, #tpu.memory_space<vmem>>, %arg3: memref<8x16x16xf32, #tpu.memory_space<vmem>>, %arg4: memref<257x64xf32, #tpu.memory_space<vmem>>, %arg5: memref<64x16xf32, #tpu.memory_space<vmem>>, %arg6: memref<4x16xf32, #tpu.memory_space<vmem>>, %arg7: memref<3x16x16xf32, #tpu.memory_space<vmem>>, %arg8: memref<3x8x8xf32, #tpu.memory_space<vmem>>, %arg9: memref<8x128xf32, #tpu.memory_space<vmem>>) attributes {dimension_semantics = [#tpu.dimension_semantics<arbitrary>], iteration_bounds = array<i64: 1>, scalar_prefetch = 0 : i64, scratch_operands = 0 : i64, tpu.core_type = #tpu.core_type<tc>, window_params = [{transform_indices = @transform_0, window_bounds = array<i64: 8, 257>}, {transform_indices = @transform_1, window_bounds = array<i64: 8, 8>}, {transform_indices = @transform_2, window_bounds = array<i64: 8, 16, 16>}, {pipeline_mode = #tpu.pipeline_mode<synchronous>, transform_indices = @transform_3, window_bounds = array<i64: 257, 64>}, {pipeline_mode = #tpu.pipeline_mode<synchronous>, transform_indices = @transform_4, window_bounds = array<i64: 64, 16>}, {pipeline_mode = #tpu.pipeline_mode<synchronous>, transform_indices = @transform_5, window_bounds = array<i64: 4, 16>}, {pipeline_mode = #tpu.pipeline_mode<synchronous>, transform_indices = @transform_6, window_bounds = array<i64: 3, 16, 16>}, {pipeline_mode = #tpu.pipeline_mode<synchronous>, transform_indices = @transform_7, window_bounds = array<i64: 3, 8, 8>}, {transform_indices = @transform_8, window_bounds = array<i64: 8, 128>}]} {
    %0 = tpu.iota {dimensions = array<i32: 0>} : vector<8x16xi32>
    %1 = arith.sitofp %0 : vector<8x16xi32> to vector<8x16xf32>
    %cst = arith.constant 2.000000e+00 : f32
    %2 = vector.broadcast %cst : f32 to vector<8x16xf32>
    %3 = arith.mulf %2, %1 : vector<8x16xf32>
    %cst_0 = arith.constant 7.000000e+00 : f32
    %4 = vector.broadcast %cst_0 : f32 to vector<8x16xf32>
    %5 = arith.divf %3, %4 : vector<8x16xf32>
    %cst_1 = arith.constant 1.000000e+00 : f32
    %6 = vector.broadcast %cst_1 : f32 to vector<8x16xf32>
    %7 = arith.subf %5, %6 : vector<8x16xf32>
    %8 = tpu.iota {dimensions = array<i32: 1>} : vector<8x16xi32>
    %9 = arith.sitofp %8 : vector<8x16xi32> to vector<8x16xf32>
    %10 = tpu.iota {dimensions = array<i32: 1>} : vector<16x8xi32>
    %11 = arith.sitofp %10 : vector<16x8xi32> to vector<16x8xf32>
    %cst_2 = arith.constant 2.000000e+00 : f32
    %12 = vector.broadcast %cst_2 : f32 to vector<16x8xf32>
    %13 = arith.mulf %12, %11 : vector<16x8xf32>
    %cst_3 = arith.constant 7.000000e+00 : f32
    %14 = vector.broadcast %cst_3 : f32 to vector<16x8xf32>
    %15 = arith.divf %13, %14 : vector<16x8xf32>
    %cst_4 = arith.constant 1.000000e+00 : f32
    %16 = vector.broadcast %cst_4 : f32 to vector<16x8xf32>
    %17 = arith.subf %15, %16 : vector<16x8xf32>
    %18 = tpu.iota {dimensions = array<i32: 0>} : vector<16x8xi32>
    %19 = arith.sitofp %18 : vector<16x8xi32> to vector<16x8xf32>
    %20 = tpu.iota {dimensions = array<i32: 0>} : vector<16x1xi32>
    %21 = arith.sitofp %20 : vector<16x1xi32> to vector<16x1xf32>
    %cst_5 = arith.constant 2.000000e+00 : f32
    %22 = vector.broadcast %cst_5 : f32 to vector<16x1xf32>
    %23 = arith.mulf %22, %21 : vector<16x1xf32>
    %cst_6 = arith.constant 1.500000e+01 : f32
    %24 = vector.broadcast %cst_6 : f32 to vector<16x1xf32>
    %25 = arith.divf %23, %24 : vector<16x1xf32>
    %cst_7 = arith.constant 1.000000e+00 : f32
    %26 = vector.broadcast %cst_7 : f32 to vector<16x1xf32>
    %27 = arith.subf %25, %26 : vector<16x1xf32>
    %28 = tpu.iota {dimensions = array<i32: 1>} : vector<1x16xi32>
    %29 = arith.sitofp %28 : vector<1x16xi32> to vector<1x16xf32>
    %cst_8 = arith.constant 2.000000e+00 : f32
    %30 = vector.broadcast %cst_8 : f32 to vector<1x16xf32>
    %31 = arith.mulf %30, %29 : vector<1x16xf32>
    %cst_9 = arith.constant 1.500000e+01 : f32
    %32 = vector.broadcast %cst_9 : f32 to vector<1x16xf32>
    %33 = arith.divf %31, %32 : vector<1x16xf32>
    %cst_10 = arith.constant 1.000000e+00 : f32
    %34 = vector.broadcast %cst_10 : f32 to vector<1x16xf32>
    %35 = arith.subf %33, %34 : vector<1x16xf32>
    %c0 = arith.constant 0 : index
    %c0_11 = arith.constant 0 : index
    %36 = vector.load %arg6[%c0, %c0_11] : memref<4x16xf32, #tpu.memory_space<vmem>>, vector<4x16xf32>
    %37 = vector.extract_strided_slice %36 {offsets = [0, 0], sizes = [1, 16], strides = [1, 1]} : vector<4x16xf32> to vector<1x16xf32>
    %38 = vector.extract_strided_slice %36 {offsets = [1, 0], sizes = [1, 16], strides = [1, 1]} : vector<4x16xf32> to vector<1x16xf32>
    %39 = vector.extract_strided_slice %36 {offsets = [2, 0], sizes = [1, 16], strides = [1, 1]} : vector<4x16xf32> to vector<1x16xf32>
    %40 = vector.extract_strided_slice %36 {offsets = [3, 8], sizes = [1, 8], strides = [1, 1]} : vector<4x16xf32> to vector<1x8xf32>
    %c0_12 = arith.constant 0 : index
    %c0_13 = arith.constant 0 : index
    %c0_14 = arith.constant 0 : index
    %41 = vector.load %arg7[%c0_12, %c0_13, %c0_14] : memref<3x16x16xf32, #tpu.memory_space<vmem>>, vector<3x16x16xf32>
    %42 = vector.extract_strided_slice %41 {offsets = [0, 0, 0], sizes = [1, 16, 16], strides = [1, 1, 1]} : vector<3x16x16xf32> to vector<1x16x16xf32>
    %43 = vector.shape_cast %42 : vector<1x16x16xf32> to vector<16x16xf32>
    %44 = vector.extract_strided_slice %41 {offsets = [1, 0, 0], sizes = [1, 16, 16], strides = [1, 1, 1]} : vector<3x16x16xf32> to vector<1x16x16xf32>
    %45 = vector.shape_cast %44 : vector<1x16x16xf32> to vector<16x16xf32>
    %46 = vector.extract_strided_slice %41 {offsets = [2, 0, 0], sizes = [1, 16, 16], strides = [1, 1, 1]} : vector<3x16x16xf32> to vector<1x16x16xf32>
    %47 = vector.shape_cast %46 : vector<1x16x16xf32> to vector<16x16xf32>
    %c0_15 = arith.constant 0 : index
    %c0_16 = arith.constant 0 : index
    %c0_17 = arith.constant 0 : index
    %48 = vector.load %arg8[%c0_15, %c0_16, %c0_17] : memref<3x8x8xf32, #tpu.memory_space<vmem>>, vector<3x8x8xf32>
    %49 = vector.extract_strided_slice %48 {offsets = [0, 0, 0], sizes = [1, 8, 8], strides = [1, 1, 1]} : vector<3x8x8xf32> to vector<1x8x8xf32>
    %50 = vector.shape_cast %49 : vector<1x8x8xf32> to vector<8x8xf32>
    %51 = vector.extract_strided_slice %48 {offsets = [1, 0, 0], sizes = [1, 8, 8], strides = [1, 1, 1]} : vector<3x8x8xf32> to vector<1x8x8xf32>
    %52 = vector.shape_cast %51 : vector<1x8x8xf32> to vector<8x8xf32>
    %53 = vector.extract_strided_slice %48 {offsets = [2, 0, 0], sizes = [1, 8, 8], strides = [1, 1, 1]} : vector<3x8x8xf32> to vector<1x8x8xf32>
    %54 = vector.shape_cast %53 : vector<1x8x8xf32> to vector<8x8xf32>
    %c0_18 = arith.constant 0 : index
    %c0_19 = arith.constant 0 : index
    %55 = vector.load %arg1[%c0_18, %c0_19] : memref<8x257xf32, #tpu.memory_space<vmem>>, vector<8x257xf32>
    %c0_20 = arith.constant 0 : index
    %c0_21 = arith.constant 0 : index
    %56 = vector.load %arg2[%c0_20, %c0_21] : memref<8x8xf32, #tpu.memory_space<vmem>>, vector<8x8xf32>
    %c0_22 = arith.constant 0 : index
    %c0_23 = arith.constant 0 : index
    %57 = vector.load %arg4[%c0_22, %c0_23] : memref<257x64xf32, #tpu.memory_space<vmem>>, vector<257x64xf32>
    %cst_24 = arith.constant dense<0.000000e+00> : vector<8x64xf32>
    %58 = tpu.matmul %55, %57, %cst_24 {dimension_numbers = #tpu.dot_dimension_numbers<[1], [0], [0], [1], [0, 0, 1, 1], [], []>} : vector<8x257xf32>, vector<257x64xf32>, vector<8x64xf32> -> vector<8x64xf32>
    %cst_25 = arith.constant 0.000000e+00 : f32
    %59 = vector.broadcast %cst_25 : f32 to vector<8x64xf32>
    %60 = arith.maximumf %58, %59 : vector<8x64xf32>
    %c0_26 = arith.constant 0 : index
    %c0_27 = arith.constant 0 : index
    %61 = vector.load %arg5[%c0_26, %c0_27] : memref<64x16xf32, #tpu.memory_space<vmem>>, vector<64x16xf32>
    %cst_28 = arith.constant dense<0.000000e+00> : vector<8x16xf32>
    %62 = tpu.matmul %60, %61, %cst_28 {dimension_numbers = #tpu.dot_dimension_numbers<[1], [0], [0], [1], [0, 0, 1, 1], [], []>} : vector<8x64xf32>, vector<64x16xf32>, vector<8x16xf32> -> vector<8x16xf32>
    %63 = vector.broadcast %37 : vector<1x16xf32> to vector<8x16xf32>
    %64 = arith.addf %62, %63 : vector<8x16xf32>
    %cst_29 = arith.constant 0.000000e+00 : f32
    %65 = vector.broadcast %cst_29 : f32 to vector<8x16xf32>
    %66 = arith.subf %65, %64 : vector<8x16xf32>
    %67 = math.exp %66 : vector<8x16xf32>
    %cst_30 = arith.constant 1.000000e+00 : f32
    %68 = vector.broadcast %cst_30 : f32 to vector<8x16xf32>
    %69 = arith.addf %68, %67 : vector<8x16xf32>
    %cst_31 = arith.constant 1.000000e+00 : f32
    %70 = vector.broadcast %cst_31 : f32 to vector<8x16xf32>
    %71 = arith.divf %70, %69 : vector<8x16xf32>
    %72 = vector.broadcast %38 : vector<1x16xf32> to vector<8x16xf32>
    %73 = arith.mulf %71, %72 : vector<8x16xf32>
    %74 = vector.broadcast %39 : vector<1x16xf32> to vector<8x16xf32>
    %75 = arith.addf %73, %74 : vector<8x16xf32>
    %76 = vector.extract_strided_slice %75 {offsets = [0, 0], sizes = [8, 8], strides = [1, 1]} : vector<8x16xf32> to vector<8x8xf32>
    %77 = vector.extract_strided_slice %75 {offsets = [0, 8], sizes = [8, 8], strides = [1, 1]} : vector<8x16xf32> to vector<8x8xf32>
    %78 = arith.mulf %77, %56 : vector<8x8xf32>
    %79 = arith.addf %76, %78 : vector<8x8xf32>
    %80 = vector.extract_strided_slice %64 {offsets = [0, 8], sizes = [8, 8], strides = [1, 1]} : vector<8x16xf32> to vector<8x8xf32>
    %cst_32 = arith.constant 0.000000e+00 : f32
    %81 = vector.broadcast %cst_32 : f32 to vector<8x8xf32>
    %82 = arith.minimumf %80, %81 : vector<8x8xf32>
    %83 = math.absf %80 : vector<8x8xf32>
    %cst_33 = arith.constant 0.000000e+00 : f32
    %84 = vector.broadcast %cst_33 : f32 to vector<8x8xf32>
    %85 = arith.subf %84, %83 : vector<8x8xf32>
    %86 = math.exp %85 : vector<8x8xf32>
    %cst_34 = arith.constant 1.000000e+00 : f32
    %87 = vector.broadcast %cst_34 : f32 to vector<8x8xf32>
    %88 = arith.addf %87, %86 : vector<8x8xf32>
    %89 = math.log %88 : vector<8x8xf32>
    %90 = arith.subf %82, %89 : vector<8x8xf32>
    %91 = vector.broadcast %40 : vector<1x8xf32> to vector<8x8xf32>
    %92 = arith.addf %91, %90 : vector<8x8xf32>
    %cst_35 = arith.constant -5.000000e-01 : f32
    %93 = vector.broadcast %cst_35 : f32 to vector<8x8xf32>
    %94 = arith.mulf %93, %56 : vector<8x8xf32>
    %95 = arith.mulf %94, %56 : vector<8x8xf32>
    %96 = arith.subf %95, %92 : vector<8x8xf32>
    %cst_36 = arith.constant dense<0.000000e+00> : vector<8xf32>
    %97 = vector.multi_reduction <add>, %96, %cst_36 [1] : vector<8x8xf32> to vector<8xf32>
    %98 = vector.shape_cast %97 : vector<8xf32> to vector<8x1xf32>
    %cst_37 = arith.constant 7.35150814 : f32
    %99 = vector.broadcast %cst_37 : f32 to vector<8x1xf32>
    %100 = arith.subf %98, %99 : vector<8x1xf32>
    %c0_38 = arith.constant 0 : index
    %c0_39 = arith.constant 0 : index
    %c0_40 = arith.constant 0 : index
    %101 = vector.load %arg3[%c0_38, %c0_39, %c0_40] : memref<8x16x16xf32, #tpu.memory_space<vmem>>, vector<8x16x16xf32>
    %cst_41 = arith.constant 0.000000e+00 : f32
    %102 = vector.broadcast %cst_41 : f32 to vector<8x16x16xf32>
    %cst_42 = arith.constant 0.000000e+00 : f32
    %103 = vector.broadcast %cst_42 : f32 to vector<8x8x8xf32>
    %104 = vector.extract_strided_slice %79 {offsets = [0, 0], sizes = [8, 1], strides = [1, 1]} : vector<8x8xf32> to vector<8x1xf32>
    %105 = vector.shape_cast %104 : vector<8x1xf32> to vector<8x1x1xf32>
    %106 = vector.extract_strided_slice %79 {offsets = [0, 1], sizes = [8, 1], strides = [1, 1]} : vector<8x8xf32> to vector<8x1xf32>
    %107 = vector.shape_cast %106 : vector<8x1xf32> to vector<8x1x1xf32>
    %108 = vector.extract_strided_slice %79 {offsets = [0, 2], sizes = [8, 1], strides = [1, 1]} : vector<8x8xf32> to vector<8x1xf32>
    %109 = vector.shape_cast %108 : vector<8x1xf32> to vector<8x1x1xf32>
    %110 = vector.extract_strided_slice %79 {offsets = [0, 3], sizes = [8, 1], strides = [1, 1]} : vector<8x8xf32> to vector<8x1xf32>
    %111 = vector.shape_cast %110 : vector<8x1xf32> to vector<8x1x1xf32>
    %112 = arith.mulf %105, %107 : vector<8x1x1xf32>
    %113 = vector.shape_cast %7 : vector<8x16xf32> to vector<1x8x16xf32>
    %114 = vector.broadcast %112 : vector<8x1x1xf32> to vector<8x8x16xf32>
    %115 = vector.broadcast %113 : vector<1x8x16xf32> to vector<8x8x16xf32>
    %116 = arith.mulf %114, %115 : vector<8x8x16xf32>
    %117 = vector.broadcast %111 : vector<8x1x1xf32> to vector<8x8x16xf32>
    %118 = arith.addf %116, %117 : vector<8x8x16xf32>
    %cst_43 = arith.constant 1.000000e+00 : f32
    %119 = vector.broadcast %cst_43 : f32 to vector<8x8x16xf32>
    %120 = arith.addf %118, %119 : vector<8x8x16xf32>
    %cst_44 = arith.constant 7.500000e+00 : f32
    %121 = vector.broadcast %cst_44 : f32 to vector<8x8x16xf32>
    %122 = arith.mulf %120, %121 : vector<8x8x16xf32>
    %123 = vector.shape_cast %9 : vector<8x16xf32> to vector<1x8x16xf32>
    %124 = vector.broadcast %123 : vector<1x8x16xf32> to vector<8x8x16xf32>
    %125 = arith.subf %122, %124 : vector<8x8x16xf32>
    %126 = math.absf %125 : vector<8x8x16xf32>
    %cst_45 = arith.constant 1.000000e+00 : f32
    %127 = vector.broadcast %cst_45 : f32 to vector<8x8x16xf32>
    %128 = arith.subf %127, %126 : vector<8x8x16xf32>
    %cst_46 = arith.constant 0.000000e+00 : f32
    %129 = vector.broadcast %cst_46 : f32 to vector<8x8x16xf32>
    %130 = arith.maximumf %129, %128 : vector<8x8x16xf32>
    %131 = vector.shape_cast %17 : vector<16x8xf32> to vector<1x16x8xf32>
    %132 = vector.broadcast %105 : vector<8x1x1xf32> to vector<8x16x8xf32>
    %133 = vector.broadcast %131 : vector<1x16x8xf32> to vector<8x16x8xf32>
    %134 = arith.mulf %132, %133 : vector<8x16x8xf32>
    %135 = vector.broadcast %109 : vector<8x1x1xf32> to vector<8x16x8xf32>
    %136 = arith.addf %134, %135 : vector<8x16x8xf32>
    %cst_47 = arith.constant 1.000000e+00 : f32
    %137 = vector.broadcast %cst_47 : f32 to vector<8x16x8xf32>
    %138 = arith.addf %136, %137 : vector<8x16x8xf32>
    %cst_48 = arith.constant 7.500000e+00 : f32
    %139 = vector.broadcast %cst_48 : f32 to vector<8x16x8xf32>
    %140 = arith.mulf %138, %139 : vector<8x16x8xf32>
    %141 = vector.shape_cast %19 : vector<16x8xf32> to vector<1x16x8xf32>
    %142 = vector.broadcast %141 : vector<1x16x8xf32> to vector<8x16x8xf32>
    %143 = arith.subf %140, %142 : vector<8x16x8xf32>
    %144 = math.absf %143 : vector<8x16x8xf32>
    %cst_49 = arith.constant 1.000000e+00 : f32
    %145 = vector.broadcast %cst_49 : f32 to vector<8x16x8xf32>
    %146 = arith.subf %145, %144 : vector<8x16x8xf32>
    %cst_50 = arith.constant 0.000000e+00 : f32
    %147 = vector.broadcast %cst_50 : f32 to vector<8x16x8xf32>
    %148 = arith.maximumf %147, %146 : vector<8x16x8xf32>
    %cst_51 = arith.constant 1.000000e+00 : f32
    %149 = vector.broadcast %cst_51 : f32 to vector<8x16x16xf32>
    %150 = arith.subf %149, %102 : vector<8x16x16xf32>
    "tpu.trace_start"() <{level = 10 : i32, message = "fwh,fhq->fwq"}> : () -> ()
    %cst_52 = arith.constant dense<0.000000e+00> : vector<8x16x8xf32>
    %151 = tpu.matmul %150, %148, %cst_52 {dimension_numbers = #tpu.dot_dimension_numbers<[2], [1], [1], [2], [0, 0, 0, 1, 1, 2], [0], [0]>} : vector<8x16x16xf32>, vector<8x16x8xf32>, vector<8x16x8xf32> -> vector<8x16x8xf32>
    "tpu.trace_stop"() : () -> ()
    "tpu.trace_start"() <{level = 10 : i32, message = "fpw,fwq->fpq"}> : () -> ()
    %cst_53 = arith.constant dense<0.000000e+00> : vector<8x8x8xf32>
    %152 = tpu.matmul %130, %151, %cst_53 {dimension_numbers = #tpu.dot_dimension_numbers<[2], [1], [1], [2], [0, 0, 0, 1, 1, 2], [0], [0]>} : vector<8x8x16xf32>, vector<8x16x8xf32>, vector<8x8x8xf32> -> vector<8x8x8xf32>
    "tpu.trace_stop"() : () -> ()
    %cst_54 = arith.constant 1.000000e+00 : f32
    %153 = vector.broadcast %cst_54 : f32 to vector<8x8x8xf32>
    %154 = arith.subf %153, %152 : vector<8x8x8xf32>
    "tpu.trace_start"() <{level = 10 : i32, message = "fwh,fhq->fwq"}> : () -> ()
    %cst_55 = arith.constant dense<0.000000e+00> : vector<8x16x8xf32>
    %155 = tpu.matmul %101, %148, %cst_55 {dimension_numbers = #tpu.dot_dimension_numbers<[2], [1], [1], [2], [0, 0, 0, 1, 1, 2], [0], [0]>} : vector<8x16x16xf32>, vector<8x16x8xf32>, vector<8x16x8xf32> -> vector<8x16x8xf32>
    "tpu.trace_stop"() : () -> ()
    "tpu.trace_start"() <{level = 10 : i32, message = "fpw,fwq->fpq"}> : () -> ()
    %cst_56 = arith.constant dense<0.000000e+00> : vector<8x8x8xf32>
    %156 = tpu.matmul %130, %155, %cst_56 {dimension_numbers = #tpu.dot_dimension_numbers<[2], [1], [1], [2], [0, 0, 0, 1, 1, 2], [0], [0]>} : vector<8x8x16xf32>, vector<8x16x8xf32>, vector<8x8x8xf32> -> vector<8x8x8xf32>
    "tpu.trace_stop"() : () -> ()
    %cst_57 = arith.constant 1.000000e+00 : f32
    %157 = vector.broadcast %cst_57 : f32 to vector<8x1x1xf32>
    %158 = arith.divf %157, %112 : vector<8x1x1xf32>
    %cst_58 = arith.constant 1.000000e+00 : f32
    %159 = vector.broadcast %cst_58 : f32 to vector<8x1x1xf32>
    %160 = arith.divf %159, %105 : vector<8x1x1xf32>
    %161 = vector.shape_cast %27 : vector<16x1xf32> to vector<1x16x1xf32>
    %162 = vector.broadcast %158 : vector<8x1x1xf32> to vector<8x16x1xf32>
    %163 = vector.broadcast %161 : vector<1x16x1xf32> to vector<8x16x1xf32>
    %164 = arith.mulf %162, %163 : vector<8x16x1xf32>
    %cst_59 = arith.constant 0.000000e+00 : f32
    %165 = vector.broadcast %cst_59 : f32 to vector<8x1x1xf32>
    %166 = arith.subf %165, %111 : vector<8x1x1xf32>
    %167 = arith.mulf %166, %158 : vector<8x1x1xf32>
    %168 = vector.broadcast %167 : vector<8x1x1xf32> to vector<8x16x1xf32>
    %169 = arith.addf %164, %168 : vector<8x16x1xf32>
    %cst_60 = arith.constant 1.000000e+00 : f32
    %170 = vector.broadcast %cst_60 : f32 to vector<8x16x1xf32>
    %171 = arith.addf %169, %170 : vector<8x16x1xf32>
    %cst_61 = arith.constant 7.500000e+00 : f32
    %172 = vector.broadcast %cst_61 : f32 to vector<8x16x1xf32>
    %173 = arith.mulf %171, %172 : vector<8x16x1xf32>
    %cst_62 = arith.constant 1.000000e+00 : f32
    %174 = vector.broadcast %cst_62 : f32 to vector<8x16x1xf32>
    %175 = arith.addf %173, %174 : vector<8x16x1xf32>
    %cst_63 = arith.constant 1.600000e+01 : f32
    %176 = vector.broadcast %cst_63 : f32 to vector<8x16x1xf32>
    %177 = arith.subf %176, %173 : vector<8x16x1xf32>
    %178 = arith.minimumf %175, %177 : vector<8x16x1xf32>
    %cst_64 = arith.constant 0.000000e+00 : f32
    %cst_65 = arith.constant 1.000000e+00 : f32
    %179 = vector.broadcast %cst_64 : f32 to vector<8x16x1xf32>
    %180 = arith.maximumf %179, %178 : vector<8x16x1xf32>
    %181 = vector.broadcast %cst_65 : f32 to vector<8x16x1xf32>
    %182 = arith.minimumf %181, %180 : vector<8x16x1xf32>
    %183 = vector.shape_cast %35 : vector<1x16xf32> to vector<1x1x16xf32>
    %184 = vector.broadcast %160 : vector<8x1x1xf32> to vector<8x1x16xf32>
    %185 = vector.broadcast %183 : vector<1x1x16xf32> to vector<8x1x16xf32>
    %186 = arith.mulf %184, %185 : vector<8x1x16xf32>
    %cst_66 = arith.constant 0.000000e+00 : f32
    %187 = vector.broadcast %cst_66 : f32 to vector<8x1x1xf32>
    %188 = arith.subf %187, %109 : vector<8x1x1xf32>
    %189 = arith.mulf %188, %160 : vector<8x1x1xf32>
    %190 = vector.broadcast %189 : vector<8x1x1xf32> to vector<8x1x16xf32>
    %191 = arith.addf %186, %190 : vector<8x1x16xf32>
    %cst_67 = arith.constant 1.000000e+00 : f32
    %192 = vector.broadcast %cst_67 : f32 to vector<8x1x16xf32>
    %193 = arith.addf %191, %192 : vector<8x1x16xf32>
    %cst_68 = arith.constant 7.500000e+00 : f32
    %194 = vector.broadcast %cst_68 : f32 to vector<8x1x16xf32>
    %195 = arith.mulf %193, %194 : vector<8x1x16xf32>
    %cst_69 = arith.constant 1.000000e+00 : f32
    %196 = vector.broadcast %cst_69 : f32 to vector<8x1x16xf32>
    %197 = arith.addf %195, %196 : vector<8x1x16xf32>
    %cst_70 = arith.constant 1.600000e+01 : f32
    %198 = vector.broadcast %cst_70 : f32 to vector<8x1x16xf32>
    %199 = arith.subf %198, %195 : vector<8x1x16xf32>
    %200 = arith.minimumf %197, %199 : vector<8x1x16xf32>
    %cst_71 = arith.constant 0.000000e+00 : f32
    %cst_72 = arith.constant 1.000000e+00 : f32
    %201 = vector.broadcast %cst_71 : f32 to vector<8x1x16xf32>
    %202 = arith.maximumf %201, %200 : vector<8x1x16xf32>
    %203 = vector.broadcast %cst_72 : f32 to vector<8x1x16xf32>
    %204 = arith.minimumf %203, %202 : vector<8x1x16xf32>
    %205 = vector.broadcast %182 : vector<8x16x1xf32> to vector<8x16x16xf32>
    %206 = vector.broadcast %204 : vector<8x1x16xf32> to vector<8x16x16xf32>
    %207 = arith.mulf %205, %206 : vector<8x16x16xf32>
    %208 = arith.addf %102, %207 : vector<8x16x16xf32>
    %cst_73 = arith.constant 0.000000e+00 : f32
    %cst_74 = arith.constant 1.000000e+00 : f32
    %209 = vector.broadcast %cst_73 : f32 to vector<8x16x16xf32>
    %210 = arith.maximumf %209, %208 : vector<8x16x16xf32>
    %211 = vector.broadcast %cst_74 : f32 to vector<8x16x16xf32>
    %212 = arith.minimumf %211, %210 : vector<8x16x16xf32>
    %213 = vector.shape_cast %50 : vector<8x8xf32> to vector<1x8x8xf32>
    %214 = vector.broadcast %213 : vector<1x8x8xf32> to vector<8x8x8xf32>
    %215 = arith.subf %156, %214 : vector<8x8x8xf32>
    %216 = vector.shape_cast %52 : vector<8x8xf32> to vector<1x8x8xf32>
    %217 = vector.broadcast %216 : vector<1x8x8xf32> to vector<8x8x8xf32>
    %218 = arith.mulf %215, %217 : vector<8x8x8xf32>
    %219 = arith.mulf %218, %218 : vector<8x8x8xf32>
    %cst_75 = arith.constant -5.000000e-01 : f32
    %220 = vector.broadcast %cst_75 : f32 to vector<8x8x8xf32>
    %221 = arith.mulf %220, %219 : vector<8x8x8xf32>
    %222 = vector.shape_cast %54 : vector<8x8xf32> to vector<1x8x8xf32>
    %223 = vector.broadcast %222 : vector<1x8x8xf32> to vector<8x8x8xf32>
    %224 = arith.addf %221, %223 : vector<8x8x8xf32>
    %225 = arith.mulf %105, %112 : vector<8x1x1xf32>
    %cst_76 = arith.constant 1.000000e+00 : f32
    %226 = vector.broadcast %cst_76 : f32 to vector<8x8x8xf32>
    %227 = arith.subf %226, %154 : vector<8x8x8xf32>
    %228 = vector.broadcast %225 : vector<8x1x1xf32> to vector<8x8x8xf32>
    %229 = arith.mulf %228, %227 : vector<8x8x8xf32>
    %230 = arith.mulf %229, %224 : vector<8x8x8xf32>
    %231 = arith.addf %103, %230 : vector<8x8x8xf32>
    %cst_77 = arith.constant 1.562500e-01 : f32
    %232 = vector.broadcast %cst_77 : f32 to vector<8x8x8xf32>
    %233 = arith.mulf %232, %154 : vector<8x8x8xf32>
    %234 = arith.subf %231, %233 : vector<8x8x8xf32>
    %235 = vector.extract_strided_slice %79 {offsets = [0, 4], sizes = [8, 1], strides = [1, 1]} : vector<8x8xf32> to vector<8x1xf32>
    %236 = vector.shape_cast %235 : vector<8x1xf32> to vector<8x1x1xf32>
    %237 = vector.extract_strided_slice %79 {offsets = [0, 5], sizes = [8, 1], strides = [1, 1]} : vector<8x8xf32> to vector<8x1xf32>
    %238 = vector.shape_cast %237 : vector<8x1xf32> to vector<8x1x1xf32>
    %239 = vector.extract_strided_slice %79 {offsets = [0, 6], sizes = [8, 1], strides = [1, 1]} : vector<8x8xf32> to vector<8x1xf32>
    %240 = vector.shape_cast %239 : vector<8x1xf32> to vector<8x1x1xf32>
    %241 = vector.extract_strided_slice %79 {offsets = [0, 7], sizes = [8, 1], strides = [1, 1]} : vector<8x8xf32> to vector<8x1xf32>
    %242 = vector.shape_cast %241 : vector<8x1xf32> to vector<8x1x1xf32>
    %243 = arith.mulf %236, %238 : vector<8x1x1xf32>
    %244 = vector.shape_cast %7 : vector<8x16xf32> to vector<1x8x16xf32>
    %245 = vector.broadcast %243 : vector<8x1x1xf32> to vector<8x8x16xf32>
    %246 = vector.broadcast %244 : vector<1x8x16xf32> to vector<8x8x16xf32>
    %247 = arith.mulf %245, %246 : vector<8x8x16xf32>
    %248 = vector.broadcast %242 : vector<8x1x1xf32> to vector<8x8x16xf32>
    %249 = arith.addf %247, %248 : vector<8x8x16xf32>
    %cst_78 = arith.constant 1.000000e+00 : f32
    %250 = vector.broadcast %cst_78 : f32 to vector<8x8x16xf32>
    %251 = arith.addf %249, %250 : vector<8x8x16xf32>
    %cst_79 = arith.constant 7.500000e+00 : f32
    %252 = vector.broadcast %cst_79 : f32 to vector<8x8x16xf32>
    %253 = arith.mulf %251, %252 : vector<8x8x16xf32>
    %254 = vector.shape_cast %9 : vector<8x16xf32> to vector<1x8x16xf32>
    %255 = vector.broadcast %254 : vector<1x8x16xf32> to vector<8x8x16xf32>
    %256 = arith.subf %253, %255 : vector<8x8x16xf32>
    %257 = math.absf %256 : vector<8x8x16xf32>
    %cst_80 = arith.constant 1.000000e+00 : f32
    %258 = vector.broadcast %cst_80 : f32 to vector<8x8x16xf32>
    %259 = arith.subf %258, %257 : vector<8x8x16xf32>
    %cst_81 = arith.constant 0.000000e+00 : f32
    %260 = vector.broadcast %cst_81 : f32 to vector<8x8x16xf32>
    %261 = arith.maximumf %260, %259 : vector<8x8x16xf32>
    %262 = vector.shape_cast %17 : vector<16x8xf32> to vector<1x16x8xf32>
    %263 = vector.broadcast %236 : vector<8x1x1xf32> to vector<8x16x8xf32>
    %264 = vector.broadcast %262 : vector<1x16x8xf32> to vector<8x16x8xf32>
    %265 = arith.mulf %263, %264 : vector<8x16x8xf32>
    %266 = vector.broadcast %240 : vector<8x1x1xf32> to vector<8x16x8xf32>
    %267 = arith.addf %265, %266 : vector<8x16x8xf32>
    %cst_82 = arith.constant 1.000000e+00 : f32
    %268 = vector.broadcast %cst_82 : f32 to vector<8x16x8xf32>
    %269 = arith.addf %267, %268 : vector<8x16x8xf32>
    %cst_83 = arith.constant 7.500000e+00 : f32
    %270 = vector.broadcast %cst_83 : f32 to vector<8x16x8xf32>
    %271 = arith.mulf %269, %270 : vector<8x16x8xf32>
    %272 = vector.shape_cast %19 : vector<16x8xf32> to vector<1x16x8xf32>
    %273 = vector.broadcast %272 : vector<1x16x8xf32> to vector<8x16x8xf32>
    %274 = arith.subf %271, %273 : vector<8x16x8xf32>
    %275 = math.absf %274 : vector<8x16x8xf32>
    %cst_84 = arith.constant 1.000000e+00 : f32
    %276 = vector.broadcast %cst_84 : f32 to vector<8x16x8xf32>
    %277 = arith.subf %276, %275 : vector<8x16x8xf32>
    %cst_85 = arith.constant 0.000000e+00 : f32
    %278 = vector.broadcast %cst_85 : f32 to vector<8x16x8xf32>
    %279 = arith.maximumf %278, %277 : vector<8x16x8xf32>
    %cst_86 = arith.constant 1.000000e+00 : f32
    %280 = vector.broadcast %cst_86 : f32 to vector<8x16x16xf32>
    %281 = arith.subf %280, %212 : vector<8x16x16xf32>
    "tpu.trace_start"() <{level = 10 : i32, message = "fwh,fhq->fwq"}> : () -> ()
    %cst_87 = arith.constant dense<0.000000e+00> : vector<8x16x8xf32>
    %282 = tpu.matmul %281, %279, %cst_87 {dimension_numbers = #tpu.dot_dimension_numbers<[2], [1], [1], [2], [0, 0, 0, 1, 1, 2], [0], [0]>} : vector<8x16x16xf32>, vector<8x16x8xf32>, vector<8x16x8xf32> -> vector<8x16x8xf32>
    "tpu.trace_stop"() : () -> ()
    "tpu.trace_start"() <{level = 10 : i32, message = "fpw,fwq->fpq"}> : () -> ()
    %cst_88 = arith.constant dense<0.000000e+00> : vector<8x8x8xf32>
    %283 = tpu.matmul %261, %282, %cst_88 {dimension_numbers = #tpu.dot_dimension_numbers<[2], [1], [1], [2], [0, 0, 0, 1, 1, 2], [0], [0]>} : vector<8x8x16xf32>, vector<8x16x8xf32>, vector<8x8x8xf32> -> vector<8x8x8xf32>
    "tpu.trace_stop"() : () -> ()
    %cst_89 = arith.constant 1.000000e+00 : f32
    %284 = vector.broadcast %cst_89 : f32 to vector<8x8x8xf32>
    %285 = arith.subf %284, %283 : vector<8x8x8xf32>
    "tpu.trace_start"() <{level = 10 : i32, message = "fwh,fhq->fwq"}> : () -> ()
    %cst_90 = arith.constant dense<0.000000e+00> : vector<8x16x8xf32>
    %286 = tpu.matmul %101, %279, %cst_90 {dimension_numbers = #tpu.dot_dimension_numbers<[2], [1], [1], [2], [0, 0, 0, 1, 1, 2], [0], [0]>} : vector<8x16x16xf32>, vector<8x16x8xf32>, vector<8x16x8xf32> -> vector<8x16x8xf32>
    "tpu.trace_stop"() : () -> ()
    "tpu.trace_start"() <{level = 10 : i32, message = "fpw,fwq->fpq"}> : () -> ()
    %cst_91 = arith.constant dense<0.000000e+00> : vector<8x8x8xf32>
    %287 = tpu.matmul %261, %286, %cst_91 {dimension_numbers = #tpu.dot_dimension_numbers<[2], [1], [1], [2], [0, 0, 0, 1, 1, 2], [0], [0]>} : vector<8x8x16xf32>, vector<8x16x8xf32>, vector<8x8x8xf32> -> vector<8x8x8xf32>
    "tpu.trace_stop"() : () -> ()
    %cst_92 = arith.constant 1.000000e+00 : f32
    %288 = vector.broadcast %cst_92 : f32 to vector<8x1x1xf32>
    %289 = arith.divf %288, %243 : vector<8x1x1xf32>
    %cst_93 = arith.constant 1.000000e+00 : f32
    %290 = vector.broadcast %cst_93 : f32 to vector<8x1x1xf32>
    %291 = arith.divf %290, %236 : vector<8x1x1xf32>
    %292 = vector.shape_cast %27 : vector<16x1xf32> to vector<1x16x1xf32>
    %293 = vector.broadcast %289 : vector<8x1x1xf32> to vector<8x16x1xf32>
    %294 = vector.broadcast %292 : vector<1x16x1xf32> to vector<8x16x1xf32>
    %295 = arith.mulf %293, %294 : vector<8x16x1xf32>
    %cst_94 = arith.constant 0.000000e+00 : f32
    %296 = vector.broadcast %cst_94 : f32 to vector<8x1x1xf32>
    %297 = arith.subf %296, %242 : vector<8x1x1xf32>
    %298 = arith.mulf %297, %289 : vector<8x1x1xf32>
    %299 = vector.broadcast %298 : vector<8x1x1xf32> to vector<8x16x1xf32>
    %300 = arith.addf %295, %299 : vector<8x16x1xf32>
    %cst_95 = arith.constant 1.000000e+00 : f32
    %301 = vector.broadcast %cst_95 : f32 to vector<8x16x1xf32>
    %302 = arith.addf %300, %301 : vector<8x16x1xf32>
    %cst_96 = arith.constant 7.500000e+00 : f32
    %303 = vector.broadcast %cst_96 : f32 to vector<8x16x1xf32>
    %304 = arith.mulf %302, %303 : vector<8x16x1xf32>
    %cst_97 = arith.constant 1.000000e+00 : f32
    %305 = vector.broadcast %cst_97 : f32 to vector<8x16x1xf32>
    %306 = arith.addf %304, %305 : vector<8x16x1xf32>
    %cst_98 = arith.constant 1.600000e+01 : f32
    %307 = vector.broadcast %cst_98 : f32 to vector<8x16x1xf32>
    %308 = arith.subf %307, %304 : vector<8x16x1xf32>
    %309 = arith.minimumf %306, %308 : vector<8x16x1xf32>
    %cst_99 = arith.constant 0.000000e+00 : f32
    %cst_100 = arith.constant 1.000000e+00 : f32
    %310 = vector.broadcast %cst_99 : f32 to vector<8x16x1xf32>
    %311 = arith.maximumf %310, %309 : vector<8x16x1xf32>
    %312 = vector.broadcast %cst_100 : f32 to vector<8x16x1xf32>
    %313 = arith.minimumf %312, %311 : vector<8x16x1xf32>
    %314 = vector.shape_cast %35 : vector<1x16xf32> to vector<1x1x16xf32>
    %315 = vector.broadcast %291 : vector<8x1x1xf32> to vector<8x1x16xf32>
    %316 = vector.broadcast %314 : vector<1x1x16xf32> to vector<8x1x16xf32>
    %317 = arith.mulf %315, %316 : vector<8x1x16xf32>
    %cst_101 = arith.constant 0.000000e+00 : f32
    %318 = vector.broadcast %cst_101 : f32 to vector<8x1x1xf32>
    %319 = arith.subf %318, %240 : vector<8x1x1xf32>
    %320 = arith.mulf %319, %291 : vector<8x1x1xf32>
    %321 = vector.broadcast %320 : vector<8x1x1xf32> to vector<8x1x16xf32>
    %322 = arith.addf %317, %321 : vector<8x1x16xf32>
    %cst_102 = arith.constant 1.000000e+00 : f32
    %323 = vector.broadcast %cst_102 : f32 to vector<8x1x16xf32>
    %324 = arith.addf %322, %323 : vector<8x1x16xf32>
    %cst_103 = arith.constant 7.500000e+00 : f32
    %325 = vector.broadcast %cst_103 : f32 to vector<8x1x16xf32>
    %326 = arith.mulf %324, %325 : vector<8x1x16xf32>
    %cst_104 = arith.constant 1.000000e+00 : f32
    %327 = vector.broadcast %cst_104 : f32 to vector<8x1x16xf32>
    %328 = arith.addf %326, %327 : vector<8x1x16xf32>
    %cst_105 = arith.constant 1.600000e+01 : f32
    %329 = vector.broadcast %cst_105 : f32 to vector<8x1x16xf32>
    %330 = arith.subf %329, %326 : vector<8x1x16xf32>
    %331 = arith.minimumf %328, %330 : vector<8x1x16xf32>
    %cst_106 = arith.constant 0.000000e+00 : f32
    %cst_107 = arith.constant 1.000000e+00 : f32
    %332 = vector.broadcast %cst_106 : f32 to vector<8x1x16xf32>
    %333 = arith.maximumf %332, %331 : vector<8x1x16xf32>
    %334 = vector.broadcast %cst_107 : f32 to vector<8x1x16xf32>
    %335 = arith.minimumf %334, %333 : vector<8x1x16xf32>
    %336 = vector.broadcast %313 : vector<8x16x1xf32> to vector<8x16x16xf32>
    %337 = vector.broadcast %335 : vector<8x1x16xf32> to vector<8x16x16xf32>
    %338 = arith.mulf %336, %337 : vector<8x16x16xf32>
    %339 = arith.addf %212, %338 : vector<8x16x16xf32>
    %cst_108 = arith.constant 0.000000e+00 : f32
    %cst_109 = arith.constant 1.000000e+00 : f32
    %340 = vector.broadcast %cst_108 : f32 to vector<8x16x16xf32>
    %341 = arith.maximumf %340, %339 : vector<8x16x16xf32>
    %342 = vector.broadcast %cst_109 : f32 to vector<8x16x16xf32>
    %343 = arith.minimumf %342, %341 : vector<8x16x16xf32>
    %344 = vector.shape_cast %50 : vector<8x8xf32> to vector<1x8x8xf32>
    %345 = vector.broadcast %344 : vector<1x8x8xf32> to vector<8x8x8xf32>
    %346 = arith.subf %287, %345 : vector<8x8x8xf32>
    %347 = vector.shape_cast %52 : vector<8x8xf32> to vector<1x8x8xf32>
    %348 = vector.broadcast %347 : vector<1x8x8xf32> to vector<8x8x8xf32>
    %349 = arith.mulf %346, %348 : vector<8x8x8xf32>
    %350 = arith.mulf %349, %349 : vector<8x8x8xf32>
    %cst_110 = arith.constant -5.000000e-01 : f32
    %351 = vector.broadcast %cst_110 : f32 to vector<8x8x8xf32>
    %352 = arith.mulf %351, %350 : vector<8x8x8xf32>
    %353 = vector.shape_cast %54 : vector<8x8xf32> to vector<1x8x8xf32>
    %354 = vector.broadcast %353 : vector<1x8x8xf32> to vector<8x8x8xf32>
    %355 = arith.addf %352, %354 : vector<8x8x8xf32>
    %356 = arith.mulf %236, %243 : vector<8x1x1xf32>
    %cst_111 = arith.constant 1.000000e+00 : f32
    %357 = vector.broadcast %cst_111 : f32 to vector<8x8x8xf32>
    %358 = arith.subf %357, %285 : vector<8x8x8xf32>
    %359 = vector.broadcast %356 : vector<8x1x1xf32> to vector<8x8x8xf32>
    %360 = arith.mulf %359, %358 : vector<8x8x8xf32>
    %361 = arith.mulf %360, %355 : vector<8x8x8xf32>
    %362 = arith.addf %234, %361 : vector<8x8x8xf32>
    %cst_112 = arith.constant 1.562500e-01 : f32
    %363 = vector.broadcast %cst_112 : f32 to vector<8x8x8xf32>
    %364 = arith.mulf %363, %285 : vector<8x8x8xf32>
    %365 = arith.subf %362, %364 : vector<8x8x8xf32>
    %366 = vector.shape_cast %43 : vector<16x16xf32> to vector<1x16x16xf32>
    %367 = vector.broadcast %366 : vector<1x16x16xf32> to vector<8x16x16xf32>
    %368 = arith.subf %101, %367 : vector<8x16x16xf32>
    %369 = vector.shape_cast %45 : vector<16x16xf32> to vector<1x16x16xf32>
    %370 = vector.broadcast %369 : vector<1x16x16xf32> to vector<8x16x16xf32>
    %371 = arith.mulf %368, %370 : vector<8x16x16xf32>
    %372 = arith.mulf %371, %371 : vector<8x16x16xf32>
    %cst_113 = arith.constant -5.000000e-01 : f32
    %373 = vector.broadcast %cst_113 : f32 to vector<8x16x16xf32>
    %374 = arith.mulf %373, %372 : vector<8x16x16xf32>
    %375 = vector.shape_cast %47 : vector<16x16xf32> to vector<1x16x16xf32>
    %376 = vector.broadcast %375 : vector<1x16x16xf32> to vector<8x16x16xf32>
    %377 = arith.addf %374, %376 : vector<8x16x16xf32>
    %cst_114 = arith.constant 1.000000e+00 : f32
    %378 = vector.broadcast %cst_114 : f32 to vector<8x16x16xf32>
    %379 = arith.subf %378, %343 : vector<8x16x16xf32>
    %380 = arith.mulf %379, %377 : vector<8x16x16xf32>
    %cst_115 = arith.constant dense<0.000000e+00> : vector<8x8xf32>
    %381 = vector.multi_reduction <add>, %365, %cst_115 [2] : vector<8x8x8xf32> to vector<8x8xf32>
    %cst_116 = arith.constant dense<0.000000e+00> : vector<8xf32>
    %382 = vector.multi_reduction <add>, %381, %cst_116 [1] : vector<8x8xf32> to vector<8xf32>
    %383 = vector.shape_cast %382 : vector<8xf32> to vector<8x1xf32>
    %cst_117 = arith.constant dense<0.000000e+00> : vector<8x16xf32>
    %384 = vector.multi_reduction <add>, %380, %cst_117 [2] : vector<8x16x16xf32> to vector<8x16xf32>
    %cst_118 = arith.constant dense<0.000000e+00> : vector<8xf32>
    %385 = vector.multi_reduction <add>, %384, %cst_118 [1] : vector<8x16xf32> to vector<8xf32>
    %386 = vector.shape_cast %385 : vector<8xf32> to vector<8x1xf32>
    %387 = arith.addf %383, %386 : vector<8x1xf32>
    %cst_119 = arith.constant 4.60517025 : f32
    %388 = vector.broadcast %cst_119 : f32 to vector<8x1xf32>
    %389 = arith.addf %387, %388 : vector<8x1xf32>
    %390 = arith.subf %389, %100 : vector<8x1xf32>
    %391 = vector.shape_cast %390 : vector<8x1xf32> to vector<8x1xf32>
    %392 = vector.broadcast %391 : vector<8x1xf32> to vector<8x128xf32>
    %c0_120 = arith.constant 0 : index
    %c0_121 = arith.constant 0 : index
    %393 = vector.load %arg9[%c0_120, %c0_121] : memref<8x128xf32, #tpu.memory_space<vmem>>, vector<8x128xf32>
    tpu.vector_store %arg9[%c0_120, %c0_121], %392 {strides = array<i32>} : memref<8x128xf32, #tpu.memory_space<vmem>>, vector<8x128xf32>,
    return
  }
  func.func @transform_0(%arg0: i32) -> (i32, i32) {
    %c0_i32 = arith.constant 0 : i32
    %c0_i32_0 = arith.constant 0 : i32
    return %arg0, %c0_i32 : i32, i32
  }
  func.func @transform_1(%arg0: i32) -> (i32, i32) {
    %c0_i32 = arith.constant 0 : i32
    %c0_i32_0 = arith.constant 0 : i32
    return %arg0, %c0_i32 : i32, i32
  }
  func.func @transform_2(%arg0: i32) -> (i32, i32, i32) {
    %c0_i32 = arith.constant 0 : i32
    %c0_i32_0 = arith.constant 0 : i32
    %c0_i32_1 = arith.constant 0 : i32
    return %arg0, %c0_i32, %c0_i32_0 : i32, i32, i32
  }
  func.func @transform_3(%arg0: i32) -> (i32, i32) {
    %c0_i32 = arith.constant 0 : i32
    %c0_i32_0 = arith.constant 0 : i32
    %c0_i32_1 = arith.constant 0 : i32
    return %c0_i32, %c0_i32_0 : i32, i32
  }
  func.func @transform_4(%arg0: i32) -> (i32, i32) {
    %c0_i32 = arith.constant 0 : i32
    %c0_i32_0 = arith.constant 0 : i32
    %c0_i32_1 = arith.constant 0 : i32
    return %c0_i32, %c0_i32_0 : i32, i32
  }
  func.func @transform_5(%arg0: i32) -> (i32, i32) {
    %c0_i32 = arith.constant 0 : i32
    %c0_i32_0 = arith.constant 0 : i32
    %c0_i32_1 = arith.constant 0 : i32
    return %c0_i32, %c0_i32_0 : i32, i32
  }
  func.func @transform_6(%arg0: i32) -> (i32, i32, i32) {
    %c0_i32 = arith.constant 0 : i32
    %c0_i32_0 = arith.constant 0 : i32
    %c0_i32_1 = arith.constant 0 : i32
    %c0_i32_2 = arith.constant 0 : i32
    return %c0_i32, %c0_i32_0, %c0_i32_1 : i32, i32, i32
  }
  func.func @transform_7(%arg0: i32) -> (i32, i32, i32) {
    %c0_i32 = arith.constant 0 : i32
    %c0_i32_0 = arith.constant 0 : i32
    %c0_i32_1 = arith.constant 0 : i32
    %c0_i32_2 = arith.constant 0 : i32
    return %c0_i32, %c0_i32_0, %c0_i32_1 : i32, i32, i32
  }
  func.func @transform_8(%arg0: i32) -> (i32, i32) {
    %c0_i32 = arith.constant 0 : i32
    %c0_i32_0 = arith.constant 0 : i32
    return %arg0, %c0_i32 : i32, i32
  }
}

</mosaic_0001>

<bundles_post_ra>
// kernel: tpu_custom_call.1
= control target key start
LH: loop header
LB: loop body
LE: loop exit
PB: predicated region body
PF: predicated region fallthrough
CT: control target
= control target key end

     0   :  { %v11198_v7 = vmov 0.0   ;;  %vm8950_vm0 = vmmov 0   ;;  %vm104_vm1 = vcmask 1040384   ;;  %vm100_vm2 = vcmask 7168   ;;  %s11189_s0 = inlined_call_operand.vmem [shape: f32[8,257], index: 0, kind: input, shape index: {}]   ;;  %s11190_s1 = inlined_call_operand.vmem [shape: f32[8,8], index: 1, kind: input, shape index: {}]   ;;  %s11191_s2 = inlined_call_operand.vmem [shape: f32[8,16,16], index: 2, kind: input, shape index: {}]   ;;  %s11192_s3 = inlined_call_operand.vmem [shape: f32[257,64], index: 3, kind: input, shape index: {}]   ;;  %s11193_s4 = inlined_call_operand.vmem [shape: f32[64,16], index: 4, kind: input, shape index: {}]   ;;  %s11194_s5 = inlined_call_operand.vmem [shape: f32[4,16], index: 5, kind: input, shape index: {}]   ;;  %s11195_s6 = inlined_call_operand.vmem [shape: f32[3,16,16], index: 6, kind: input, shape index: {}]   ;;  %s11196_s7 = inlined_call_operand.vmem [shape: f32[3,8,8], index: 7, kind: input, shape index: {}]   ;;  %s11197_s8 = inlined_call_operand.hbm [shape: f32[8,128], index: 8, kind: output, shape index: {}]  }
   0x1   :  { %v83_v0 = vld [vmem:[%s11192_s3 + $0x80] sm:$0xff]  ;;  %v84_v1 = vld [vmem:[%s11192_s3 + $0x88] sm:$0xff]  ;;  %v85_v5 = vld [vmem:[%s11192_s3 + $0x90] sm:$0xff]  ;;  %8033 = vmatprep.subr.mxu1 %v11198_v7  ;;  %8035 = vmatprep.mubr.msk.f32.mxu1 %vm8950_vm0, %v11198_v7 }
   0x2   :  { %v67_v2 = vld [vmem:[%s11192_s3] sm:$0xff]  ;;  %v8505_v3 = vpack.c.bf16 %v84_v1, %v83_v0  ;;  %v68_v4 = vld [vmem:[%s11192_s3 + $0x8] sm:$0xff]  ;;  %v86_v6 = vld [vmem:[%s11192_s3 + $0x98] sm:$0xff] }
   0x3   :  { %v8507_v8 = vpack.c.bf16 %v68_v4, %v67_v2  ;;  %v8509_v9 = vpack.c.bf16 %v86_v6, %v85_v5  ;;  %v69_v10 = vld [vmem:[%s11192_s3 + $0x10] sm:$0xff]  ;;  %v70_v11 = vld [vmem:[%s11192_s3 + $0x18] sm:$0xff]  ;;  %v87_v12 = vld [vmem:[%s11192_s3 + $0xa0] sm:$0xff] }
   0x4   :  { %8506 = vmatprep.subr.bf16.mxu0 %v8505_v3  ;;  %v88_v13 = vld [vmem:[%s11192_s3 + $0xa8] sm:$0xff]  ;;  %v8511_v14 = vpack.c.bf16 %v70_v11, %v69_v10  ;;  %v71_v16 = vld [vmem:[%s11192_s3 + $0x20] sm:$0xff]  ;;  %v89_v18 = vld [vmem:[%s11192_s3 + $0xb0] sm:$0xff] }
   0x5   :  { %8508 = vmatpush3.bf16.msra.mxu0 %v8507_v8  ;;  %v8513_v15 = vpack.c.bf16 %v88_v13, %v87_v12  ;;  %v72_v17 = vld [vmem:[%s11192_s3 + $0x28] sm:$0xff]  ;;  %v90_v19 = vld [vmem:[%s11192_s3 + $0xb8] sm:$0xff]  ;;  %v73_v22 = vld [vmem:[%s11192_s3 + $0x30] sm:$0xff] }
   0x6   :  { %8510 = vmatprep.subr.bf16.mxu0 %v8509_v9  ;;  %v8515_v20 = vpack.c.bf16 %v72_v17, %v71_v16  ;;  %v8517_v21 = vpack.c.bf16 %v90_v19, %v89_v18  ;;  %v74_v23 = vld [vmem:[%s11192_s3 + $0x38] sm:$0xff]  ;;  %v91_v24 = vld [vmem:[%s11192_s3 + $0xc0] sm:$0xff]  ;;  %v92_v25 = vld [vmem:[%s11192_s3 + $0xc8] sm:$0xff] }
   0x7   :  { %v64_v26 = vld [vmem:[%s11189_s0 + $0x8] sm:$0xff]  ;;  %v75_v27 = vld [vmem:[%s11192_s3 + $0x40] sm:$0xff]  ;;  %v65_v29 = vld [vmem:[%s11189_s0 + $0x10] sm:$0xff]  ;;  %v8519_v30 = vpack.c.bf16 %v74_v23, %v73_v22  ;;  %v8521_v34 = vpack.c.bf16 %v92_v25, %v91_v24 }
   0x8   :  { %172 = vmatprep.mubr.f32.mxu0 %v64_v26  ;;  %v99_v28 = vld [vmem:[%s11192_s3 + $0x100] sm:$0x1]  ;;  %v250_v32 = vld [vmem:[%s11193_s4 + $0x8] sm:$0xff]  ;;  %v251_v33 = vld [vmem:[%s11193_s4 + $0x10] sm:$0xff] }
   0x9   :  { %8512 = vmatpush3.bf16.msra.mxu0 %v8511_v14  ;;  %8034 = vmatpush3.msk.msra.mxu1 %vm104_vm1, %v99_v28  ;;  %v249_v31 = vld [vmem:[%s11193_s4] sm:$0xff]  ;;  %v76_v35 = vld [vmem:[%s11192_s3 + $0x48] sm:$0xff]  ;;  %v252_v37 = vld [vmem:[%s11193_s4 + $0x18] sm:$0xff] }
   0xa   :  { %8514 = vmatprep.subr.bf16.mxu0 %v8513_v15  ;;  %8036 = vmatmul.mubr.msk.f32.vlgmr.msra.gmra.mrb[0].mxu1 %vm100_vm2, %v65_v29  ;;  %v8538_v36 = vpack.c.bf16 %v250_v32, %v249_v31 }
   0xd   :  { %8516 = vmatpush3.bf16.msra.mxu0 %v8515_v20 }
   0xe   :  { %8518 = vmatprep.subr.bf16.mxu0 %v8517_v21 }
   0xf   :  { %13 = vsyncpa [#allocation3], 0  ;;  %v93_v38 = vld [vmem:[%s11192_s3 + $0xd0] sm:$0xff]  ;;  %v94_v39 = vld [vmem:[%s11192_s3 + $0xd8] sm:$0xff]  ;;  %v11200_v40 = vmov 0.0|0.0   ;;  %8054 = vmatprep.mubr.msk.f32.mxu1 %vm8950_vm0, %v11198_v7  ;;  %v8541_v41 = vpack.c.bf16 %v252_v37, %v251_v33  ;;  %v8523_v42 = vpack.c.bf16 %v76_v35, %v75_v27  ;;  %s8952_s27 = smov 8   ;;  %v30_v11 = vlaneseq }
  0x10   :  { %8537 = vmatprep.subr.bf16.mxu1 %v11200_v40  ;;  %v8525_v43 = vpack.c.bf16 %v94_v39, %v93_v38  ;;  %v77_v44 = vld [vmem:[%s11192_s3 + $0x50] sm:$0xff]  ;;  %v78_v45 = vld [vmem:[%s11192_s3 + $0x58] sm:$0xff]  ;;  %v95_v46 = vld [vmem:[%s11192_s3 + $0xe0] sm:$0xff]  ;;  %vm261_vm3 = vcmask 523264   ;;  %v11202_v29 = vmov 0   ;;  %s8954_s29 = smov 120  }
  0x11   :  { %8539 = vmatpush3.bf16.msra.mxu1 %v8538_v36  ;;  %8520 = vmatpush3.bf16.msra.mxu0 %v8519_v30  ;;  %v96_v47 = vld [vmem:[%s11192_s3 + $0xe8] sm:$0xff]  ;;  %v8527_v48 = vpack.c.bf16 %v78_v45, %v77_v44  ;;  %v79_v50 = vld [vmem:[%s11192_s3 + $0x60] sm:$0xff]  ;;  %v97_v52 = vld [vmem:[%s11192_s3 + $0xf0] sm:$0xff]  ;;  %v9157_v12 = vshrl.u32 %v30_v11, 7  ;;  %v8955_v33 = vmov 1966171168  }
  0x12   :  { %8540 = vmatprep.subr.bf16.mxu1 %v11200_v40  ;;  %8522 = vmatprep.subr.bf16.mxu0 %v8521_v34  ;;  %v8529_v49 = vpack.c.bf16 %v96_v47, %v95_v46  ;;  %v80_v51 = vld [vmem:[%s11192_s3 + $0x68] sm:$0xff]  ;;  %v98_v53 = vld [vmem:[%s11192_s3 + $0xf8] sm:$0xff]  ;;  %v81_v56 = vld [vmem:[%s11192_s3 + $0x70] sm:$0xff]  ;;  %v406_v34 = vunpack.c.l.s4 %v8955_v33  ;;  %vm853_vm4 = vcmask 130048   ;;  %s8957_s30 = smov 127   ;;  %s8960_s9 = smov 3  }
  0x13   :  { %v8531_v54 = vpack.c.bf16 %v80_v51, %v79_v50  ;;  %v8533_v55 = vpack.c.bf16 %v98_v53, %v97_v52  ;;  %v82_v57 = vld [vmem:[%s11192_s3 + $0x78] sm:$0xff]  ;;  %v63_v59 = vld [vmem:[%s11189_s0] sm:$0xff]  ;;  %v254_v61 = vld [vmem:[%s11193_s4 + $0x28] sm:$0xff]  ;;  %11340 = vst [vmem:[#allocation5_spill] sm:$0xff] %v9157_v12  ;;  %v9160_v13 = vsub.s32 0, %v9157_v12  ;;  %v343_v23 = vsub.s32 1, %v9157_v12  ;;  %8791 = vset.pattern.permute.xlu1 %v11202_v29  ;;  %8793 = vset.pattern.permute.xlu0 %v11202_v29 }
  0x14   :  { %v8535_v58 = vpack.c.bf16 %v82_v57, %v81_v56  ;;  %v253_v60 = vld [vmem:[%s11193_s4 + $0x20] sm:$0xff]  ;;  %v255_v63 = vld [vmem:[%s11193_s4 + $0x30] sm:$0xff]  ;;  %v256_v0 = vld [vmem:[%s11193_s4 + $0x38] sm:$0xff]  ;;  %v348_v24 = vsub.s32 2, %v9157_v12  ;;  %v407_v35 = vunpack.c.0.s8 %v406_v34  ;;  %s8961_s10 = smov 2   ;;  %s8962_s0 = smov 125  }
  0x15   :  { %8542 = vmatpush3.bf16.msra.mxu1 %v8541_v41  ;;  %8524 = vmatpush3.bf16.msra.mxu0 %v8523_v42  ;;  %v8544_v62 = vpack.c.bf16 %v254_v61, %v253_v60  ;;  %v8547_v1 = vpack.c.bf16 %v256_v0, %v255_v63  ;;  %v66_v2 = vld [vmem:[%s11190_s1] sm:$0xff]  ;;  %v8958_v60 = vmov 3   ;;  %v8959_v61 = vmov 1.0  }
  0x16   :  { %8543 = vmatprep.subr.bf16.mxu1 %v11200_v40  ;;  %8526 = vmatprep.subr.bf16.mxu0 %v8525_v43  ;;  %v53_v14 = vld [vmem:[%s11194_s5] sm:$0xf]  ;;  %v410_v36 = vsub.s32 %v407_v35, %v9157_v12  ;;  %v9279_v0 = vand.u32 127, %v30_v11  ;;  %vm382_vm5 = vcmask 64512   ;;  %vm7564_vm6 = vcmask 130112  }
  0x17   :  { %352 = vrot.lane.b32.xlu0 %v66_v2, %s8952_s27  ;;  %v260_v15 = vrot.slane %v53_v14, %v9160_v13  ;;  %v344_v25 = vrot.slane %v53_v14, %v343_v23  ;;  %v349_v26 = vrot.slane %v53_v14, %v348_v24  ;;  %vm7473_vm7 = vcmask 1041409  }
  0x18   :  { %11351 = vst [vmem:[#allocation16_spill] sm:$0xff] %v9279_v0  ;;  %vm7475_vm8 = vcmask 1042434   ;;  %vm7477_vm9 = vcmask 1043459   ;;  %vm7479_vm10 = vcmask 1044484   ;;  %vm7481_vm11 = vcmask 1045509  }
  0x19   :  { %8528 = vmatpush3.bf16.msra.mxu0 %v8527_v48  ;;  %8545 = vmatpush3.bf16.msra.mxu1 %v8544_v62  ;;  %vm7483_vm12 = vcmask 1046534   ;;  %vm7485_vm13 = vcmask 1047559  }
  0x1a   :  { %8530 = vmatprep.subr.bf16.mxu0 %v8529_v49  ;;  %8546 = vmatprep.subr.bf16.mxu1 %v11200_v40  ;;  %v11204_v49 = vmov 2  }
  0x1d   :  { %8532 = vmatpush3.bf16.msra.mxu0 %v8531_v54  ;;  %8548 = vmatpush3.bf16.msra.mxu1 %v8547_v1  ;;  %v9282_v1 = vcvt.s32.f32 %v9279_v0 }
  0x1e   :  { %8534 = vmatprep.subr.bf16.mxu0 %v8533_v55 }
  0x1f   :  { %11352 = vst [vmem:[#allocation17_spill] sm:$0xff] %v9282_v1  ;;  %v9285_v2 = vmul.f32 2.0, %v9282_v1 }
  0x21   :  { %8536 = vmatpush3.bf16.msra.mxu0 %v8535_v58  ;;  %11353 = vst [vmem:[#allocation18_spill] sm:$0xff] %v9285_v2 }
  0x24   :  { %173 = vmatmul.mubr.f32.vlgmr.msra.gmra.mrb[0].mxu0 %v63_v59 }
  0x25   :  { %8089 = vmatprep.mubr.msk.f32.mxu0 %vm853_vm4, %v8959_v61 }
  0x89   :  { %v353_v30 = vpop.permute.xlu0 %352 }
  0xdd   :  { %v244_v3 = vpop.f32.mrb[0].mxu1 }
  0xde   :  { %v8037_v4 = vpop.f32.mrb[1].mxu1 }
  0xf7   :  { %v7795_v5 = vpop.f32.mrb[0].mxu0 }
  0xf8   :  { %v7796_v6 = vpop.f32.mrb[1].mxu0 }
  0xf9   :  { %v7797_v8 = vadd.f32 %v7796_v6, %v7795_v5 }
  0xfb   :  { %v245_v9 = vadd.f32 %v7797_v8, %v244_v3  ;;  %v41_v3 = vmul.f32 0.14285715, %v9285_v2 }
  0xfd   :  { %v248_v10 = vmax.f32 %v245_v9, 0.0  ;;  %v9288_v4 = vadd.f32 -1.0, %v41_v3  ;;  %v43_v9 = vadd.s32 8, %v9157_v12 }
  0xff   :  { %8055 = vmatmul.mubr.msk.f32.vlgmr.msra.gmra.mrb[2].mxu1 %vm261_vm3, %v248_v10  ;;  %11354 = vst [vmem:[#allocation19_spill] sm:$0xff] %v9288_v4 }
 0x100   :  { %8061 = vmatprep.mubr.msk.f32.mxu1 %vm853_vm4, %v8959_v61 }
 0x1d2   :  { %v331_v16 = vpop.f32.mrb[2].mxu1 }
 0x1d3   :  { %v9166_v17 = vadd.f32 %v331_v16, %v260_v15  ;;  %v8056_v18 = vpop.f32.mrb[3].mxu1  ;;  %v9294_v16 = vcvt.s32.f32 %v9157_v12 }
 0x1d4   :  { %v9296_v18 = vcvt.s32.f32 %v43_v9 }
 0x1d5   :  { %11341 = vst [vmem:[#allocation6_spill] sm:$0xff] %v9166_v17  ;;  %v335_v19 = vsub.f32 0.0, %v9166_v17  ;;  %11355 = vst [vmem:[#allocation20_spill] sm:$0xff] %v9294_v16 }
 0x1d6   :  { %11356 = vst [vmem:[#allocation21_spill] sm:$0xff] %v9296_v18 }
 0x1d7   :  { %v336_v20 = vmul.f32 1.442695, %v335_v19 }
 0x1d9   :  { %8861 = vpow2.f32 %v336_v20 }
 0x1e3   :  { %v8862_v21 = vpop.eup %8861 }
 0x1e4   :  { %v338_v22 = vadd.f32 1.0, %v8862_v21 }
 0x1e6   :  { %8863 = vrcp.f32 %v338_v22 }
 0x1f0   :  { %v8864_v27 = vpop.eup %8863 }
 0x1f1   :  { %v345_v28 = vmul.f32 %v8864_v27, %v344_v25 }
 0x1f3   :  { %v350_v31 = vadd.f32 %v349_v26, %v345_v28 }
 0x1f5   :  { %v355_v32 = vmul.f32 %v353_v30, %v350_v31 }
 0x1f7   :  { %357 = vrot.lane.b32.xlu0 %v355_v32, %s8954_s29 }
 0x269   :  { %v358_v37 = vpop.permute.xlu0 %357 }
 0x26a   :  { %v360_v38 = vadd.f32 %v358_v37, %v350_v31 }
 0x26c   :  { %v411_v39 = vrot.slane %v360_v38, %v410_v36  ;;  %v404_v43 = vcombine.high %v360_v38, %v360_v38 }
 0x26e   :  { %v419_v41 = vcombine.high %v411_v39, %v411_v39  ;;  %v9175_v42 = vrot.slane %v411_v39, %v410_v36  ;;  %v418_v48 = vrot.slane %v404_v43, %v410_v36 }
 0x270   :  { %11342 = vst [vmem:[#allocation7_spill] sm:$0xff] %v9175_v42  ;;  %v9177_v44 = vrot.slane %v419_v41, %v410_v36  ;;  %v9181_v45 = vrot.slane %v9175_v42, %v9160_v13  ;;  %v9189_v47 = vcombine.high %v9175_v42, %v9175_v42  ;;  %v9198_v51 = vrot.slane %v418_v48, %v410_v36 }
 0x271   :  { %v420_v52 = vcombine.high %v418_v48, %v418_v48 }
 0x272   :  { %11343 = vst [vmem:[#allocation8_spill] sm:$0xff] %v9177_v44  ;;  %v9185_v46 = vrot.slane %v9177_v44, %v9160_v13  ;;  %11344 = vst [vmem:[#allocation9_spill] sm:$0xff] %v9189_v47  ;;  %694 = vperm.xlu1 %8791, %v9181_v45   ;;  %v9196_v50 = vrot.slane %v9189_v47, %v9160_v13  ;;  %v9206_v53 = vrot.slane %v9198_v51, %v9160_v13 }
 0x273   :  { %11345 = vst [vmem:[#allocation10_spill] sm:$0xff] %v9198_v51  ;;  %v9208_v54 = vrot.slane %v420_v52, %v410_v36  ;;  %v9215_v55 = vcombine.high %v9198_v51, %v9198_v51  ;;  %v9226_v57 = vcombine.high %v9177_v44, %v9177_v44 }
 0x274   :  { %698 = vperm.xlu0 %8793, %v9185_v46  }
 0x275   :  { %11346 = vst [vmem:[#allocation11_spill] sm:$0xff] %v9208_v54  ;;  %11347 = vst [vmem:[#allocation12_spill] sm:$0xff] %v9215_v55  ;;  %v9220_v56 = vrot.slane %v9208_v54, %v9160_v13  ;;  %v9231_v58 = vrot.slane %v9215_v55, %v9160_v13  ;;  %v9237_v59 = vrot.slane %v9226_v57, %v9160_v13 }
 0x276   :  { %8792 = vset.pattern.permute.xlu1 %v11204_v49  ;;  %11348 = vst [vmem:[#allocation13_spill] sm:$0xff] %v9226_v57  ;;  %v9255_v62 = vcombine.high %v9208_v54, %v9208_v54 }
 0x277   :  { %734 = vperm.xlu1 %8792, %v9181_v45   ;;  %11349 = vst [vmem:[#allocation14_spill] sm:$0xff] %v9231_v58 }
 0x278   :  { %8795 = vset.pattern.permute.xlu0 %v11204_v49  ;;  %11350 = vst [vmem:[#allocation15_spill] sm:$0xff] %v9255_v62  ;;  %v9262_v63 = vrot.slane %v9255_v62, %v9160_v13 }
 0x279   :  { %742 = vperm.xlu0 %8795, %v9196_v50  }
 0x27b   :  { %738 = vperm.xlu1 %8792, %v9185_v46  }
 0x27d   :  { %8796 = vset.pattern.permute.xlu0 %v11202_v29 }
 0x27e   :  { %710 = vperm.xlu0 %8796, %v9206_v53  }
 0x27f   :  { %8794 = vset.pattern.permute.xlu1 %v11202_v29 }
 0x280   :  { %702 = vperm.xlu1 %8794, %v9196_v50  }
 0x282   :  { %8801 = vset.pattern.permute.xlu0 %v11204_v49 }
 0x283   :  { %754 = vperm.xlu0 %8801, %v9220_v56  }
 0x284   :  { %8797 = vset.pattern.permute.xlu1 %v11204_v49 }
 0x285   :  { %750 = vperm.xlu1 %8797, %v9206_v53  }
 0x287   :  { %758 = vperm.xlu0 %8801, %v9231_v58  }
 0x289   :  { %8798 = vset.pattern.permute.xlu1 %v11202_v29 }
 0x28a   :  { %706 = vperm.xlu1 %8798, %v9237_v59  }
 0x28b   :  { %461 = vrot.lane.b32.xlu0 %v9175_v42, %s8957_s30 }
 0x28c   :  { %8804 = vset.pattern.permute.xlu0 %v8958_v60 }
 0x28e   :  { %8799 = vset.pattern.permute.xlu1 %v11204_v49 }
 0x28f   :  { %465 = vrot.lane.b32.xlu0 %v9189_v47, %s8957_s30  ;;  %746 = vperm.xlu1 %8799, %v9237_v59  }
 0x293   :  { %469 = vrot.lane.b32.xlu0 %v9198_v51, %s8957_s30  ;;  %8800 = vset.pattern.permute.xlu1 %v11202_v29 }
 0x294   :  { %714 = vperm.xlu1 %8800, %v9220_v56  }
 0x297   :  { %473 = vrot.lane.b32.xlu0 %v9215_v55, %s8957_s30 }
 0x298   :  { %718 = vperm.xlu1 %8800, %v9231_v58  }
 0x29b   :  { %610 = vperm.xlu0 %8804, %v9185_v46  }
 0x29c   :  { %722 = vperm.xlu1 %8800, %v9262_v63  }
 0x29f   :  { %614 = vperm.xlu0 %8804, %v9196_v50  }
 0x2a0   :  { %8802 = vset.pattern.permute.xlu1 %v11204_v49 }
 0x2a1   :  { %762 = vperm.xlu1 %8802, %v9262_v63  }
 0x2a3   :  { %8805 = vset.pattern.permute.xlu0 %v11202_v29 }
 0x2a5   :  { %463 = vrot.lane.b32.xlu1 %v9177_v44, %s8957_s30 }
 0x2a6   :  { %8803 = vset.pattern.permute.xlu1 %v8958_v60 }
 0x2a9   :  { %467 = vrot.lane.b32.xlu1 %v9226_v57, %s8957_s30 }
 0x2ad   :  { %471 = vrot.lane.b32.xlu1 %v9208_v54, %s8957_s30 }
 0x2b1   :  { %475 = vrot.lane.b32.xlu1 %v9255_v62, %s8957_s30 }
 0x2b5   :  { %606 = vperm.xlu1 %8803, %v9181_v45  }
 0x2b9   :  { %618 = vperm.xlu1 %8803, %v9237_v59  }
 0x2bd   :  { %622 = vperm.xlu1 %8803, %v9206_v53  }
 0x2c1   :  { %8807 = vset.pattern.permute.xlu1 %v11202_v29 }
 0x2f1   :  { %v695_v5 = vpop.permute.xlu1 %694 }
 0x2f2   :  { %v725_v8 = vmul.f32 %v9288_v4, %v695_v5 }
 0x2f3   :  { %v699_v6 = vpop.permute.xlu0 %698 }
 0x2f4   :  { %v726_v15 = vmul.f32 %v9288_v4, %v699_v6 }
 0x2f6   :  { %v735_v10 = vpop.permute.xlu1 %734 }
 0x2f7   :  { %v765_v14 = vadd.f32 %v735_v10, %v725_v8 }
 0x2f8   :  { %v743_v11 = vpop.permute.xlu0 %742 }
 0x2f9   :  { %v773_v19 = vadd.f32 1.0, %v765_v14 }
 0x2fa   :  { %v739_v20 = vpop.permute.xlu1 %738 }
 0x2fb   :  { %v781_v21 = vmul.f32 7.5, %v773_v19  ;;  %v766_v22 = vadd.f32 %v739_v20, %v726_v15 }
 0x2fd   :  { %v711_v23 = vpop.permute.xlu0 %710  ;;  %v789_v24 = vsub.f32 %v781_v21, %v9294_v16  ;;  %v790_v25 = vsub.f32 %v781_v21, %v9296_v18  ;;  %v774_v26 = vadd.f32 1.0, %v766_v22 }
 0x2fe   :  { %v729_v38 = vmul.f32 %v9288_v4, %v711_v23 }
 0x2ff   :  { %v805_v27 = vand.u32 2147483647, %v789_v24  ;;  %v806_v28 = vand.u32 2147483647, %v790_v25  ;;  %v782_v30 = vmul.f32 7.5, %v774_v26  ;;  %v703_v31 = vpop.permute.xlu1 %702 }
 0x300   :  { %v727_v32 = vmul.f32 %v9288_v4, %v703_v31 }
 0x301   :  { %v821_v33 = vsub.f32 1.0, %v805_v27  ;;  %v822_v34 = vsub.f32 1.0, %v806_v28  ;;  %v791_v35 = vsub.f32 %v782_v30, %v9294_v16  ;;  %v792_v36 = vsub.f32 %v782_v30, %v9296_v18 }
 0x302   :  { %v9303_v37 = vpop.permute.xlu0 %754  ;;  %v767_v39 = vadd.f32 %v743_v11, %v727_v32 }
 0x303   :  { %v837_v41 = vmax.f32 %v821_v33, 0.0  ;;  %v838_v43 = vmax.f32 %v822_v34, 0.0  ;;  %v807_v48 = vand.u32 2147483647, %v791_v35  ;;  %v808_v52 = vand.u32 2147483647, %v792_v36 }
 0x304   :  { %v775_v3 = vadd.f32 1.0, %v767_v39  ;;  %v751_v5 = vpop.permute.xlu1 %750 }
 0x305   :  { %v823_v6 = vsub.f32 1.0, %v807_v48  ;;  %v824_v8 = vsub.f32 1.0, %v808_v52  ;;  %v769_v9 = vadd.f32 %v751_v5, %v729_v38  ;;  %v9308_v14 = vpack.c.bf16 %v838_v43, %v837_v41 }
 0x306   :  { %v9306_v10 = vpop.permute.xlu0 %758  ;;  %v783_v15 = vmul.f32 7.5, %v775_v3 }
 0x307   :  { %v839_v19 = vmax.f32 %v823_v6, 0.0  ;;  %v840_v20 = vmax.f32 %v824_v8, 0.0  ;;  %v777_v21 = vadd.f32 1.0, %v769_v9  ;;  %8550 = vmatprep.subr.bf16.mxu1 %v9308_v14 }
 0x308   :  { %v793_v11 = vsub.f32 %v783_v15, %v9294_v16  ;;  %v794_v22 = vsub.f32 %v783_v15, %v9296_v18  ;;  %8552 = vmatpush3.bf16.msra.mxu1 %v9308_v14 }
 0x309   :  { %v785_v23 = vmul.f32 7.5, %v777_v21  ;;  %v707_v24 = vpop.permute.xlu1 %706  ;;  %v9314_v26 = vpack.c.bf16 %v840_v20, %v839_v19 }
 0x30a   :  { %v462_v25 = vpop.permute.xlu0 %461  ;;  %v809_v27 = vand.u32 2147483647, %v793_v11  ;;  %v810_v28 = vand.u32 2147483647, %v794_v22  ;;  %v728_v38 = vmul.f32 %v9288_v4, %v707_v24 }
 0x30b   :  { %v9317_v30 = vmul.f32 %v462_v25, %v9175_v42  ;;  %v797_v31 = vsub.f32 %v785_v23, %v9294_v16  ;;  %v798_v32 = vsub.f32 %v785_v23, %v9296_v18  ;;  %8062 = vmatmul.mubr.msk.f32.vlgmr.msra.gmra.mrb[4].mxu1 %vm853_vm4, %v8959_v61  ;;  %8554 = vmatprep.subr.bf16.mxu1 %v9314_v26 }
 0x30c   :  { %v825_v33 = vsub.f32 1.0, %v809_v27  ;;  %v826_v34 = vsub.f32 1.0, %v810_v28  ;;  %8556 = vmatpush3.bf16.msra.mxu1 %v9314_v26  ;;  %8068 = vmatprep.mubr.msk.f32.mxu1 %vm853_vm4, %v8959_v61 }
 0x30d   :  { %11357 = vst [vmem:[#allocation22_spill] sm:$0xff] %v9317_v30  ;;  %v813_v35 = vand.u32 2147483647, %v797_v31  ;;  %v814_v36 = vand.u32 2147483647, %v798_v32  ;;  %v9330_v41 = vrot.slane %v9317_v30, %v9160_v13  ;;  %8865 = vrcp.f32 %v9317_v30  ;;  %v9570_v30 = vld [vmem:[%s11191_s2 + $0x40] sm:$0xff] }
 0x30e   :  { %v466_v39 = vpop.permute.xlu0 %465  ;;  %v841_v43 = vmax.f32 %v825_v33, 0.0  ;;  %v842_v48 = vmax.f32 %v826_v34, 0.0  ;;  %v747_v52 = vpop.permute.xlu1 %746  ;;  %11392 = vst [vmem:[#allocation56_spill] sm:$0xff] %v9570_v30 }
 0x30f   :  { %11358 = vst [vmem:[#allocation23_spill] sm:$0xff] %v9330_v41  ;;  %v829_v3 = vsub.f32 1.0, %v813_v35  ;;  %v830_v5 = vsub.f32 1.0, %v814_v36  ;;  %v768_v6 = vadd.f32 %v747_v52, %v728_v38  ;;  %534 = vperm.xlu0 %8805, %v9330_v41   ;;  %8069 = vmatmul.mubr.msk.f32.vlgmr.msra.gmra.mrb[6].mxu1 %vm853_vm4, %v8959_v61  ;;  %v9358_v33 = vmul.f32 %v466_v39, %v9189_v47 }
 0x310   :  { %v9335_v8 = vpack.c.bf16 %v842_v48, %v841_v43  ;;  %8075 = vmatprep.mubr.msk.f32.mxu1 %vm853_vm4, %v8959_v61 }
 0x311   :  { %v845_v9 = vmax.f32 %v829_v3, 0.0  ;;  %v846_v15 = vmax.f32 %v830_v5, 0.0  ;;  %v776_v19 = vadd.f32 1.0, %v768_v6  ;;  %11360 = vst [vmem:[#allocation25_spill] sm:$0xff] %v9358_v33  ;;  %8867 = vrcp.f32 %v9358_v33 }
 0x312   :  { %v470_v20 = vpop.permute.xlu0 %469  ;;  %8558 = vmatprep.subr.bf16.mxu1 %v9335_v8 }
 0x313   :  { %v784_v21 = vmul.f32 7.5, %v776_v19  ;;  %v9341_v11 = vmul.f32 %v470_v20, %v9198_v51  ;;  %8806 = vset.pattern.permute.xlu0 %v8958_v60  ;;  %v715_v22 = vpop.permute.xlu1 %714  ;;  %8560 = vmatpush3.bf16.msra.mxu1 %v9335_v8  ;;  %v9345_v23 = vpack.c.bf16 %v846_v15, %v845_v9 }
 0x314   :  { %v730_v24 = vmul.f32 %v9288_v4, %v715_v22  ;;  %626 = vperm.xlu0 %8806, %v9220_v56  }
 0x315   :  { %11359 = vst [vmem:[#allocation24_spill] sm:$0xff] %v9341_v11  ;;  %v795_v25 = vsub.f32 %v784_v21, %v9294_v16  ;;  %v796_v27 = vsub.f32 %v784_v21, %v9296_v18  ;;  %8566 = vmatprep.subr.bf16.mxu0 %v9345_v23  ;;  %v9362_v35 = vrot.slane %v9341_v11, %v9160_v13  ;;  %8869 = vrcp.f32 %v9341_v11  ;;  %v9557_v11 = vld [vmem:[%s11191_s2 + $0x20] sm:$0xff] }
 0x316   :  { %v770_v28 = vadd.f32 %v9303_v37, %v730_v24  ;;  %8076 = vmatmul.mubr.msk.f32.vlgmr.msra.gmra.mrb[8].mxu1 %vm853_vm4, %v8959_v61  ;;  %8568 = vmatpush3.bf16.msra.mxu0 %v9345_v23  ;;  %v474_v15 = vpop.permute.xlu0 %473 }
 0x317   :  { %v811_v31 = vand.u32 2147483647, %v795_v25  ;;  %v812_v32 = vand.u32 2147483647, %v796_v27  ;;  %v719_v34 = vpop.permute.xlu1 %718  ;;  %11361 = vst [vmem:[#allocation26_spill] sm:$0xff] %v9362_v35  ;;  %8082 = vmatprep.mubr.msk.f32.mxu1 %vm853_vm4, %v8959_v61  ;;  %v9383_v24 = vmul.f32 %v474_v15, %v9215_v55  ;;  %v9387_v27 = vpop.eup %8865 }
 0x318   :  { %v778_v36 = vadd.f32 1.0, %v770_v28  ;;  %v731_v37 = vmul.f32 %v9288_v4, %v719_v34  ;;  %8808 = vset.pattern.permute.xlu0 %v11202_v29  ;;  %11363 = vst [vmem:[#allocation28_spill] sm:$0xff] %v9387_v27 }
 0x319   :  { %v827_v38 = vsub.f32 1.0, %v811_v31  ;;  %v828_v43 = vsub.f32 1.0, %v812_v32  ;;  %550 = vperm.xlu0 %8808, %v9362_v35   ;;  %8090 = vmatmul.mubr.msk.f32.vlgmr.msra.gmra.mrb[2].mxu0 %vm853_vm4, %v8959_v61  ;;  %11362 = vst [vmem:[#allocation27_spill] sm:$0xff] %v9383_v24  ;;  %8871 = vrcp.f32 %v9383_v24 }
 0x31a   :  { %v786_v39 = vmul.f32 7.5, %v778_v36  ;;  %v771_v48 = vadd.f32 %v9306_v10, %v731_v37  ;;  %8103 = vmatprep.mubr.msk.f32.mxu0 %vm853_vm4, %v8959_v61  ;;  %8873 = vrcp.f32 %v9175_v42 }
 0x31b   :  { %v843_v52 = vmax.f32 %v827_v38, 0.0  ;;  %v844_v3 = vmax.f32 %v828_v43, 0.0  ;;  %v723_v5 = vpop.permute.xlu1 %722  ;;  %v9402_v15 = vpop.eup %8867 }
 0x31c   :  { %v799_v6 = vsub.f32 %v786_v39, %v9294_v16  ;;  %v800_v9 = vsub.f32 %v786_v39, %v9296_v18  ;;  %v779_v19 = vadd.f32 1.0, %v771_v48  ;;  %v732_v25 = vmul.f32 %v9288_v4, %v723_v5  ;;  %11365 = vst [vmem:[#allocation30_spill] sm:$0xff] %v9402_v15 }
 0x31d   :  { %8809 = vset.pattern.permute.xlu0 %v8958_v60  ;;  %v9378_v20 = vpack.c.bf16 %v844_v3, %v843_v52 }
 0x31e   :  { %v815_v21 = vand.u32 2147483647, %v799_v6  ;;  %v816_v10 = vand.u32 2147483647, %v800_v9  ;;  %v787_v22 = vmul.f32 7.5, %v779_v19  ;;  %630 = vperm.xlu0 %8809, %v9231_v58  }
 0x31f   :  { %8562 = vmatprep.subr.bf16.mxu1 %v9378_v20 }
 0x320   :  { %v831_v28 = vsub.f32 1.0, %v815_v21  ;;  %v832_v31 = vsub.f32 1.0, %v816_v10  ;;  %v801_v32 = vsub.f32 %v787_v22, %v9294_v16  ;;  %v802_v34 = vsub.f32 %v787_v22, %v9296_v18  ;;  %v763_v36 = vpop.permute.xlu1 %762  ;;  %8564 = vmatpush3.bf16.msra.mxu1 %v9378_v20 }
 0x321   :  { %v772_v37 = vadd.f32 %v763_v36, %v732_v25  ;;  %v9420_v36 = vpop.eup %8869 }
 0x322   :  { %v847_v38 = vmax.f32 %v831_v28, 0.0  ;;  %v848_v43 = vmax.f32 %v832_v31, 0.0  ;;  %v817_v39 = vand.u32 2147483647, %v801_v32  ;;  %v818_v48 = vand.u32 2147483647, %v802_v34  ;;  %3361 = vrot.lane.b32.xlu0 %v9387_v27, %s8960_s9 }
 0x323   :  { %v780_v52 = vadd.f32 1.0, %v772_v37  ;;  %8083 = vmatmul.mubr.msk.f32.vlgmr.msra.gmra.mrb[10].mxu1 %vm853_vm4, %v8959_v61  ;;  %8811 = vset.pattern.permute.xlu0 %v11202_v29  ;;  %11369 = vst [vmem:[#allocation34_spill] sm:$0xff] %v9420_v36 }
 0x324   :  { %v833_v3 = vsub.f32 1.0, %v817_v39  ;;  %v834_v5 = vsub.f32 1.0, %v818_v48  ;;  %v464_v6 = vpop.permute.xlu1 %463  ;;  %v9398_v9 = vpack.c.bf16 %v848_v43, %v847_v38  ;;  %8096 = vmatprep.mubr.msk.f32.mxu1 %vm853_vm4, %v8959_v61 }
 0x325   :  { %v788_v19 = vmul.f32 7.5, %v780_v52  ;;  %v9405_v21 = vmul.f32 %v464_v6, %v9177_v44  ;;  %v9434_v52 = vrot.slane %v9358_v33, %v9160_v13  ;;  %v11390_v33 = vmov 2  }
 0x326   :  { %11364 = vst [vmem:[#allocation29_spill] sm:$0xff] %v9398_v9  ;;  %v849_v10 = vmax.f32 %v833_v3, 0.0  ;;  %v850_v22 = vmax.f32 %v834_v5, 0.0  ;;  %3365 = vrot.lane.b32.xlu0 %v9402_v15, %s8960_s9  ;;  %8570 = vmatprep.subr.bf16.mxu1 %v9398_v9  ;;  %v9438_v3 = vpop.eup %8871 }
 0x327   :  { %11366 = vst [vmem:[#allocation31_spill] sm:$0xff] %v9405_v21  ;;  %v803_v25 = vsub.f32 %v788_v19, %v9294_v16  ;;  %v804_v28 = vsub.f32 %v788_v19, %v9296_v18  ;;  %8572 = vmatpush3.bf16.msra.mxu1 %v9398_v9  ;;  %v9416_v32 = vrot.slane %v9405_v21, %v9160_v13  ;;  %11371 = vst [vmem:[#allocation36_spill] sm:$0xff] %v9434_v52 }
 0x328   :  { %v468_v31 = vpop.permute.xlu1 %467  ;;  %v9418_v34 = vpack.c.bf16 %v850_v22, %v849_v10  ;;  %11372 = vst [vmem:[#allocation37_spill] sm:$0xff] %v9438_v3  ;;  %8875 = vrcp.f32 %v9405_v21  ;;  %v611_v21 = vpop.permute.xlu0 %610 }
 0x329   :  { %11367 = vst [vmem:[#allocation32_spill] sm:$0xff] %v9416_v32  ;;  %v819_v37 = vand.u32 2147483647, %v803_v25  ;;  %v820_v38 = vand.u32 2147483647, %v804_v28  ;;  %538 = vperm.xlu1 %8807, %v9416_v32   ;;  %v9429_v48 = vmul.f32 %v468_v31, %v9226_v57  ;;  %v9457_v28 = vpop.eup %8873 }
 0x32a   :  { %11368 = vst [vmem:[#allocation33_spill] sm:$0xff] %v9418_v34  ;;  %3369 = vrot.lane.b32.xlu0 %v9420_v36, %s8960_s9  ;;  %8097 = vmatmul.mubr.msk.f32.vlgmr.msra.gmra.mrb[12].mxu1 %vm853_vm4, %v8959_v61  ;;  %11376 = vst [vmem:[#allocation41_spill] sm:$0xff] %v9457_v28 }
 0x32b   :  { %v835_v43 = vsub.f32 1.0, %v819_v37  ;;  %v836_v39 = vsub.f32 1.0, %v820_v38  ;;  %8574 = vmatprep.subr.bf16.mxu0 %v9418_v34  ;;  %11370 = vst [vmem:[#allocation35_spill] sm:$0xff] %v9429_v48  ;;  %8110 = vmatprep.mubr.msk.f32.mxu1 %vm853_vm4, %v8959_v61  ;;  %v9453_v25 = vrot.slane %v9429_v48, %v9160_v13  ;;  %8877 = vrcp.f32 %v9429_v48 }
 0x32c   :  { %8576 = vmatpush3.bf16.msra.mxu0 %v9418_v34  ;;  %v472_v19 = vpop.permute.xlu1 %471 }
 0x32d   :  { %v851_v5 = vmax.f32 %v835_v43, 0.0  ;;  %v852_v6 = vmax.f32 %v836_v39, 0.0  ;;  %8581 = vmatprep.subr.bf16.mxu0 %v11200_v40  ;;  %542 = vperm.xlu1 %8807, %v9434_v52   ;;  %v9449_v22 = vmul.f32 %v472_v19, %v9208_v54  ;;  %11375 = vst [vmem:[#allocation40_spill] sm:$0xff] %v9453_v25  ;;  %v9480_v43 = vrot.slane %v9383_v24, %v9160_v13 }
 0x32e   :  { %3373 = vrot.lane.b32.xlu0 %v9438_v3, %s8960_s9 }
 0x32f   :  { %8104 = vmatmul.mubr.msk.f32.vlgmr.msra.gmra.mrb[4].mxu0 %vm853_vm4, %v8959_v61  ;;  %v9446_v10 = vpack.c.bf16 %v852_v6, %v851_v5  ;;  %11374 = vst [vmem:[#allocation39_spill] sm:$0xff] %v9449_v22  ;;  %v9466_v31 = vrot.slane %v9449_v22, %v9160_v13  ;;  %11379 = vst [vmem:[#allocation44_spill] sm:$0xff] %v9480_v43  ;;  %8879 = vrcp.f32 %v9449_v22  ;;  %v54_v22 = vld [vmem:[%s11195_s6] sm:$0xff] }
 0x330   :  { %8117 = vmatprep.mubr.msk.f32.mxu0 %vm8950_vm0, %v11198_v7  ;;  %v476_v37 = vpop.permute.xlu1 %475  ;;  %8881 = vrcp.f32 %v9177_v44  ;;  %v7301_v48 = vsub.f32 %v9557_v11, %v54_v22 }
 0x331   :  { %11373 = vst [vmem:[#allocation38_spill] sm:$0xff] %v9446_v10  ;;  %8578 = vmatprep.subr.bf16.mxu1 %v9446_v10  ;;  %546 = vperm.xlu1 %8807, %v9453_v25   ;;  %11377 = vst [vmem:[#allocation42_spill] sm:$0xff] %v9466_v31  ;;  %v9476_v38 = vmul.f32 %v476_v37, %v9255_v62  ;;  %8883 = vrcp.f32 %v9189_v47 }
 0x332   :  { %3665 = vrot.lane.b32.xlu0 %v9457_v28, %s8961_s10  ;;  %8580 = vmatpush3.bf16.msra.mxu1 %v9446_v10  ;;  %v9494_v39 = vpop.eup %8875  ;;  %8885 = vrcp.f32 %v9226_v57 }
 0x333   :  { %8584 = vmatprep.subr.bf16.mxu1 %v11200_v40  ;;  %11378 = vst [vmem:[#allocation43_spill] sm:$0xff] %v9476_v38  ;;  %11381 = vst [vmem:[#allocation46_spill] sm:$0xff] %v9494_v39  ;;  %8887 = vrcp.f32 %v9198_v51 }
 0x334   :  { %8889 = vrcp.f32 %v9476_v38  ;;  %v607_v2 = vpop.permute.xlu1 %606 }
 0x335   :  { %554 = vperm.xlu1 %8807, %v9466_v31   ;;  %8111 = vmatmul.mubr.msk.f32.vlgmr.msra.gmra.mrb[14].mxu1 %vm853_vm4, %v8959_v61  ;;  %v9487_v61 = vrot.slane %v9476_v38, %v9160_v13  ;;  %v9500_v5 = vpop.eup %8877  ;;  %8891 = vrcp.f32 %v9208_v54  ;;  %v9549_v38 = vpop.permute.xlu0 %614 }
 0x336   :  { %3587 = vperm.xlu0 %8811, %v9457_v28   ;;  %8124 = vmatprep.mubr.msk.f32.mxu1 %vm8950_vm0, %v11198_v7  ;;  %11382 = vst [vmem:[#allocation47_spill] sm:$0xff] %v9500_v5  ;;  %8893 = vrcp.f32 %v9215_v55 }
 0x337   :  { %11380 = vst [vmem:[#allocation45_spill] sm:$0xff] %v9487_v61  ;;  %8895 = vrcp.f32 %v9255_v62 }
 0x338   :  { %v9600_v32 = vpop.permute.xlu1 %618 }
 0x339   :  { %558 = vperm.xlu1 %8807, %v9480_v43   ;;  %v9580_v43 = vld [vmem:[%s11191_s2 + $0x30] sm:$0xff] }
 0x33a   :  { %8814 = vset.pattern.permute.xlu0 %v11204_v49  ;;  %11394 = vst [vmem:[#allocation58_spill] sm:$0xff] %v9580_v43 }
 0x33d   :  { %562 = vperm.xlu1 %8807, %v9487_v61   ;;  %v7305_v61 = vsub.f32 %v9570_v30, %v54_v22 }
 0x341   :  { %8810 = vset.pattern.permute.xlu1 %v8958_v60  ;;  %v9505_v60 = vpop.eup %8879 }
 0x342   :  { %634 = vperm.xlu1 %8810, %v9262_v63   ;;  %11383 = vst [vmem:[#allocation48_spill] sm:$0xff] %v9505_v60  ;;  %v9510_v6 = vpop.eup %8881 }
 0x343   :  { %11384 = vst [vmem:[#allocation49_spill] sm:$0xff] %v9510_v6  ;;  %v9515_v19 = vpop.eup %8883 }
 0x344   :  { %11385 = vst [vmem:[#allocation50_spill] sm:$0xff] %v9515_v19  ;;  %v9520_v37 = vpop.eup %8885 }
 0x345   :  { %11386 = vst [vmem:[#allocation51_spill] sm:$0xff] %v9520_v37  ;;  %v9525_v7 = vpop.eup %8887 }
 0x346   :  { %3363 = vrot.lane.b32.xlu1 %v9494_v39, %s8960_s9  ;;  %v9530_v40 = vpop.eup %8889 }
 0x347   :  { %8812 = vset.pattern.permute.xlu1 %v11202_v29  ;;  %11387 = vst [vmem:[#allocation52_spill] sm:$0xff] %v9530_v40  ;;  %v9535_v29 = vpop.eup %8891 }
 0x348   :  { %v9539_v49 = vpop.eup %8893 }
 0x349   :  { %11388 = vst [vmem:[#allocation53_spill] sm:$0xff] %v9539_v49  ;;  %v9543_v0 = vpop.eup %8895 }
 0x34a   :  { %3367 = vrot.lane.b32.xlu1 %v9500_v5, %s8960_s9  ;;  %11389 = vst [vmem:[#allocation54_spill] sm:$0xff] %v9543_v0 }
 0x34e   :  { %3371 = vrot.lane.b32.xlu1 %v9505_v60, %s8960_s9 }
 0x352   :  { %3667 = vrot.lane.b32.xlu1 %v9510_v6, %s8961_s10 }
 0x356   :  { %3669 = vrot.lane.b32.xlu1 %v9515_v19, %s8961_s10 }
 0x35a   :  { %3671 = vrot.lane.b32.xlu1 %v9520_v37, %s8961_s10 }
 0x35e   :  { %3673 = vrot.lane.b32.xlu1 %v9525_v7, %s8961_s10 }
 0x362   :  { %3375 = vrot.lane.b32.xlu1 %v9530_v40, %s8960_s9 }
 0x366   :  { %3675 = vrot.lane.b32.xlu1 %v9535_v29, %s8961_s10 }
 0x36a   :  { %3677 = vrot.lane.b32.xlu1 %v9539_v49, %s8961_s10 }
 0x36e   :  { %3679 = vrot.lane.b32.xlu1 %v9543_v0, %s8961_s10 }
 0x372   :  { %3596 = vperm.xlu1 %8812, %v9510_v6   ;;  %v56_v6 = vld [vmem:[%s11195_s6 + $0x10] sm:$0xff] }
 0x373   :  { %v9565_v4 = vmul.f32 %v7301_v48, %v56_v6  ;;  %v9575_v35 = vmul.f32 %v7305_v61, %v56_v6  ;;  %v7303_v48 = vsub.f32 %v9580_v43, %v54_v22 }
 0x375   :  { %11391 = vst [vmem:[#allocation55_spill] sm:$0xff] %v9565_v4  ;;  %11393 = vst [vmem:[#allocation57_spill] sm:$0xff] %v9575_v35  ;;  %v9586_v4 = vld [vmem:[%s11191_s2 + $0x60] sm:$0xff]  ;;  %v9589_v31 = vmul.f32 %v7303_v48, %v56_v6  ;;  %v9598_v35 = vld [vmem:[%s11191_s2 + $0x50] sm:$0xff] }
 0x376   :  { %8813 = vset.pattern.permute.xlu1 %v11390_v33  ;;  %11395 = vst [vmem:[#allocation59_spill] sm:$0xff] %v9586_v4  ;;  %v7309_v25 = vsub.f32 %v9586_v4, %v54_v22  ;;  %11398 = vst [vmem:[#allocation62_spill] sm:$0xff] %v9598_v35  ;;  %v7307_v41 = vsub.f32 %v9598_v35, %v54_v22  ;;  %v9608_v48 = vld [vmem:[%s11191_s2 + $0x70] sm:$0xff] }
 0x377   :  { %11396 = vst [vmem:[#allocation60_spill] sm:$0xff] %v9589_v31  ;;  %11400 = vst [vmem:[#allocation64_spill] sm:$0xff] %v9608_v48  ;;  %v623_v31 = vpop.permute.xlu1 %622 }
 0x378   :  { %v9593_v61 = vmul.f32 %v7309_v25, %v56_v6  ;;  %v9603_v40 = vmul.f32 %v7307_v41, %v56_v6  ;;  %v7311_v25 = vsub.f32 %v9608_v48, %v54_v22  ;;  %v3353_v41 = vsub.f32 0.0, %v9175_v42 }
 0x379   :  { %v11403_v22 = vmov 0  }
 0x37a   :  { %11397 = vst [vmem:[#allocation61_spill] sm:$0xff] %v9593_v61  ;;  %11399 = vst [vmem:[#allocation63_spill] sm:$0xff] %v9603_v40  ;;  %v9611_v60 = vmul.f32 %v7311_v25, %v56_v6  ;;  %v9628_v25 = vmul.f32 2.0, %v9294_v16 }
 0x37c   :  { %11401 = vst [vmem:[#allocation65_spill] sm:$0xff] %v9611_v60  ;;  %11404 = vst [vmem:[#allocation67_spill] sm:$0xff] %v9628_v25 }
 0x38e   :  { %v535_v24 = vpop.permute.xlu0 %534 }
 0x393   :  { %v9560_v28 = vpop.permute.xlu0 %626 }
 0x398   :  { %v9573_v12 = vpop.permute.xlu0 %550 }
 0x39d   :  { %v9591_v52 = vpop.permute.xlu0 %630 }
 0x3a1   :  { %v3362_v17 = vpop.permute.xlu0 %3361 }
 0x3a2   :  { %v3385_v9 = vmul.f32 %v3362_v17, %v3353_v41 }
 0x3a5   :  { %v3366_v61 = vpop.permute.xlu0 %3365 }
 0x3a8   :  { %v539_v5 = vpop.permute.xlu1 %538 }
 0x3a9   :  { %v9613_v3 = vpop.permute.xlu0 %3369 }
 0x3ac   :  { %v543_v36 = vpop.permute.xlu1 %542 }
 0x3ad   :  { %v9615_v15 = vpop.permute.xlu0 %3373 }
 0x3b0   :  { %v547_v40 = vpop.permute.xlu1 %546 }
 0x3b1   :  { %v3666_v39 = vpop.permute.xlu0 %3665 }
 0x3b2   :  { %v9618_v27 = vmul.f32 %v3666_v39, %v3353_v41  ;;  %v35_v39 = vmul.f32 0.14285715, %v9628_v25 }
 0x3b4   :  { %11402 = vst [vmem:[#allocation66_spill] sm:$0xff] %v9618_v27  ;;  %3699 = vperm.xlu1 %8813, %v9618_v27   ;;  %v9621_v18 = vpop.permute.xlu1 %554  ;;  %v9635_v27 = vadd.f32 -1.0, %v35_v39 }
 0x3b6   :  { %11405 = vst [vmem:[#allocation68_spill] sm:$0xff] %v9635_v27  ;;  %v565_v48 = vmul.f32 %v9635_v27, %v535_v24  ;;  %v566_v16 = vmul.f32 %v9635_v27, %v539_v5  ;;  %v567_v58 = vmul.f32 %v9635_v27, %v543_v36  ;;  %v3355_v24 = vsub.f32 0.0, %v9189_v47 }
 0x3b7   :  { %v569_v17 = vmul.f32 %v9635_v27, %v9573_v12 }
 0x3b8   :  { %8815 = vset.pattern.permute.xlu1 %v11403_v22  ;;  %v9624_v6 = vpop.permute.xlu1 %558  ;;  %v637_v35 = vadd.f32 %v607_v2, %v565_v48  ;;  %v638_v43 = vadd.f32 %v611_v21, %v566_v16  ;;  %v3404_v16 = vrot.slane %v3385_v9, %v9160_v13  ;;  %v3387_v41 = vmul.f32 %v3366_v61, %v3355_v24 }
 0x3b9   :  { %3605 = vperm.xlu1 %8815, %v9515_v19   ;;  %v641_v9 = vadd.f32 %v623_v31, %v569_v17 }
 0x3ba   :  { %v645_v10 = vadd.f32 1.0, %v637_v35  ;;  %v646_v30 = vadd.f32 1.0, %v638_v43  ;;  %v639_v35 = vadd.f32 %v9549_v38, %v567_v58  ;;  %v3412_v61 = vrot.slane %v3387_v41, %v9160_v13 }
 0x3bc   :  { %v9630_v60 = vpop.permute.xlu1 %562  ;;  %v653_v25 = vmul.f32 7.5, %v645_v10  ;;  %v654_v21 = vmul.f32 7.5, %v646_v30  ;;  %v647_v36 = vadd.f32 1.0, %v639_v35  ;;  %v11268_v30 = vmov 4  }
 0x3bd   :  { %3614 = vperm.xlu1 %8815, %v9520_v37   ;;  %v3354_v37 = vsub.f32 0.0, %v9177_v44  ;;  %v649_v35 = vadd.f32 1.0, %v641_v9  ;;  %v11407_v9 = vmov 0.0|0.0  }
 0x3be   :  { %v661_v2 = vsub.f32 %v653_v25, %v9282_v1  ;;  %v662_v58 = vsub.f32 %v654_v21, %v9282_v1  ;;  %v655_v12 = vmul.f32 7.5, %v647_v36 }
 0x3c0   :  { %v669_v43 = vand.u32 2147483647, %v661_v2 }
 0x3c1   :  { %8816 = vset.pattern.permute.xlu1 %v11390_v33  ;;  %v9637_v42 = vpop.permute.xlu1 %634 }
 0x3c5   :  { %v3364_v0 = vpop.permute.xlu1 %3363 }
 0x3c6   :  { %v3386_v10 = vmul.f32 %v3364_v0, %v3354_v37  ;;  %v3357_v0 = vsub.f32 0.0, %v9198_v51 }
 0x3c8   :  { %v3408_v38 = vrot.slane %v3386_v10, %v9160_v13  ;;  %v3389_v31 = vmul.f32 %v9613_v3, %v3357_v0  ;;  %v11266_v10 = vmov 6  }
 0x3c9   :  { %v3368_v19 = vpop.permute.xlu1 %3367 }
 0x3ca   :  { %v3420_v3 = vrot.slane %v3389_v31, %v9160_v13 }
 0x3cd   :  { %v9641_v4 = vpop.permute.xlu1 %3371 }
 0x3d1   :  { %v3668_v39 = vpop.permute.xlu1 %3667 }
 0x3d2   :  { %v9645_v34 = vmul.f32 %v3668_v39, %v3354_v37  ;;  %v568_v37 = vmul.f32 %v9635_v27, %v547_v40  ;;  %v677_v39 = vsub.f32 1.0, %v669_v43  ;;  %v663_v40 = vsub.f32 %v655_v12, %v9282_v1 }
 0x3d4   :  { %3708 = vperm.xlu0 %8814, %v9645_v34   ;;  %v640_v21 = vadd.f32 %v9600_v32, %v568_v37  ;;  %v9674_v36 = vmax.f32 %v677_v39, 0.0  ;;  %v657_v32 = vmul.f32 7.5, %v649_v35  ;;  %v3358_v37 = vsub.f32 0.0, %v9208_v54 }
 0x3d5   :  { %v3670_v5 = vpop.permute.xlu1 %3669 }
 0x3d6   :  { %v9652_v48 = vmul.f32 %v3670_v5, %v3355_v24  ;;  %v670_v24 = vand.u32 2147483647, %v662_v58  ;;  %v648_v39 = vadd.f32 1.0, %v640_v21  ;;  %v665_v35 = vsub.f32 %v657_v32, %v9282_v1 }
 0x3d8   :  { %11406 = vst [vmem:[#allocation69_spill] sm:$0xff] %v9652_v48  ;;  %3433 = vrot.lane.b32.xlu0 %v3404_v16, %s8962_s0  ;;  %3717 = vperm.xlu1 %8816, %v9652_v48   ;;  %v3356_v16 = vsub.f32 0.0, %v9226_v57  ;;  %v678_v43 = vsub.f32 1.0, %v670_v24  ;;  %v570_v24 = vmul.f32 %v9635_v27, %v9621_v18  ;;  %v673_v32 = vand.u32 2147483647, %v665_v35 }
 0x3d9   :  { %v3672_v58 = vpop.permute.xlu1 %3671 }
 0x3da   :  { %v3388_v41 = vmul.f32 %v3368_v19, %v3356_v16  ;;  %v9687_v19 = vmax.f32 %v678_v43, 0.0  ;;  %v656_v43 = vmul.f32 7.5, %v648_v39  ;;  %v681_v35 = vsub.f32 1.0, %v673_v32 }
 0x3dc   :  { %3435 = vrot.lane.b32.xlu0 %v3408_v38, %s8962_s0  ;;  %8817 = vset.pattern.permute.xlu1 %v11268_v30  ;;  %v3416_v31 = vrot.slane %v3388_v41, %v9160_v13  ;;  %v664_v39 = vsub.f32 %v656_v43, %v9282_v1  ;;  %v572_v43 = vmul.f32 %v9635_v27, %v9630_v60 }
 0x3dd   :  { %4278 = vperm.xlu1 %8817, %v9185_v46  }
 0x3de   :  { %v8063_v25 = vpop.f32.mrb[4].mxu1 }
 0x3df   :  { %v923_v2 = vpop.f32.mrb[5].mxu1 }
 0x3e0   :  { %v8582_v5 = vpack.c.bf16 %v8063_v25, %v923_v2  ;;  %3437 = vrot.lane.b32.xlu0 %v3412_v61, %s8962_s0  ;;  %v671_v25 = vand.u32 2147483647, %v663_v40  ;;  %v11408_v61 = vmov 0.0   ;;  %v3390_v2 = vmul.f32 %v9641_v4, %v3358_v37  ;;  %v3674_v40 = vpop.permute.xlu1 %3673 }
 0x3e1   :  { %8818 = vset.pattern.permute.xlu1 %v11266_v10  ;;  %v9745_v32 = vmul.f32 %v3674_v40, %v3357_v0 }
 0x3e2   :  { %v8070_v17 = vpop.f32.mrb[6].mxu1  ;;  %8583 = vmatpush3.bf16.msra.mxu0 %v8582_v5  ;;  %4314 = vperm.xlu1 %8818, %v9181_v45   ;;  %v11265_v5 = vsub.f32 0.0, %v9215_v55  ;;  %v679_v21 = vsub.f32 1.0, %v671_v25  ;;  %v3424_v41 = vrot.slane %v3390_v2, %v9160_v13 }
 0x3e3   :  { %v998_v38 = vpop.f32.mrb[7].mxu1  ;;  %8587 = vmatprep.subr.bf16.mxu0 %v11407_v9  ;;  %11410 = vst [vmem:[#allocation71_spill] sm:$0xff] %v9745_v32 }
 0x3e4   :  { %v8585_v12 = vpack.c.bf16 %v8070_v17, %v998_v38  ;;  %3441 = vrot.lane.b32.xlu0 %v3420_v3, %s8962_s0  ;;  %v3391_v4 = vmul.f32 %v9615_v15, %v11265_v5  ;;  %v642_v3 = vadd.f32 %v9560_v28, %v570_v24  ;;  %v3376_v2 = vpop.permute.xlu1 %3375 }
 0x3e5   :  { %8118 = vmatmul.mubr.msk.f32.vlgmr.msra.gmra.mrb[6].mxu0 %vm853_vm4, %v9674_v36 }
 0x3e6   :  { %8586 = vmatpush3.bf16.msra.mxu1 %v8585_v12  ;;  %8131 = vmatprep.mubr.msk.f32.mxu0 %vm8950_vm0, %v11408_v61  ;;  %v571_v12 = vmul.f32 %v9635_v27, %v9624_v6  ;;  %v3428_v28 = vrot.slane %v3391_v4, %v9160_v13  ;;  %v650_v24 = vadd.f32 1.0, %v642_v3  ;;  %v9729_v4 = vmul.f32 %v3672_v58, %v3356_v16 }
 0x3e7   :  { %8819 = vset.pattern.permute.xlu1 %v11403_v22  ;;  %8590 = vmatprep.subr.bf16.mxu1 %v11407_v9 }
 0x3e8   :  { %3623 = vperm.xlu1 %8819, %v9525_v7   ;;  %3439 = vrot.lane.b32.xlu0 %v3416_v31, %s8962_s0  ;;  %v9714_v31 = vmax.f32 %v679_v21, 0.0  ;;  %v643_v6 = vadd.f32 %v9591_v52, %v571_v12  ;;  %v658_v21 = vmul.f32 7.5, %v650_v24  ;;  %v9732_v52 = vmax.f32 %v681_v35, 0.0  ;;  %v3676_v3 = vpop.permute.xlu1 %3675 }
 0x3e9   :  { %v8077_v18 = vpop.f32.mrb[8].mxu1  ;;  %8125 = vmatmul.mubr.msk.f32.vlgmr.msra.gmra.mrb[16].mxu1 %vm853_vm4, %v9687_v19 }
 0x3ea   :  { %v1073_v17 = vpop.f32.mrb[9].mxu1  ;;  %8138 = vmatprep.mubr.msk.f32.mxu1 %vm8950_vm0, %v11408_v61  ;;  %11409 = vst [vmem:[#allocation70_spill] sm:$0xff] %v9732_v52 }
 0x3eb   :  { %v8588_v38 = vpack.c.bf16 %v8077_v18, %v1073_v17  ;;  %v672_v18 = vand.u32 2147483647, %v664_v39  ;;  %v651_v17 = vadd.f32 1.0, %v643_v6 }
 0x3ec   :  { %3632 = vperm.xlu1 %8819, %v9535_v29   ;;  %v8091_v25 = vpop.f32.mrb[2].mxu0  ;;  %3443 = vrot.lane.b32.xlu0 %v3424_v41, %s8962_s0  ;;  %v666_v41 = vsub.f32 %v658_v21, %v9282_v1 }
 0x3ed   :  { %8589 = vmatpush3.bf16.msra.mxu0 %v8588_v38  ;;  %v1223_v15 = vpop.f32.mrb[3].mxu0  ;;  %v680_v58 = vsub.f32 1.0, %v672_v18  ;;  %v644_v38 = vadd.f32 %v9637_v42, %v572_v43  ;;  %v659_v12 = vmul.f32 7.5, %v651_v17 }
 0x3ee   :  { %v8594_v5 = vpack.c.bf16 %v8091_v25, %v1223_v15  ;;  %8593 = vmatprep.subr.bf16.mxu0 %v11407_v9  ;;  %v9753_v15 = vmul.f32 %v3676_v3, %v3358_v37  ;;  %v674_v40 = vand.u32 2147483647, %v666_v41 }
 0x3ef   :  { %v9758_v42 = vmax.f32 %v680_v58, 0.0  ;;  %v652_v0 = vadd.f32 1.0, %v644_v38  ;;  %v667_v39 = vsub.f32 %v659_v12, %v9282_v1 }
 0x3f0   :  { %8820 = vset.pattern.permute.xlu1 %v11268_v30  ;;  %8132 = vmatmul.mubr.msk.f32.vlgmr.msra.gmra.mrb[8].mxu0 %vm853_vm4, %v9714_v31  ;;  %11411 = vst [vmem:[#allocation72_spill] sm:$0xff] %v9753_v15  ;;  %v682_v6 = vsub.f32 1.0, %v674_v40 }
 0x3f1   :  { %3445 = vrot.lane.b32.xlu0 %v3428_v28, %s8962_s0  ;;  %4282 = vperm.xlu1 %8820, %v9196_v50   ;;  %11412 = vst [vmem:[#allocation73_spill] sm:$0xff] %v9758_v42  ;;  %v675_v18 = vand.u32 2147483647, %v667_v39  ;;  %v388_v39 = vld [vmem:[%s11191_s2 + $0x8] sm:$0xff] }
 0x3f2   :  { %8595 = vmatpush3.bf16.msra.mxu0 %v8594_v5  ;;  %8145 = vmatprep.mubr.msk.f32.mxu0 %vm8950_vm0, %v11408_v61  ;;  %v3360_v5 = vsub.f32 0.0, %v9255_v62 }
 0x3f3   :  { %8599 = vmatprep.subr.bf16.mxu0 %v11407_v9  ;;  %v683_v58 = vsub.f32 1.0, %v675_v18  ;;  %v11419_v18 = vld [vmem:[#allocation33_spill] sm:$0xff] }
 0x3f4   :  { %v3392_v25 = vmul.f32 %v3376_v2, %v3360_v5  ;;  %v660_v2 = vmul.f32 7.5, %v652_v0 }
 0x3f5   :  { %4286 = vperm.xlu1 %8820, %v9237_v59   ;;  %3726 = vperm.xlu0 %8814, %v9729_v4  }
 0x3f6   :  { %8146 = vmatmul.mubr.msk.f32.vlgmr.msra.gmra.mrb[10].mxu0 %vm853_vm4, %v9732_v52  ;;  %v8084_v16 = vpop.f32.mrb[10].mxu1  ;;  %v3432_v24 = vrot.slane %v3392_v25, %v9160_v13  ;;  %v668_v43 = vsub.f32 %v660_v2, %v9282_v1 }
 0x3f7   :  { %v1148_v60 = vpop.f32.mrb[11].mxu1  ;;  %8159 = vmatprep.mubr.msk.f32.mxu0 %vm8950_vm0, %v11408_v61 }
 0x3f8   :  { %v8591_v28 = vpack.c.bf16 %v8084_v16, %v1148_v60  ;;  %v9774_v16 = vmax.f32 %v682_v6, 0.0  ;;  %v676_v38 = vand.u32 2147483647, %v668_v43  ;;  %v9781_v60 = vmax.f32 %v683_v58, 0.0  ;;  %v11423_v43 = vld [vmem:[#allocation58_spill] sm:$0xff]  ;;  %v398_v58 = vld [vmem:[%s11191_s2 + $0x58] sm:$0xff] }
 0x3f9   :  { %8822 = vset.pattern.permute.xlu1 %v11390_v33  ;;  %3735 = vperm.xlu0 %8814, %v9745_v32  }
 0x3fa   :  { %3744 = vperm.xlu1 %8822, %v9753_v15   ;;  %8592 = vmatpush3.bf16.msra.mxu1 %v8591_v28  ;;  %11413 = vst [vmem:[#allocation74_spill] sm:$0xff] %v9774_v16  ;;  %11414 = vst [vmem:[#allocation75_spill] sm:$0xff] %v9781_v60  ;;  %v387_v28 = vld [vmem:[%s11191_s2] sm:$0xff]  ;;  %v684_v0 = vsub.f32 1.0, %v676_v38  ;;  %v11426_v38 = vld [vmem:[#allocation62_spill] sm:$0xff] }
 0x3fb   :  { %8596 = vmatprep.subr.bf16.mxu1 %v11407_v9 }
 0x3fd   :  { %8821 = vset.pattern.permute.xlu0 %v11268_v30  ;;  %8139 = vmatmul.mubr.msk.f32.vlgmr.msra.gmra.mrb[18].mxu1 %vm853_vm4, %v9758_v42  ;;  %v8098_v37 = vpop.f32.mrb[12].mxu1 }
 0x3fe   :  { %4274 = vperm.xlu0 %8821, %v9181_v45   ;;  %3447 = vrot.lane.b32.xlu1 %v3432_v24, %s8962_s0  ;;  %v1298_v35 = vpop.f32.mrb[13].mxu1  ;;  %v3678_v24 = vpop.permute.xlu1 %3677 }
 0x3ff   :  { %8823 = vset.pattern.permute.xlu1 %v11403_v22  ;;  %8152 = vmatprep.mubr.msk.f32.mxu1 %vm8950_vm0, %v11408_v61  ;;  %v8597_v21 = vpack.c.bf16 %v8098_v37, %v1298_v35  ;;  %v9803_v37 = vmax.f32 %v684_v0, 0.0  ;;  %v392_v35 = vld [vmem:[%s11191_s2 + $0x28] sm:$0xff] }
 0x401   :  { %8598 = vmatpush3.bf16.msra.mxu1 %v8597_v21  ;;  %11415 = vst [vmem:[#allocation76_spill] sm:$0xff] %v9803_v37  ;;  %v11420_v21 = vld [vmem:[#allocation56_spill] sm:$0xff] }
 0x402   :  { %4294 = vperm.xlu0 %8821, %v9220_v56   ;;  %3641 = vperm.xlu1 %8823, %v9539_v49   ;;  %v8105_v17 = vpop.f32.mrb[4].mxu0  ;;  %v3680_v6 = vpop.permute.xlu1 %3679 }
 0x403   :  { %v1373_v3 = vpop.f32.mrb[5].mxu0  ;;  %8602 = vmatprep.subr.bf16.mxu1 %v11407_v9 }
 0x404   :  { %v8600_v41 = vpack.c.bf16 %v8105_v17, %v1373_v3  ;;  %8153 = vmatmul.mubr.msk.f32.vlgmr.msra.gmra.mrb[20].mxu1 %vm853_vm4, %v9774_v16  ;;  %v11422_v17 = vld [vmem:[#allocation14_spill] sm:$0xff]  ;;  %v400_v3 = vld [vmem:[%s11191_s2 + $0x68] sm:$0xff] }
 0x405   :  { %8166 = vmatprep.mubr.msk.f32.mxu1 %vm8950_vm0, %v11408_v61 }
 0x406   :  { %4302 = vperm.xlu0 %8821, %v9262_v63   ;;  %8824 = vset.pattern.permute.xlu1 %v11266_v10  ;;  %v9893_v0 = vpop.permute.xlu1 %3596 }
 0x407   :  { %8601 = vmatpush3.bf16.msra.mxu0 %v8600_v41  ;;  %4326 = vperm.xlu1 %8824, %v9237_v59   ;;  %v11425_v41 = vld [vmem:[#allocation38_spill] sm:$0xff] }
 0x408   :  { %8606 = vmatprep.subr.bf16.mxu0 %v9308_v14  ;;  %v8112_v12 = vpop.f32.mrb[14].mxu1 }
 0x409   :  { %v1448_v25 = vpop.f32.mrb[15].mxu1 }
 0x40a   :  { %8160 = vmatmul.mubr.msk.f32.vlgmr.msra.gmra.mrb[12].mxu0 %vm853_vm4, %v9781_v60  ;;  %8829 = vset.pattern.permute.xlu0 %v11266_v10  ;;  %v8603_v40 = vpack.c.bf16 %v8112_v12, %v1448_v25  ;;  %v11427_v12 = vld [vmem:[#allocation54_spill] sm:$0xff]  ;;  %v402_v25 = vld [vmem:[%s11191_s2 + $0x78] sm:$0xff] }
 0x40b   :  { %8608 = vmatpush3.bf16.msra.mxu0 %v9308_v14  ;;  %4318 = vperm.xlu0 %8829, %v9185_v46   ;;  %v11416_v14 = vsub.f32 0.0, %v9215_v55 }
 0x40c   :  { %8825 = vset.pattern.permute.xlu1 %v11268_v30  ;;  %8614 = vmatprep.subr.bf16.mxu0 %v9335_v8 }
 0x40d   :  { %4290 = vperm.xlu1 %8825, %v9206_v53   ;;  %8173 = vmatprep.mubr.msk.f32.mxu0 %vm853_vm4, %v387_v28  ;;  %v9809_v2 = vmul.f32 %v3678_v24, %v11416_v14  ;;  %v11428_v28 = vld [vmem:[#allocation64_spill] sm:$0xff] }
 0x40e   :  { %8604 = vmatpush3.bf16.msra.mxu1 %v8603_v40  ;;  %8174 = vmatmul.mubr.msk.f32.vlgmr.msra.gmra.mrb[14].mxu0 %vm853_vm4, %v388_v39  ;;  %v11429_v39 = vld [vmem:[#allocation21_spill] sm:$0xff] }
 0x40f   :  { %8610 = vmatprep.subr.bf16.mxu1 %v9314_v26  ;;  %8616 = vmatpush3.bf16.msra.mxu0 %v9335_v8  ;;  %11417 = vst [vmem:[#allocation77_spill] sm:$0xff] %v9809_v2  ;;  %v389_v8 = vld [vmem:[%s11191_s2 + $0x10] sm:$0xff]  ;;  %v45_v24 = vmul.f32 2.0, %v11429_v39 }
 0x410   :  { %4322 = vperm.xlu0 %8829, %v9196_v50   ;;  %8622 = vmatprep.subr.bf16.mxu0 %v9345_v23 }
 0x411   :  { %8826 = vset.pattern.permute.xlu1 %v11390_v33  ;;  %8167 = vmatmul.mubr.msk.f32.vlgmr.msra.gmra.mrb[22].mxu1 %vm853_vm4, %v9803_v37  ;;  %v390_v33 = vld [vmem:[%s11191_s2 + $0x18] sm:$0xff] }
 0x412   :  { %8187 = vmatprep.mubr.msk.f32.mxu0 %vm853_vm4, %v9557_v11  ;;  %3753 = vperm.xlu1 %8826, %v9809_v2   ;;  %v9834_v11 = vmul.f32 %v3680_v6, %v3360_v5  ;;  %v11421_v5 = vld [vmem:[#allocation29_spill] sm:$0xff] }
 0x413   :  { %8612 = vmatpush3.bf16.msra.mxu1 %v9314_v26  ;;  %8188 = vmatmul.mubr.msk.f32.vlgmr.msra.gmra.mrb[16].mxu0 %vm853_vm4, %v392_v35  ;;  %v396_v26 = vld [vmem:[%s11191_s2 + $0x48] sm:$0xff]  ;;  %v11430_v35 = vld [vmem:[#allocation67_spill] sm:$0xff] }
 0x414   :  { %8618 = vmatprep.subr.bf16.mxu1 %v9378_v20  ;;  %8624 = vmatpush3.bf16.msra.mxu0 %v9345_v23  ;;  %11418 = vst [vmem:[#allocation78_spill] sm:$0xff] %v9834_v11  ;;  %v394_v23 = vld [vmem:[%s11191_s2 + $0x38] sm:$0xff]  ;;  %v47_v6 = vmul.f32 0.06666667, %v11430_v35  ;;  %v11433_v35 = vld [vmem:[#allocation30_spill] sm:$0xff] }
 0x415   :  { %4334 = vperm.xlu0 %8829, %v9220_v56   ;;  %8180 = vmatprep.mubr.msk.f32.mxu1 %vm853_vm4, %v389_v8  ;;  %v48_v8 = vmul.f32 0.06666667, %v45_v24 }
 0x416   :  { %8630 = vmatprep.subr.bf16.mxu0 %v11419_v18  ;;  %8181 = vmatmul.mubr.msk.f32.vlgmr.msra.gmra.mrb[24].mxu1 %vm853_vm4, %v390_v33  ;;  %v9901_v33 = vpop.permute.xlu0 %3587 }
 0x417   :  { %8201 = vmatprep.mubr.msk.f32.mxu0 %vm853_vm4, %v11420_v21  ;;  %3762 = vperm.xlu1 %8826, %v9834_v11   ;;  %v9905_v21 = vadd.f32 -1.0, %v47_v6  ;;  %v3308_v6 = vrot.slane %v11433_v35, %v9160_v13 }
 0x418   :  { %8620 = vmatpush3.bf16.msra.mxu1 %v9378_v20  ;;  %8202 = vmatmul.mubr.msk.f32.vlgmr.msra.gmra.mrb[18].mxu0 %vm853_vm4, %v396_v26  ;;  %v11424_v20 = vld [vmem:[#allocation59_spill] sm:$0xff]  ;;  %v11431_v26 = vld [vmem:[#allocation28_spill] sm:$0xff] }
 0x419   :  { %8626 = vmatprep.subr.bf16.mxu1 %v11421_v5  ;;  %8632 = vmatpush3.bf16.msra.mxu0 %v11419_v18  ;;  %v3300_v18 = vrot.slane %v11431_v26, %v9160_v13 }
 0x41a   :  { %4338 = vperm.xlu0 %8829, %v11422_v17   ;;  %8194 = vmatprep.mubr.msk.f32.mxu1 %vm853_vm4, %v11423_v43 }
 0x41b   :  { %8195 = vmatmul.mubr.msk.f32.vlgmr.msra.gmra.mrb[26].mxu1 %vm853_vm4, %v394_v23  ;;  %8215 = vmatprep.mubr.msk.f32.mxu0 %vm853_vm4, %v11424_v20  ;;  %v9907_v23 = vadd.f32 -1.0, %v48_v8 }
 0x41c   :  { %8827 = vset.pattern.permute.xlu1 %v11266_v10  ;;  %8628 = vmatpush3.bf16.msra.mxu1 %v11421_v5 }
 0x41d   :  { %8216 = vmatmul.mubr.msk.f32.vlgmr.msra.gmra.mrb[20].mxu0 %vm853_vm4, %v400_v3  ;;  %4330 = vperm.xlu1 %8827, %v9206_v53   ;;  %v3337_v3 = vmul.f32 %v9905_v21, %v3300_v18  ;;  %v3338_v20 = vmul.f32 %v9907_v23, %v3300_v18  ;;  %v11434_v18 = vld [vmem:[#allocation34_spill] sm:$0xff] }
 0x41e   :  { %8634 = vmatprep.subr.bf16.mxu1 %v11425_v41  ;;  %8830 = vset.pattern.permute.xlu0 %v11403_v22  ;;  %v3316_v27 = vrot.slane %v11434_v18, %v9160_v13 }
 0x41f   :  { %8208 = vmatprep.mubr.msk.f32.mxu1 %vm853_vm4, %v11426_v38  ;;  %3650 = vperm.xlu0 %8830, %v11427_v12  }
 0x420   :  { %8209 = vmatmul.mubr.msk.f32.vlgmr.msra.gmra.mrb[28].mxu1 %vm853_vm4, %v398_v58  ;;  %8637 = vmatprep.subr.bf16.mxu0 %v11407_v9  ;;  %v11432_v58 = vld [vmem:[#allocation46_spill] sm:$0xff] }
 0x421   :  { %8636 = vmatpush3.bf16.msra.mxu1 %v11425_v41  ;;  %8828 = vset.pattern.permute.xlu1 %v11268_v30  ;;  %v3304_v41 = vrot.slane %v11432_v58, %v9160_v13 }
 0x422   :  { %4298 = vperm.xlu1 %8828, %v11422_v17   ;;  %8222 = vmatprep.mubr.msk.f32.mxu1 %vm853_vm4, %v11428_v28 }
 0x423   :  { %8229 = vmatprep.mubr.msk.f32.mxu0 %vm8950_vm0, %v11408_v61  ;;  %8640 = vmatprep.subr.bf16.mxu1 %v11407_v9  ;;  %v3340_v1 = vmul.f32 %v9907_v23, %v3304_v41 }
 0x424   :  { %8223 = vmatmul.mubr.msk.f32.vlgmr.msra.gmra.mrb[30].mxu1 %vm853_vm4, %v402_v25 }
 0x425   :  { %8236 = vmatprep.mubr.msk.f32.mxu1 %vm8950_vm0, %v11408_v61 }
 0x426   :  { %8831 = vset.pattern.permute.xlu1 %v11266_v10  ;;  %v3339_v10 = vmul.f32 %v9905_v21, %v3304_v41 }
 0x427   :  { %4342 = vperm.xlu1 %8831, %v9262_v63  }
 0x42b   :  { %8832 = vset.pattern.permute.xlu1 %v11403_v22 }
 0x433   :  { %v9895_v40 = vpop.permute.xlu1 %3699 }
 0x438   :  { %v9898_v14 = vpop.permute.xlu1 %3605 }
 0x43c   :  { %v9909_v5 = vpop.permute.xlu1 %3614 }
 0x453   :  { %v9911_v43 = vpop.permute.xlu0 %3708 }
 0x457   :  { %v3434_v38 = vpop.permute.xlu0 %3433  ;;  %v9917_v25 = vpop.permute.xlu1 %3717 }
 0x458   :  { %v3457_v28 = vadd.f32 %v3434_v38, %v3337_v3  ;;  %v3458_v24 = vadd.f32 %v3434_v38, %v3338_v20  ;;  %v3341_v20 = vmul.f32 %v9905_v21, %v3308_v6  ;;  %v3342_v38 = vmul.f32 %v9907_v23, %v3308_v6 }
 0x45a   :  { %v3473_v8 = vadd.f32 1.0, %v3457_v28  ;;  %v3474_v26 = vadd.f32 1.0, %v3458_v24  ;;  %v11435_v28 = vld [vmem:[#allocation37_spill] sm:$0xff] }
 0x45b   :  { %v3436_v30 = vpop.permute.xlu0 %3435  ;;  %v3324_v24 = vrot.slane %v11435_v28, %v9160_v13  ;;  %v3346_v28 = vmul.f32 %v9907_v23, %v3316_v27 }
 0x45c   :  { %v3489_v47 = vmul.f32 7.5, %v3473_v8  ;;  %v3490_v58 = vmul.f32 7.5, %v3474_v26  ;;  %v3459_v48 = vadd.f32 %v3436_v30, %v3339_v10  ;;  %v9925_v44 = vpop.permute.xlu1 %4278  ;;  %v3460_v3 = vadd.f32 %v3436_v30, %v3340_v1  ;;  %v11436_v1 = vld [vmem:[#allocation47_spill] sm:$0xff] }
 0x45d   :  { %v3345_v8 = vmul.f32 %v9905_v21, %v3316_v27  ;;  %v3312_v30 = vrot.slane %v11436_v1, %v9160_v13 }
 0x45e   :  { %v3505_v35 = vadd.f32 1.0, %v3489_v47  ;;  %v3506_v62 = vadd.f32 1.0, %v3490_v58  ;;  %v3521_v55 = vsub.f32 16.0, %v3489_v47  ;;  %v3522_v41 = vsub.f32 16.0, %v3490_v58 }
 0x45f   :  { %v3475_v54 = vadd.f32 1.0, %v3459_v48  ;;  %v3476_v51 = vadd.f32 1.0, %v3460_v3  ;;  %v3438_v18 = vpop.permute.xlu0 %3437  ;;  %v9938_v3 = vmul.f32 %v9905_v21, %v3324_v24 }
 0x460   :  { %v3461_v10 = vadd.f32 %v3438_v18, %v3341_v20  ;;  %v3462_v26 = vadd.f32 %v3438_v18, %v3342_v38  ;;  %v3537_v57 = vmin.f32 %v3505_v35, %v3521_v55  ;;  %v3538_v15 = vmin.f32 %v3506_v62, %v3522_v41 }
 0x461   :  { %v3491_v11 = vmul.f32 7.5, %v3475_v54  ;;  %v3492_v6 = vmul.f32 7.5, %v3476_v51  ;;  %v9934_v2 = vpop.permute.xlu1 %4314  ;;  %v3343_v51 = vmul.f32 %v9905_v21, %v3312_v30 }
 0x462   :  { %v3477_v47 = vadd.f32 1.0, %v3461_v10  ;;  %v3478_v58 = vadd.f32 1.0, %v3462_v26  ;;  %v3553_v48 = vmax.f32 %v3537_v57, 0.0  ;;  %v3554_v62 = vmax.f32 %v3538_v15, 0.0 }
 0x463   :  { %v3507_v12 = vadd.f32 1.0, %v3491_v11  ;;  %v3508_v20 = vadd.f32 1.0, %v3492_v6  ;;  %v3523_v38 = vsub.f32 16.0, %v3491_v11  ;;  %v3524_v55 = vsub.f32 16.0, %v3492_v6  ;;  %v3442_v35 = vpop.permute.xlu0 %3441  ;;  %v11438_v11 = vld [vmem:[#allocation48_spill] sm:$0xff] }
 0x464   :  { %v3493_v18 = vmul.f32 7.5, %v3477_v47  ;;  %v3465_v1 = vadd.f32 %v3442_v35, %v3345_v8  ;;  %v3466_v54 = vadd.f32 %v3442_v35, %v3346_v28  ;;  %v3494_v37 = vmul.f32 7.5, %v3478_v58 }
 0x465   :  { %v9941_v16 = vmin.f32 %v3553_v48, 1.0  ;;  %v3539_v27 = vmin.f32 %v3507_v12, %v3523_v38  ;;  %v3344_v26 = vmul.f32 %v9907_v23, %v3312_v30  ;;  %v3320_v6 = vrot.slane %v11438_v11, %v9160_v13 }
 0x466   :  { %v3509_v41 = vadd.f32 1.0, %v3493_v18  ;;  %v3525_v57 = vsub.f32 16.0, %v3493_v18  ;;  %v3481_v32 = vadd.f32 1.0, %v3465_v1  ;;  %v3482_v47 = vadd.f32 1.0, %v3466_v54 }
 0x467   :  { %11437 = vst [vmem:[#allocation33_spill] sm:$0xff] %v9941_v16  ;;  %v9943_v10 = vpop.permute.xlu1 %3623  ;;  %3835 = vperm.xlu1 %8832, %v9941_v16   ;;  %v3440_v8 = vpop.permute.xlu0 %3439  ;;  %v3350_v28 = vmul.f32 %v9907_v23, %v3324_v24  ;;  %v3540_v58 = vmin.f32 %v3508_v20, %v3524_v55  ;;  %v3555_v38 = vmax.f32 %v3539_v27, 0.0  ;;  %v3510_v35 = vadd.f32 1.0, %v3494_v37 }
 0x468   :  { %v3463_v48 = vadd.f32 %v3440_v8, %v3343_v51  ;;  %v3464_v15 = vadd.f32 %v3440_v8, %v3344_v26  ;;  %v3541_v12 = vmin.f32 %v3509_v41, %v3525_v57  ;;  %v3526_v18 = vsub.f32 16.0, %v3494_v37 }
 0x469   :  { %v3498_v60 = vmul.f32 7.5, %v3482_v47  ;;  %v9950_v42 = vmin.f32 %v3554_v62, 1.0  ;;  %v3497_v30 = vmul.f32 7.5, %v3481_v32  ;;  %v3347_v1 = vmul.f32 %v9905_v21, %v3320_v6 }
 0x46a   :  { %v3480_v49 = vadd.f32 1.0, %v3464_v15  ;;  %v3557_v54 = vmax.f32 %v3541_v12, 0.0  ;;  %v3479_v24 = vadd.f32 1.0, %v3463_v48  ;;  %v3348_v55 = vmul.f32 %v9907_v23, %v3320_v6 }
 0x46b   :  { %11439 = vst [vmem:[#allocation56_spill] sm:$0xff] %v9950_v42  ;;  %v9952_v11 = vpop.permute.xlu1 %3632  ;;  %v3514_v16 = vadd.f32 1.0, %v3498_v60  ;;  %v3530_v52 = vsub.f32 16.0, %v3498_v60  ;;  %3840 = vperm.xlu1 %8832, %v9950_v42   ;;  %v3444_v20 = vpop.permute.xlu0 %3443  ;;  %v9957_v27 = vmin.f32 %v3555_v38, 1.0  ;;  %v3556_v62 = vmax.f32 %v3540_v58, 0.0 }
 0x46c   :  { %v3496_v51 = vmul.f32 7.5, %v3480_v49  ;;  %v3467_v37 = vadd.f32 %v3444_v20, %v3347_v1  ;;  %v3468_v32 = vadd.f32 %v3444_v20, %v3348_v55  ;;  %v9959_v41 = vmin.f32 %v3557_v54, 1.0 }
 0x46d   :  { %11440 = vst [vmem:[#allocation29_spill] sm:$0xff] %v9957_v27  ;;  %v3546_v57 = vmin.f32 %v3514_v16, %v3530_v52  ;;  %v3542_v26 = vmin.f32 %v3510_v35, %v3526_v18  ;;  %v3513_v47 = vadd.f32 1.0, %v3497_v30  ;;  %v3529_v8 = vsub.f32 16.0, %v3497_v30 }
 0x46e   :  { %11441 = vst [vmem:[#allocation14_spill] sm:$0xff] %v9959_v41  ;;  %v3512_v15 = vadd.f32 1.0, %v3496_v51  ;;  %v3528_v60 = vsub.f32 16.0, %v3496_v51  ;;  %v3495_v48 = vmul.f32 7.5, %v3479_v24  ;;  %v3483_v12 = vadd.f32 1.0, %v3467_v37  ;;  %3855 = vperm.xlu0 %8830, %v9959_v41  }
 0x46f   :  { %v3484_v42 = vadd.f32 1.0, %v3468_v32  ;;  %3845 = vperm.xlu1 %8832, %v9957_v27   ;;  %v3446_v49 = vpop.permute.xlu0 %3445  ;;  %v3562_v58 = vmax.f32 %v3546_v57, 0.0  ;;  %v9966_v52 = vmin.f32 %v3556_v62, 1.0  ;;  %v3558_v54 = vmax.f32 %v3542_v26, 0.0 }
 0x470   :  { %v9963_v6 = vpop.permute.xlu1 %4282  ;;  %v3469_v38 = vadd.f32 %v3446_v49, %v9938_v3  ;;  %v3470_v1 = vadd.f32 %v3446_v49, %v3350_v28  ;;  %v3544_v16 = vmin.f32 %v3512_v15, %v3528_v60  ;;  %v3499_v35 = vmul.f32 7.5, %v3483_v12  ;;  %v11443_v49 = vld [vmem:[#allocation52_spill] sm:$0xff] }
 0x471   :  { %11442 = vst [vmem:[#allocation58_spill] sm:$0xff] %v9966_v52  ;;  %v3500_v18 = vmul.f32 7.5, %v3484_v42  ;;  %v9968_v30 = vmin.f32 %v3562_v58, 1.0  ;;  %v3545_v51 = vmin.f32 %v3513_v47, %v3529_v8  ;;  %v3511_v37 = vadd.f32 1.0, %v3495_v48 }
 0x472   :  { %v3485_v24 = vadd.f32 1.0, %v3469_v38  ;;  %v3486_v20 = vadd.f32 1.0, %v3470_v1  ;;  %v3560_v55 = vmax.f32 %v3544_v16, 0.0  ;;  %v3527_v32 = vsub.f32 16.0, %v3495_v48 }
 0x473   :  { %v3516_v41 = vadd.f32 1.0, %v3500_v18  ;;  %v3532_v27 = vsub.f32 16.0, %v3500_v18  ;;  %3880 = vperm.xlu0 %8830, %v9968_v30   ;;  %3850 = vperm.xlu1 %8832, %v9966_v52   ;;  %v3515_v28 = vadd.f32 1.0, %v3499_v35  ;;  %v3531_v62 = vsub.f32 16.0, %v3499_v35 }
 0x474   :  { %v9972_v3 = vpop.permute.xlu1 %4286  ;;  %v3501_v42 = vmul.f32 7.5, %v3485_v24  ;;  %v3502_v57 = vmul.f32 7.5, %v3486_v20  ;;  %v9974_v15 = vmin.f32 %v3560_v55, 1.0  ;;  %v9976_v26 = vmin.f32 %v3558_v54, 1.0 }
 0x475   :  { %v3548_v60 = vmin.f32 %v3516_v41, %v3532_v27  ;;  %v3561_v47 = vmax.f32 %v3545_v51, 0.0  ;;  %v3328_v58 = vrot.slane %v11443_v49, %v9160_v13  ;;  %v3543_v38 = vmin.f32 %v3511_v37, %v3527_v32 }
 0x476   :  { %v3518_v8 = vadd.f32 1.0, %v3502_v57  ;;  %v3534_v48 = vsub.f32 16.0, %v3502_v57  ;;  %v3517_v1 = vadd.f32 1.0, %v3501_v42  ;;  %v3533_v16 = vsub.f32 16.0, %v3501_v42 }
 0x477   :  { %3870 = vperm.xlu0 %8830, %v9974_v15   ;;  %3860 = vperm.xlu1 %8832, %v9976_v26   ;;  %v3564_v12 = vmax.f32 %v3548_v60, 0.0  ;;  %v9986_v27 = vmin.f32 %v3561_v47, 1.0  ;;  %v3559_v41 = vmax.f32 %v3543_v38, 0.0  ;;  %v3547_v24 = vmin.f32 %v3515_v28, %v3531_v62 }
 0x478   :  { %v3550_v18 = vmin.f32 %v3518_v8, %v3534_v48  ;;  %v3351_v55 = vmul.f32 %v9905_v21, %v3328_v58  ;;  %v3352_v51 = vmul.f32 %v9907_v23, %v3328_v58  ;;  %v3549_v42 = vmin.f32 %v3517_v1, %v3533_v16 }
 0x479   :  { %v9982_v35 = vpop.permute.xlu1 %3744  ;;  %v9984_v54 = vmin.f32 %v3564_v12, 1.0  ;;  %v9994_v8 = vmin.f32 %v3559_v41, 1.0  ;;  %v3563_v47 = vmax.f32 %v3547_v24, 0.0 }
 0x47a   :  { %v3566_v20 = vmax.f32 %v3550_v18, 0.0  ;;  %v3565_v23 = vmax.f32 %v3549_v42, 0.0 }
 0x47b   :  { %11444 = vst [vmem:[#allocation59_spill] sm:$0xff] %v9984_v54  ;;  %3890 = vperm.xlu0 %8830, %v9984_v54   ;;  %3875 = vperm.xlu1 %8832, %v9986_v27   ;;  %11446 = vst [vmem:[#allocation62_spill] sm:$0xff] %v9994_v8  ;;  %v9998_v21 = vmin.f32 %v3563_v47, 1.0  ;;  %v8965_v47 = vmov 7  }
 0x47c   :  { %v9992_v32 = vmin.f32 %v3566_v20, 1.0  ;;  %v10001_v16 = vmin.f32 %v3565_v23, 1.0  ;;  %v11453_v23 = vld [vmem:[#allocation42_spill] sm:$0xff] }
 0x47d   :  { %v3448_v37 = vpop.permute.xlu1 %3447 }
 0x47e   :  { %11445 = vst [vmem:[#allocation38_spill] sm:$0xff] %v9992_v32  ;;  %v3471_v57 = vadd.f32 %v3448_v37, %v3351_v55  ;;  %v3472_v60 = vadd.f32 %v3448_v37, %v3352_v51  ;;  %v11448_v37 = vld [vmem:[#allocation6_spill] sm:$0xff] }
 0x47f   :  { %3900 = vperm.xlu0 %8830, %v9992_v32   ;;  %3865 = vperm.xlu1 %8832, %v9994_v8   ;;  %v362_v42 = vand.u32 2147483647, %v11448_v37 }
 0x480   :  { %v3487_v48 = vadd.f32 1.0, %v3471_v57  ;;  %v3488_v28 = vadd.f32 1.0, %v3472_v60  ;;  %v11449_v57 = vmov 4  }
 0x481   :  { %v363_v60 = vsub.f32 0.0, %v362_v42 }
 0x482   :  { %v3503_v62 = vmul.f32 7.5, %v3487_v48  ;;  %v3504_v12 = vmul.f32 7.5, %v3488_v28  ;;  %v11450_v48 = vld [vmem:[#allocation23_spill] sm:$0xff] }
 0x483   :  { %3885 = vperm.xlu1 %8832, %v9998_v21   ;;  %v364_v28 = vmul.f32 1.442695, %v363_v60  ;;  %v11460_v60 = vld [vmem:[#allocation45_spill] sm:$0xff] }
 0x484   :  { %v3519_v49 = vadd.f32 1.0, %v3503_v62  ;;  %v3520_v58 = vadd.f32 1.0, %v3504_v12  ;;  %v3535_v38 = vsub.f32 16.0, %v3503_v62  ;;  %v3536_v1 = vsub.f32 16.0, %v3504_v12  ;;  %v11451_v62 = vld [vmem:[#allocation32_spill] sm:$0xff] }
 0x485   :  { %8897 = vpow2.f32 %v364_v28  ;;  %v11452_v12 = vld [vmem:[#allocation36_spill] sm:$0xff]  ;;  %v361_v28 = vmin.f32 %v11448_v37, 0.0  ;;  %v3705_v37 = vrot.slane %v9895_v40, %v9160_v13 }
 0x486   :  { %v3551_v18 = vmin.f32 %v3519_v49, %v3535_v38  ;;  %v3552_v41 = vmin.f32 %v3520_v58, %v3536_v1  ;;  %v11454_v49 = vld [vmem:[#allocation40_spill] sm:$0xff]  ;;  %v11457_v38 = vmov 6   ;;  %v10029_v1 = vpop.permute.xlu0 %3726 }
 0x487   :  { %3895 = vperm.xlu1 %8832, %v10001_v16   ;;  %v11455_v58 = vld [vmem:[#allocation44_spill] sm:$0xff] }
 0x488   :  { %v3567_v24 = vmax.f32 %v3551_v18, 0.0  ;;  %v3568_v20 = vmax.f32 %v3552_v41, 0.0 }
 0x48a   :  { %v10004_v55 = vmin.f32 %v3567_v24, 1.0  ;;  %v10006_v51 = vmin.f32 %v3568_v20, 1.0  ;;  %v11458_v24 = vld [vmem:[#allocation18_spill] sm:$0xff] }
 0x48b   :  { %v51_v20 = vmul.f32 0.06666667, %v11458_v24 }
 0x48c   :  { %11447 = vst [vmem:[#allocation64_spill] sm:$0xff] %v10004_v55  ;;  %3905 = vperm.xlu1 %8832, %v10004_v55   ;;  %3910 = vperm.xlu0 %8830, %v10006_v51  }
 0x490   :  { %8833 = vset.pattern.permute.xlu1 %v11449_v57  ;;  %8836 = vset.pattern.permute.xlu0 %v8965_v47 }
 0x491   :  { %4146 = vperm.xlu1 %8833, %v11450_v48   ;;  %4194 = vperm.xlu0 %8836, %v9196_v50   ;;  %v8898_v50 = vpop.eup %8897 }
 0x495   :  { %8834 = vset.pattern.permute.xlu1 %v8965_v47  ;;  %8837 = vset.pattern.permute.xlu0 %v11449_v57 }
 0x496   :  { %4186 = vperm.xlu1 %8834, %v9181_v45   ;;  %4150 = vperm.xlu0 %8837, %v11451_v62   ;;  %v366_v45 = vadd.f32 1.0, %v8898_v50 }
 0x498   :  { %8899 = vlog2.f32 %v366_v45 }
 0x49a   :  { %4190 = vperm.xlu1 %8834, %v9185_v46   ;;  %4154 = vperm.xlu0 %8837, %v11452_v12   ;;  %v11456_v46 = vld [vmem:[#allocation26_spill] sm:$0xff] }
 0x49e   :  { %8835 = vset.pattern.permute.xlu1 %v11449_v57  ;;  %4166 = vperm.xlu0 %8837, %v11453_v23   ;;  %v3593_v23 = vrot.slane %v9901_v33, %v9160_v13 }
 0x49f   :  { %4158 = vperm.xlu1 %8835, %v11454_v49   ;;  %v8901_v49 = vld [vmem:[%s11194_s5] sm:$0xf] }
 0x4a2   :  { %4170 = vperm.xlu0 %8837, %v11455_v58   ;;  %v8900_v18 = vpop.eup %8899 }
 0x4a3   :  { %8838 = vset.pattern.permute.xlu1 %v8965_v47  ;;  %v368_v41 = vmul.f32 0.6931472, %v8900_v18  ;;  %v11462_v18 = vld [vmem:[#allocation7_spill] sm:$0xff] }
 0x4a4   :  { %4198 = vperm.xlu1 %8838, %v9237_v59   ;;  %v3736_v59 = vpop.permute.xlu0 %3735 }
 0x4a5   :  { %v369_v12 = vsub.f32 %v361_v28, %v368_v41  ;;  %v11463_v41 = vld [vmem:[#allocation22_spill] sm:$0xff] }
 0x4a6   :  { %8842 = vset.pattern.permute.xlu0 %v8965_v47  ;;  %v4017_v24 = vmul.f32 %v11463_v41, %v11462_v18  ;;  %v3620_v18 = vrot.slane %v9909_v5, %v9160_v13  ;;  %v3741_v41 = vrot.slane %v3736_v59, %v9160_v13  ;;  %v3732_v5 = vrot.slane %v10029_v1, %v9160_v13 }
 0x4a7   :  { %4210 = vperm.xlu0 %8842, %v11422_v17   ;;  %v11459_v17 = vld [vmem:[#allocation5_spill] sm:$0xff] }
 0x4a8   :  { %8839 = vset.pattern.permute.xlu1 %v11449_v57  ;;  %v372_v42 = vsub.s32 3, %v11459_v17  ;;  %v4275_v58 = vpop.permute.xlu0 %4274 }
 0x4a9   :  { %4162 = vperm.xlu1 %8839, %v11456_v46  }
 0x4aa   :  { %v373_v50 = vrot.slane %v8901_v49, %v372_v42  ;;  %v3602_v42 = vrot.slane %v9893_v0, %v9160_v13 }
 0x4ab   :  { %8848 = vset.pattern.permute.xlu0 %v11457_v38 }
 0x4ac   :  { %v10063_v40 = vpop.permute.xlu0 %4294 }
 0x4ad   :  { %8840 = vset.pattern.permute.xlu1 %v8965_v47 }
 0x4ae   :  { %4202 = vperm.xlu1 %8840, %v9206_v53   ;;  %v10039_v53 = vpop.permute.xlu1 %3641 }
 0x4b2   :  { %4206 = vperm.xlu1 %8840, %v9220_v56   ;;  %v10041_v56 = vadd.f32 -1.0, %v51_v20  ;;  %v4327_v20 = vpop.permute.xlu1 %4326 }
 0x4b4   :  { %v3657_v33 = vmul.f32 %v10041_v56, %v3593_v23  ;;  %v3658_v23 = vmul.f32 %v10041_v56, %v3602_v42  ;;  %v11465_v42 = vld [vmem:[#allocation19_spill] sm:$0xff] }
 0x4b5   :  { %v4308_v1 = vmul.f32 %v11465_v42, %v9972_v3  ;;  %v11470_v3 = vld [vmem:[#allocation50_spill] sm:$0xff] }
 0x4b6   :  { %8841 = vset.pattern.permute.xlu1 %v11449_v57  ;;  %v3769_v28 = vadd.f32 %v3705_v37, %v3657_v33  ;;  %v10075_v37 = vpop.permute.xlu1 %4290 }
 0x4b7   :  { %4174 = vperm.xlu1 %8841, %v11460_v60   ;;  %v374_v60 = vadd.f32 %v373_v50, %v369_v12  ;;  %v10069_v12 = vrot.slane %v4017_v24, %v9160_v13  ;;  %v10083_v24 = vpop.permute.xlu0 %4302 }
 0x4b8   :  { %v10036_v48 = vpop.f32.mrb[6].mxu0  ;;  %v3777_v49 = vadd.f32 1.0, %v3769_v28  ;;  %v4305_v28 = vmul.f32 %v11465_v42, %v4275_v58  ;;  %v3660_v58 = vmul.f32 %v10041_v56, %v3620_v18  ;;  %v4306_v18 = vmul.f32 %v11465_v42, %v9925_v44 }
 0x4b9   :  { %v8119_v62 = vpop.f32.mrb[7].mxu0 }
 0x4ba   :  { %v3723_v62 = vrot.slane %v9917_v25, %v9160_v13  ;;  %v3785_v33 = vmul.f32 7.5, %v3777_v49 }
 0x4bb   :  { %8843 = vset.pattern.permute.xlu1 %v8965_v47  ;;  %v3611_v47 = vrot.slane %v9898_v14, %v9160_v13 }
 0x4bc   :  { %v10048_v45 = vpop.f32.mrb[16].mxu1  ;;  %4214 = vperm.xlu1 %8843, %v9262_v63   ;;  %v3714_v63 = vrot.slane %v9911_v43, %v9160_v13 }
 0x4bd   :  { %11461 = vst [vmem:[#allocation21_spill] sm:$0xff] %v10048_v45  ;;  %v8126_v46 = vpop.f32.mrb[17].mxu1  ;;  %v3659_v50 = vmul.f32 %v10041_v56, %v3611_v47 }
 0x4be   :  { %v3770_v43 = vadd.f32 %v3714_v63, %v3658_v23  ;;  %v3629_v46 = vrot.slane %v9943_v10, %v9160_v13 }
 0x4bf   :  { %v3771_v25 = vadd.f32 %v3723_v62, %v3659_v50  ;;  %v11467_v62 = vld [vmem:[#allocation41_spill] sm:$0xff] }
 0x4c0   :  { %378 = vrot.lane.b32.xlu1 %v374_v60, %s8954_s29  ;;  %v3638_v60 = vrot.slane %v9952_v11, %v9160_v13  ;;  %v3778_v63 = vadd.f32 1.0, %v3770_v43  ;;  %v3661_v10 = vmul.f32 %v10041_v56, %v3629_v46  ;;  %v10097_v11 = vpop.permute.xlu1 %3753  ;;  %v4345_v43 = vadd.f32 %v9934_v2, %v4305_v28 }
 0x4c1   :  { %8844 = vset.pattern.permute.xlu1 %v11403_v22  ;;  %v3779_v23 = vadd.f32 1.0, %v3771_v25  ;;  %v3793_v46 = vadd.f32 1.0, %v3785_v33  ;;  %v11468_v25 = vld [vmem:[#allocation49_spill] sm:$0xff] }
 0x4c2   :  { %v3773_v49 = vadd.f32 %v3741_v41, %v3661_v10  ;;  %v3662_v50 = vmul.f32 %v10041_v56, %v3638_v60  ;;  %v3786_v17 = vmul.f32 7.5, %v3778_v63  ;;  %v4348_v10 = vadd.f32 %v4327_v20, %v4308_v1 }
 0x4c3   :  { %v10071_v0 = vpop.f32.mrb[8].mxu0  ;;  %v4353_v2 = vadd.f32 1.0, %v4345_v43  ;;  %v11471_v43 = vld [vmem:[#allocation51_spill] sm:$0xff] }
 0x4c4   :  { %11464 = vst [vmem:[#allocation67_spill] sm:$0xff] %v10071_v0  ;;  %v8133_v14 = vpop.f32.mrb[9].mxu0  ;;  %4074 = vperm.xlu1 %8844, %v10069_v12   ;;  %v3772_v0 = vadd.f32 %v3732_v5, %v3660_v58  ;;  %v3781_v41 = vadd.f32 1.0, %v3773_v49  ;;  %v10109_v28 = vpop.permute.xlu1 %3762  ;;  %v4356_v44 = vadd.f32 1.0, %v4348_v10 }
 0x4c5   :  { %v3750_v14 = vrot.slane %v9982_v35, %v9160_v13  ;;  %v3787_v35 = vmul.f32 7.5, %v3779_v23  ;;  %v4361_v20 = vmul.f32 7.5, %v4353_v2 }
 0x4c6   :  { %v3780_v5 = vadd.f32 1.0, %v3772_v0  ;;  %v3789_v55 = vmul.f32 7.5, %v3781_v41  ;;  %v4307_v0 = vmul.f32 %v11465_v42, %v9963_v6 }
 0x4c7   :  { %v3795_v23 = vadd.f32 1.0, %v3787_v35  ;;  %v4370_v10 = vsub.f32 %v4361_v20, %v11429_v39 }
 0x4c8   :  { %8845 = vset.pattern.permute.xlu1 %v11449_v57  ;;  %v3788_v1 = vmul.f32 7.5, %v3780_v5 }
 0x4c9   :  { %v10089_v47 = vpop.f32.mrb[10].mxu0  ;;  %6850 = vperm.xlu1 %8845, %v11467_v62   ;;  %v4319_v62 = vpop.permute.xlu0 %4318 }
 0x4ca   :  { %11466 = vst [vmem:[#allocation28_spill] sm:$0xff] %v10089_v47  ;;  %v8147_v59 = vpop.f32.mrb[11].mxu0  ;;  %v3774_v47 = vadd.f32 %v3750_v14, %v3662_v50  ;;  %v4346_v58 = vadd.f32 %v4319_v62, %v4306_v18  ;;  %v3803_v14 = vsub.f32 16.0, %v3787_v35  ;;  %v3802_v50 = vsub.f32 16.0, %v3786_v17  ;;  %v4331_v18 = vpop.permute.xlu1 %4330 }
 0x4cb   :  { %v3801_v59 = vsub.f32 16.0, %v3785_v33  ;;  %v3805_v35 = vsub.f32 16.0, %v3789_v55 }
 0x4cc   :  { %v3782_v33 = vadd.f32 1.0, %v3774_v47  ;;  %v4364_v47 = vmul.f32 7.5, %v4356_v44 }
 0x4cd   :  { %6858 = vperm.xlu1 %8845, %v11468_v25   ;;  %v3809_v45 = vmin.f32 %v3793_v46, %v3801_v59  ;;  %v3794_v25 = vadd.f32 1.0, %v3786_v17  ;;  %v4323_v49 = vpop.permute.xlu0 %4322  ;;  %v3811_v46 = vmin.f32 %v3795_v23, %v3803_v14  ;;  %v11472_v17 = vld [vmem:[#allocation20_spill] sm:$0xff]  ;;  %v3804_v23 = vsub.f32 16.0, %v3788_v1 }
 0x4ce   :  { %v3790_v62 = vmul.f32 7.5, %v3782_v33  ;;  %v4369_v41 = vsub.f32 %v4361_v20, %v11472_v17  ;;  %v4347_v2 = vadd.f32 %v4323_v49, %v4307_v0  ;;  %v3796_v33 = vadd.f32 1.0, %v3788_v1 }
 0x4cf   :  { %v3817_v32 = vmax.f32 %v3809_v45, 0.0  ;;  %v3810_v59 = vmin.f32 %v3794_v25, %v3802_v50  ;;  %v11474_v25 = vld [vmem:[#allocation66_spill] sm:$0xff]  ;;  %v3819_v14 = vmax.f32 %v3811_v46, 0.0  ;;  %v3647_v49 = vrot.slane %v10039_v53, %v9160_v13 }
 0x4d0   :  { %v10107_v60 = vpop.f32.mrb[18].mxu1  ;;  %v3798_v50 = vadd.f32 1.0, %v3790_v62  ;;  %v3806_v44 = vsub.f32 16.0, %v3790_v62  ;;  %v4375_v20 = vsub.f32 %v4364_v47, %v11472_v17  ;;  %v4385_v0 = vand.u32 2147483647, %v4369_v41 }
 0x4d1   :  { %11469 = vst [vmem:[#allocation46_spill] sm:$0xff] %v10107_v60  ;;  %v8140_v63 = vpop.f32.mrb[19].mxu1  ;;  %6866 = vperm.xlu1 %8845, %v11470_v3   ;;  %v4354_v60 = vadd.f32 1.0, %v4346_v58  ;;  %v4335_v3 = vpop.permute.xlu0 %4334  ;;  %v10120_v6 = vmin.f32 %v3817_v32, 1.0  ;;  %v4309_v32 = vmul.f32 %v11465_v42, %v10075_v37  ;;  %v4355_v1 = vadd.f32 1.0, %v4347_v2 }
 0x4d2   :  { %v3797_v63 = vadd.f32 1.0, %v3789_v55  ;;  %v3818_v55 = vmax.f32 %v3810_v59, 0.0  ;;  %v3759_v53 = vrot.slane %v10097_v11, %v9160_v13  ;;  %v3812_v54 = vmin.f32 %v3796_v33, %v3804_v23 }
 0x4d3   :  { %v4362_v58 = vmul.f32 7.5, %v4354_v60  ;;  %v4376_v60 = vsub.f32 %v4364_v47, %v11429_v39  ;;  %v4349_v47 = vadd.f32 %v4331_v18, %v4309_v32  ;;  %v3814_v37 = vmin.f32 %v3798_v50, %v3806_v44 }
 0x4d4   :  { %v4310_v41 = vmul.f32 %v11465_v42, %v10063_v40  ;;  %v4391_v2 = vand.u32 2147483647, %v4375_v20  ;;  %v4401_v8 = vsub.f32 1.0, %v4385_v0  ;;  %v10148_v20 = vmul.f32 %v11465_v42, %v10083_v24 }
 0x4d5   :  { %6874 = vperm.xlu1 %8845, %v11471_v43   ;;  %v3813_v43 = vmin.f32 %v3797_v63, %v3805_v35  ;;  %v4371_v46 = vsub.f32 %v4362_v58, %v11472_v17  ;;  %v4372_v62 = vsub.f32 %v4362_v58, %v11429_v39  ;;  %v10136_v63 = vmin.f32 %v3819_v14, 1.0 }
 0x4d6   :  { %v10138_v35 = vmin.f32 %v3818_v55, 1.0  ;;  %v4392_v58 = vand.u32 2147483647, %v4376_v60  ;;  %v3820_v55 = vmax.f32 %v3812_v54, 0.0  ;;  %v4350_v52 = vadd.f32 %v4335_v3, %v4310_v41 }
 0x4d7   :  { %v10117_v5 = vpop.f32.mrb[20].mxu1  ;;  %v3821_v18 = vmax.f32 %v3813_v43, 0.0  ;;  %v4387_v23 = vand.u32 2147483647, %v4371_v46  ;;  %v4357_v50 = vadd.f32 1.0, %v4349_v47  ;;  %v4407_v60 = vsub.f32 1.0, %v4391_v2 }
 0x4d8   :  { %11473 = vst [vmem:[#allocation30_spill] sm:$0xff] %v10117_v5  ;;  %v8154_v45 = vpop.f32.mrb[21].mxu1  ;;  %v4299_v5 = vpop.permute.xlu1 %4298  ;;  %v4408_v0 = vsub.f32 1.0, %v4392_v58  ;;  %v4417_v54 = vmax.f32 %v4401_v8, 0.0  ;;  %v10159_v2 = vmin.f32 %v3820_v55, 1.0 }
 0x4d9   :  { %8846 = vset.pattern.permute.xlu1 %v11457_v38  ;;  %v4386_v45 = vand.u32 2147483647, %v4370_v10  ;;  %v3663_v10 = vmul.f32 %v10041_v56, %v3647_v49  ;;  %v3822_v49 = vmax.f32 %v3814_v37, 0.0  ;;  %v4311_v43 = vmul.f32 %v11465_v42, %v4299_v5 }
 0x4da   :  { %6922 = vperm.xlu1 %8846, %v11474_v25   ;;  %v10157_v42 = vmin.f32 %v3821_v18, 1.0  ;;  %v4365_v5 = vmul.f32 7.5, %v4357_v50 }
 0x4db   :  { %v4402_v11 = vsub.f32 1.0, %v4386_v45  ;;  %v3775_v14 = vadd.f32 %v3759_v53, %v3663_v10  ;;  %v4403_v53 = vsub.f32 1.0, %v4387_v23  ;;  %v10161_v58 = vmin.f32 %v3822_v49, 1.0 }
 0x4dc   :  { %v10143_v44 = vpop.permute.xlu1 %4342 }
 0x4dd   :  { %v10129_v25 = vpop.f32.mrb[12].mxu0  ;;  %v4418_v3 = vmax.f32 %v4402_v11, 0.0  ;;  %v3783_v24 = vadd.f32 1.0, %v3775_v14  ;;  %v4423_v11 = vmax.f32 %v4407_v60, 0.0  ;;  %v4419_v55 = vmax.f32 %v4403_v53, 0.0 }
 0x4de   :  { %11475 = vst [vmem:[#allocation34_spill] sm:$0xff] %v10129_v25  ;;  %v8161_v59 = vpop.f32.mrb[13].mxu0  ;;  %6930 = vperm.xlu1 %8846, %v9645_v34   ;;  %v4339_v25 = vpop.permute.xlu0 %4338  ;;  %v4388_v34 = vand.u32 2147483647, %v4372_v62  ;;  %v4378_v60 = vsub.f32 %v4365_v5, %v11429_v39 }
 0x4df   :  { %v4363_v59 = vmul.f32 7.5, %v4355_v1 }
 0x4e0   :  { %v4404_v47 = vsub.f32 1.0, %v4388_v34 }
 0x4e1   :  { %v8175_v33 = vpop.f32.mrb[14].mxu0  ;;  %v4373_v1 = vsub.f32 %v4363_v59, %v11472_v17  ;;  %v4374_v46 = vsub.f32 %v4363_v59, %v11429_v39  ;;  %v4424_v59 = vmax.f32 %v4408_v0, 0.0 }
 0x4e2   :  { %v2121_v32 = vpop.f32.mrb[15].mxu0  ;;  %8847 = vset.pattern.permute.xlu1 %v11449_v57  ;;  %v3651_v37 = vpop.permute.xlu0 %3650  ;;  %v4420_v50 = vmax.f32 %v4404_v47, 0.0 }
 0x4e3   :  { %v8638_v40 = vpack.c.bf16 %v8175_v33, %v2121_v32  ;;  %6882 = vperm.xlu1 %8847, %v9525_v7   ;;  %v4358_v7 = vadd.f32 1.0, %v4350_v52  ;;  %v4351_v33 = vadd.f32 %v4339_v25, %v4311_v43  ;;  %v4389_v34 = vand.u32 2147483647, %v4373_v1 }
 0x4e4   :  { %v10152_v45 = vpop.f32.mrb[22].mxu1  ;;  %v4390_v18 = vand.u32 2147483647, %v4374_v46  ;;  %v3656_v52 = vrot.slane %v3651_v37, %v9160_v13  ;;  %v10169_v32 = vpack.c.bf16 %v4418_v3, %v4417_v54  ;;  %v3768_v54 = vrot.slane %v10109_v28, %v9160_v13 }
 0x4e5   :  { %v8168_v62 = vpop.f32.mrb[23].mxu1  ;;  %8639 = vmatpush3.bf16.msra.mxu0 %v8638_v40  ;;  %v10171_v40 = vmul.f32 7.5, %v3783_v24  ;;  %v10174_v49 = vmul.f32 7.5, %v4358_v7  ;;  %v4359_v3 = vadd.f32 1.0, %v4351_v33  ;;  %v10183_v53 = vpack.c.bf16 %v4424_v59, %v4423_v11 }
 0x4e6   :  { %v8189_v41 = vpop.f32.mrb[16].mxu0  ;;  %8643 = vmatprep.subr.bf16.mxu0 %v11407_v9  ;;  %v3836_v8 = vpop.permute.xlu1 %3835  ;;  %11476 = vst [vmem:[#allocation37_spill] sm:$0xff] %v10169_v32  ;;  %v4405_v47 = vsub.f32 1.0, %v4389_v34  ;;  %v4406_v24 = vsub.f32 1.0, %v4390_v18  ;;  %v3664_v37 = vmul.f32 %v10041_v56, %v3656_v52  ;;  %v10188_v7 = vpack.c.bf16 %v4420_v50, %v4419_v55 }
 0x4e7   :  { %v2283_v10 = vpop.f32.mrb[17].mxu0  ;;  %6890 = vperm.xlu1 %8847, %v9535_v29   ;;  %v3913_v25 = vmul.f32 %v3836_v8, %v10120_v6  ;;  %11477 = vst [vmem:[#allocation47_spill] sm:$0xff] %v10183_v53  ;;  %v4352_v28 = vadd.f32 %v10143_v44, %v10148_v20  ;;  %v4379_v8 = vsub.f32 %v10174_v49, %v11472_v17  ;;  %v4394_v59 = vand.u32 2147483647, %v4378_v60 }
 0x4e8   :  { %v8644_v23 = vpack.c.bf16 %v8189_v41, %v2283_v10  ;;  %8230 = vmatmul.mubr.msk.f32.vlgmr.msra.gmra.mrb[22].mxu0 %vm853_vm4, %v9674_v36  ;;  %v4377_v36 = vsub.f32 %v4365_v5, %v11472_v17  ;;  %11478 = vst [vmem:[#allocation48_spill] sm:$0xff] %v10188_v7  ;;  %v3799_v10 = vadd.f32 1.0, %v10171_v40  ;;  %v3807_v44 = vsub.f32 16.0, %v10171_v40 }
 0x4e9   :  { %v8182_v14 = vpop.f32.mrb[24].mxu1  ;;  %8243 = vmatprep.mubr.msk.f32.mxu0 %vm8950_vm0, %v11408_v61  ;;  %v3945_v5 = vmax.f32 %v3913_v25, 0.0  ;;  %v4367_v20 = vmul.f32 7.5, %v4359_v3  ;;  %v4422_v55 = vmax.f32 %v4406_v24, 0.0  ;;  %v4380_v50 = vsub.f32 %v10174_v49, %v11429_v39 }
 0x4ea   :  { %v2202_v29 = vpop.f32.mrb[25].mxu1  ;;  %8645 = vmatpush3.bf16.msra.mxu0 %v8644_v23  ;;  %v3841_v1 = vpop.permute.xlu1 %3840  ;;  %v4393_v11 = vand.u32 2147483647, %v4377_v36  ;;  %v3776_v25 = vadd.f32 %v3768_v54, %v3664_v37  ;;  %v4360_v40 = vadd.f32 1.0, %v4352_v28  ;;  %v4410_v3 = vsub.f32 1.0, %v4394_v59 }
 0x4eb   :  { %v8641_v0 = vpack.c.bf16 %v8182_v14, %v2202_v29  ;;  %v8203_v43 = vpop.f32.mrb[18].mxu0  ;;  %8649 = vmatprep.subr.bf16.mxu0 %v11407_v9  ;;  %v3914_v62 = vmul.f32 %v3841_v1, %v10120_v6  ;;  %8849 = vset.pattern.permute.xlu1 %v11457_v38  ;;  %v4421_v14 = vmax.f32 %v4405_v47, 0.0  ;;  %v10208_v36 = vmin.f32 %v3945_v5, 1.0 }
 0x4ec   :  { %v2445_v46 = vpop.f32.mrb[19].mxu0  ;;  %6946 = vperm.xlu1 %8849, %v9729_v4   ;;  %v4409_v1 = vsub.f32 1.0, %v4393_v11  ;;  %v4382_v47 = vsub.f32 %v4367_v20, %v11429_v39  ;;  %v10220_v5 = vmin.f32 %v3799_v10, %v3807_v44 }
 0x4ed   :  { %v8650_v41 = vpack.c.bf16 %v8203_v43, %v2445_v46  ;;  %8642 = vmatpush3.bf16.msra.mxu1 %v8641_v0  ;;  %8244 = vmatmul.mubr.msk.f32.vlgmr.msra.gmra.mrb[24].mxu0 %vm853_vm4, %v9714_v31  ;;  %v3856_v31 = vpop.permute.xlu0 %3855  ;;  %v3946_v23 = vmax.f32 %v3914_v62, 0.0  ;;  %v11479_v43 = vld [vmem:[#allocation70_spill] sm:$0xff]  ;;  %v4381_v62 = vsub.f32 %v4367_v20, %v11472_v17  ;;  %v3784_v20 = vadd.f32 1.0, %v3776_v25 }
 0x4ee   :  { %v8196_v6 = vpop.f32.mrb[26].mxu1  ;;  %8646 = vmatprep.subr.bf16.mxu1 %v11407_v9  ;;  %8257 = vmatprep.mubr.msk.f32.mxu0 %vm8950_vm0, %v11408_v61  ;;  %v3917_v18 = vmul.f32 %v3856_v31, %v10136_v63  ;;  %v3846_v52 = vpop.permute.xlu1 %3845  ;;  %v10228_v31 = vpack.c.bf16 %v4422_v55, %v4421_v14  ;;  %v4425_v44 = vmax.f32 %v4409_v1, 0.0 }
 0x4ef   :  { %v2364_v33 = vpop.f32.mrb[27].mxu1  ;;  %8651 = vmatpush3.bf16.msra.mxu0 %v8650_v41  ;;  %v3915_v46 = vmul.f32 %v3846_v52, %v10138_v35  ;;  %v10217_v24 = vmin.f32 %v3946_v23, 1.0  ;;  %v11480_v41 = vld [vmem:[#allocation53_spill] sm:$0xff]  ;;  %v4368_v23 = vmul.f32 7.5, %v4360_v40  ;;  %v11484_v52 = vld [vmem:[#allocation75_spill] sm:$0xff] }
 0x4f0   :  { %v8647_v4 = vpack.c.bf16 %v8196_v6, %v2364_v33  ;;  %v8217_v34 = vpop.f32.mrb[20].mxu0  ;;  %8237 = vmatmul.mubr.msk.f32.vlgmr.msra.gmra.mrb[32].mxu1 %vm853_vm4, %v9687_v19  ;;  %8655 = vmatprep.subr.bf16.mxu0 %v11407_v9  ;;  %v3949_v0 = vmax.f32 %v3917_v18, 0.0  ;;  %v4395_v19 = vand.u32 2147483647, %v4379_v8  ;;  %v4396_v6 = vand.u32 2147483647, %v4380_v50 }
 0x4f1   :  { %v2607_v29 = vpop.f32.mrb[21].mxu0  ;;  %8250 = vmatprep.mubr.msk.f32.mxu1 %vm8950_vm0, %v11408_v61  ;;  %8850 = vset.pattern.permute.xlu1 %v11449_v57  ;;  %v11482_v33 = vld [vmem:[#allocation73_spill] sm:$0xff]  ;;  %11483 = vst [vmem:[#allocation6_spill] sm:$0xff] %v10228_v31  ;;  %v3947_v18 = vmax.f32 %v3915_v46, 0.0  ;;  %v4397_v55 = vand.u32 2147483647, %v4381_v62 }
 0x4f2   :  { %v8656_v60 = vpack.c.bf16 %v8217_v34, %v2607_v29  ;;  %8648 = vmatpush3.bf16.msra.mxu1 %v8647_v4  ;;  %8258 = vmatmul.mubr.msk.f32.vlgmr.msra.gmra.mrb[26].mxu0 %vm853_vm4, %v11479_v43  ;;  %v3881_v54 = vpop.permute.xlu0 %3880  ;;  %v3851_v28 = vpop.permute.xlu1 %3850  ;;  %v10222_v8 = vmin.f32 %v3949_v0, 1.0  ;;  %v4433_v4 = vsub.f32 1.0, %v10208_v36  ;;  %v4411_v10 = vsub.f32 1.0, %v4395_v19  ;;  %v11485_v62 = vld [vmem:[#allocation71_spill] sm:$0xff] }
 0x4f3   :  { %v8210_v49 = vpop.f32.mrb[28].mxu1  ;;  %8652 = vmatprep.subr.bf16.mxu1 %v11407_v9  ;;  %6898 = vperm.xlu1 %8850, %v11480_v41   ;;  %v3916_v59 = vmul.f32 %v3851_v28, %v10138_v35  ;;  %v4426_v34 = vmax.f32 %v4410_v3, 0.0  ;;  %v4398_v50 = vand.u32 2147483647, %v4382_v47  ;;  %v4434_v25 = vsub.f32 1.0, %v10217_v24  ;;  %v11486_v47 = vld [vmem:[#allocation74_spill] sm:$0xff] }
 0x4f4   :  { %v2526_v37 = vpop.f32.mrb[29].mxu1  ;;  %8657 = vmatpush3.bf16.msra.mxu0 %v8656_v60  ;;  %11481 = vst [vmem:[#allocation52_spill] sm:$0xff] %v10222_v8  ;;  %8271 = vmatprep.mubr.msk.f32.mxu0 %vm8950_vm0, %v11408_v61  ;;  %v3922_v29 = vmul.f32 %v3881_v54, %v10157_v42  ;;  %v4437_v0 = vsub.f32 1.0, %v10222_v8  ;;  %v4412_v3 = vsub.f32 1.0, %v4396_v6  ;;  %v3792_v46 = vmul.f32 7.5, %v3784_v20 }
 0x4f5   :  { %v8653_v11 = vpack.c.bf16 %v8210_v49, %v2526_v37  ;;  %8662 = vmatprep.subr.bf16.mxu0 %v10169_v32  ;;  %8251 = vmatmul.mubr.msk.f32.vlgmr.msra.gmra.mrb[34].mxu1 %vm853_vm4, %v11482_v33  ;;  %v3948_v43 = vmax.f32 %v3916_v59, 0.0  ;;  %v4383_v49 = vsub.f32 %v4368_v23, %v11472_v17  ;;  %v4384_v54 = vsub.f32 %v4368_v23, %v11429_v39 }
 0x4f6   :  { %8264 = vmatprep.mubr.msk.f32.mxu1 %vm8950_vm0, %v11408_v61  ;;  %v3871_v14 = vpop.permute.xlu0 %3870  ;;  %v3861_v60 = vpop.permute.xlu1 %3860  ;;  %v4427_v37 = vmax.f32 %v4411_v10, 0.0  ;;  %v10250_v41 = vmin.f32 %v3947_v18, 1.0  ;;  %v3823_v6 = vmax.f32 %v10220_v5, 0.0  ;;  %v4414_v17 = vsub.f32 1.0, %v4398_v50 }
 0x4f7   :  { %v8224_v35 = vpop.f32.mrb[30].mxu1  ;;  %8654 = vmatpush3.bf16.msra.mxu1 %v8653_v11  ;;  %8272 = vmatmul.mubr.msk.f32.vlgmr.msra.gmra.mrb[28].mxu0 %vm853_vm4, %v11484_v52  ;;  %v3918_v1 = vmul.f32 %v3861_v60, %v10136_v63  ;;  %v4413_v11 = vsub.f32 1.0, %v4397_v55  ;;  %v3920_v39 = vmul.f32 %v3871_v14, %v10159_v2  ;;  %v10257_v59 = vpack.c.bf16 %v4426_v34, %v4425_v44  ;;  %v11489_v55 = vld [vmem:[#allocation76_spill] sm:$0xff]  ;;  %v11490_v60 = vld [vmem:[#allocation54_spill] sm:$0xff] }
 0x4f8   :  { %v2688_v40 = vpop.f32.mrb[31].mxu1  ;;  %8664 = vmatpush3.bf16.msra.mxu0 %v10169_v32  ;;  %8285 = vmatprep.mubr.msk.f32.mxu0 %vm853_vm4, %v4433_v4  ;;  %v3954_v20 = vmax.f32 %v3922_v29, 0.0  ;;  %v10259_v23 = vmin.f32 %v3948_v43, 1.0  ;;  %v4428_v10 = vmax.f32 %v4412_v3, 0.0  ;;  %v4399_v18 = vand.u32 2147483647, %v4383_v49 }
 0x4f9   :  { %v8659_v19 = vpack.c.bf16 %v8224_v35, %v2688_v40  ;;  %8851 = vset.pattern.permute.xlu1 %v11457_v38  ;;  %8670 = vmatprep.subr.bf16.mxu0 %v10228_v31  ;;  %v3950_v28 = vmax.f32 %v3918_v1, 0.0  ;;  %11487 = vst [vmem:[#allocation23_spill] sm:$0xff] %v10257_v59  ;;  %v4400_v35 = vand.u32 2147483647, %v4384_v54  ;;  %v3800_v44 = vadd.f32 1.0, %v3792_v46 }
 0x4fa   :  { %6954 = vperm.xlu1 %8851, %v11485_v62   ;;  %8265 = vmatmul.mubr.msk.f32.vlgmr.msra.gmra.mrb[36].mxu1 %vm853_vm4, %v11486_v47  ;;  %v3891_v63 = vpop.permute.xlu0 %3890  ;;  %v3876_v33 = vpop.permute.xlu1 %3875  ;;  %v4435_v34 = vsub.f32 1.0, %v10250_v41  ;;  %v4429_v50 = vmax.f32 %v4413_v11, 0.0  ;;  %v3952_v29 = vmax.f32 %v3920_v39, 0.0  ;;  %v10277_v43 = vmin.f32 %v3954_v20, 1.0 }
 0x4fb   :  { %8658 = vmatprep.subr.bf16.mxu1 %v11407_v9  ;;  %8286 = vmatmul.mubr.msk.f32.vlgmr.msra.gmra.mrb[30].mxu0 %vm853_vm4, %v4434_v25  ;;  %v10261_v4 = vmin.f32 %v3950_v28, 1.0  ;;  %v3921_v5 = vmul.f32 %v3876_v33, %v10157_v42  ;;  %v3808_v42 = vsub.f32 16.0, %v3792_v46  ;;  %v4430_v25 = vmax.f32 %v4414_v17, 0.0 }
 0x4fc   :  { %8660 = vmatpush3.bf16.msra.mxu1 %v8659_v19  ;;  %8672 = vmatpush3.bf16.msra.mxu0 %v10228_v31  ;;  %v3924_v40 = vmul.f32 %v3891_v63, %v10161_v58  ;;  %v4436_v19 = vsub.f32 1.0, %v10259_v23  ;;  %v4415_v49 = vsub.f32 1.0, %v4399_v18  ;;  %v4416_v54 = vsub.f32 1.0, %v4400_v35 }
 0x4fd   :  { %11488 = vst [vmem:[#allocation32_spill] sm:$0xff] %v10261_v4  ;;  %8666 = vmatprep.subr.bf16.mxu1 %v10188_v7  ;;  %8299 = vmatprep.mubr.msk.f32.mxu0 %vm853_vm4, %v4437_v0  ;;  %v4438_v52 = vsub.f32 1.0, %v10261_v4  ;;  %v3953_v14 = vmax.f32 %v3921_v5, 0.0  ;;  %v3831_v62 = vmin.f32 %v3823_v6, 1.0  ;;  %v10286_v47 = vpack.c.bf16 %v4428_v10, %v4427_v37  ;;  %v11494_v5 = vld [vmem:[#allocation72_spill] sm:$0xff] }
 0x4fe   :  { %8278 = vmatprep.mubr.msk.f32.mxu1 %vm8950_vm0, %v11408_v61  ;;  %8678 = vmatprep.subr.bf16.mxu0 %v10257_v59  ;;  %v3866_v0 = vpop.permute.xlu1 %3865  ;;  %v3901_v3 = vpop.permute.xlu0 %3900  ;;  %v3816_v11 = vmin.f32 %v3800_v44, %v3808_v42  ;;  %v10291_v17 = vmin.f32 %v3952_v29, 1.0  ;;  %v3956_v39 = vmax.f32 %v3924_v40, 0.0  ;;  %v4442_v6 = vsub.f32 1.0, %v10277_v43 }
 0x4ff   :  { %8852 = vset.pattern.permute.xlu1 %v11449_v57  ;;  %8279 = vmatmul.mubr.msk.f32.vlgmr.msra.gmra.mrb[38].mxu1 %vm853_vm4, %v11489_v55  ;;  %v10280_v1 = vmin.f32 %v3953_v14, 1.0  ;;  %v3919_v46 = vmul.f32 %v3866_v0, %v10159_v2  ;;  %11491 = vst [vmem:[#allocation36_spill] sm:$0xff] %v10286_v47  ;;  %v3926_v33 = vmul.f32 %v3901_v3, %v3831_v62  ;;  %v4431_v18 = vmax.f32 %v4415_v49, 0.0 }
 0x500   :  { %6906 = vperm.xlu1 %8852, %v11490_v60   ;;  %8668 = vmatpush3.bf16.msra.mxu1 %v10188_v7  ;;  %v10295_v2 = vpack.c.bf16 %v4430_v25, %v4429_v50  ;;  %v4432_v35 = vmax.f32 %v4416_v54, 0.0  ;;  %v10308_v14 = vmin.f32 %v3956_v39, 1.0  ;;  %v11496_v50 = vld [vmem:[#allocation77_spill] sm:$0xff] }
 0x501   :  { %8292 = vmatprep.mubr.msk.f32.mxu1 %vm853_vm4, %v4435_v34  ;;  %8674 = vmatprep.subr.bf16.mxu1 %v10183_v53  ;;  %v4441_v28 = vsub.f32 1.0, %v10280_v1  ;;  %v3951_v63 = vmax.f32 %v3919_v46, 0.0  ;;  %v3824_v34 = vmax.f32 %v3816_v11, 0.0  ;;  %v3958_v55 = vmax.f32 %v3926_v33, 0.0 }
 0x502   :  { %8300 = vmatmul.mubr.msk.f32.vlgmr.msra.gmra.mrb[32].mxu0 %vm853_vm4, %v4438_v52  ;;  %11492 = vst [vmem:[#allocation42_spill] sm:$0xff] %v10295_v2  ;;  %v3886_v37 = vpop.permute.xlu1 %3885  ;;  %v4440_v52 = vsub.f32 1.0, %v10291_v17  ;;  %11495 = vst [vmem:[#allocation44_spill] sm:$0xff] %v10308_v14  ;;  %v10316_v29 = vpack.c.bf16 %v4432_v35, %v4431_v18  ;;  %v11501_v18 = vld [vmem:[#allocation33_spill] sm:$0xff] }
 0x503   :  { %8293 = vmatmul.mubr.msk.f32.vlgmr.msra.gmra.mrb[40].mxu1 %vm853_vm4, %v4436_v19  ;;  %8680 = vmatpush3.bf16.msra.mxu0 %v10257_v59  ;;  %v10298_v20 = vmin.f32 %v3951_v63, 1.0  ;;  %v3923_v10 = vmul.f32 %v3886_v37, %v10161_v58  ;;  %v3832_v0 = vmin.f32 %v3824_v34, 1.0  ;;  %v4444_v19 = vsub.f32 1.0, %v10308_v14  ;;  %v11502_v34 = vld [vmem:[#allocation56_spill] sm:$0xff] }
 0x504   :  { %8853 = vset.pattern.permute.xlu1 %v11457_v38  ;;  %8676 = vmatpush3.bf16.msra.mxu1 %v10183_v53  ;;  %11497 = vst [vmem:[#allocation26_spill] sm:$0xff] %v10316_v29  ;;  %v10322_v3 = vmin.f32 %v3958_v55, 1.0  ;;  %v11503_v55 = vld [vmem:[#allocation29_spill] sm:$0xff] }
 0x505   :  { %11493 = vst [vmem:[#allocation40_spill] sm:$0xff] %v10298_v20  ;;  %6962 = vperm.xlu1 %8853, %v11494_v5   ;;  %8682 = vmatprep.subr.bf16.mxu1 %v10286_v47  ;;  %v4439_v38 = vsub.f32 1.0, %v10298_v20  ;;  %v3955_v44 = vmax.f32 %v3923_v10, 0.0 }
 0x506   :  { %8686 = vmatprep.subr.bf16.mxu0 %v10295_v2  ;;  %8313 = vmatprep.mubr.msk.f32.mxu0 %vm853_vm4, %v4441_v28  ;;  %v3896_v58 = vpop.permute.xlu1 %3895  ;;  %11498 = vst [vmem:[#allocation18_spill] sm:$0xff] %v10322_v3  ;;  %v4446_v37 = vsub.f32 1.0, %v10322_v3 }
 0x507   :  { %8314 = vmatmul.mubr.msk.f32.vlgmr.msra.gmra.mrb[34].mxu0 %vm853_vm4, %v4442_v6  ;;  %v10311_v42 = vmin.f32 %v3955_v44, 1.0  ;;  %v3925_v25 = vmul.f32 %v3896_v58, %v3831_v62  ;;  %8306 = vmatprep.mubr.msk.f32.mxu1 %vm853_vm4, %v4439_v38  ;;  %v11499_v62 = vld [vmem:[#allocation78_spill] sm:$0xff] }
 0x508   :  { %8688 = vmatpush3.bf16.msra.mxu0 %v10295_v2  ;;  %8307 = vmatmul.mubr.msk.f32.vlgmr.msra.gmra.mrb[42].mxu1 %vm853_vm4, %v4440_v52  ;;  %v11504_v58 = vld [vmem:[#allocation14_spill] sm:$0xff] }
 0x509   :  { %6970 = vperm.xlu1 %8853, %v11496_v50   ;;  %8693 = vmatprep.subr.bf16.mxu0 %v11407_v9  ;;  %v4443_v40 = vsub.f32 1.0, %v10311_v42  ;;  %v3957_v60 = vmax.f32 %v3925_v25, 0.0 }
 0x50a   :  { %8684 = vmatpush3.bf16.msra.mxu1 %v10286_v47  ;;  %v11523_v47 = vld [vmem:[#allocation38_spill] sm:$0xff] }
 0x50b   :  { %8690 = vmatprep.subr.bf16.mxu1 %v10316_v29  ;;  %v3911_v46 = vpop.permute.xlu0 %3910  ;;  %v3906_v49 = vpop.permute.xlu1 %3905  ;;  %v10325_v54 = vmin.f32 %v3957_v60, 1.0  ;;  %8320 = vmatprep.mubr.msk.f32.mxu1 %vm853_vm4, %v4443_v40 }
 0x50c   :  { %v3928_v28 = vmul.f32 %v3911_v46, %v3832_v0  ;;  %v3927_v63 = vmul.f32 %v3906_v49, %v3832_v0  ;;  %v11505_v0 = vld [vmem:[#allocation13_spill] sm:$0xff] }
 0x50d   :  { %6978 = vperm.xlu1 %8853, %v11499_v62   ;;  %8321 = vmatmul.mubr.msk.f32.vlgmr.msra.gmra.mrb[44].mxu1 %vm853_vm4, %v4444_v19  ;;  %v4445_v11 = vsub.f32 1.0, %v10325_v54  ;;  %v11506_v19 = vld [vmem:[#allocation35_spill] sm:$0xff] }
 0x50e   :  { %v3960_v39 = vmax.f32 %v3928_v28, 0.0  ;;  %v3959_v33 = vmax.f32 %v3927_v63, 0.0  ;;  %8692 = vmatpush3.bf16.msra.mxu1 %v10316_v29  ;;  %v4020_v46 = vmul.f32 %v11506_v19, %v11505_v0  ;;  %v11507_v28 = vld [vmem:[#allocation10_spill] sm:$0xff]  ;;  %v11508_v63 = vld [vmem:[#allocation24_spill] sm:$0xff]  ;;  %v11512_v19 = vld [vmem:[#allocation27_spill] sm:$0xff] }
 0x50f   :  { %8696 = vmatprep.subr.bf16.mxu1 %v11407_v9  ;;  %8327 = vmatprep.mubr.msk.f32.mxu0 %vm853_vm4, %v4445_v11  ;;  %v4021_v11 = vmul.f32 %v11508_v63, %v11507_v28  ;;  %v11511_v0 = vld [vmem:[#allocation12_spill] sm:$0xff]  ;;  %v11514_v28 = vld [vmem:[#allocation43_spill] sm:$0xff] }
 0x510   :  { %v10333_v6 = vpop.permute.xlu1 %4146  ;;  %v10336_v5 = vmin.f32 %v3960_v39, 1.0  ;;  %v10338_v10 = vmin.f32 %v3959_v33, 1.0  ;;  %8328 = vmatmul.mubr.msk.f32.vlgmr.msra.gmra.mrb[36].mxu0 %vm853_vm4, %v4446_v37  ;;  %v11303_v39 = vsub.f32 1.0, %v10036_v48  ;;  %v10529_v7 = vpop.permute.xlu0 %4194 }
 0x511   :  { %8854 = vset.pattern.permute.xlu1 %v11449_v57  ;;  %8341 = vmatprep.mubr.msk.f32.mxu0 %vm8950_vm0, %v11408_v61 }
 0x512   :  { %11500 = vst [vmem:[#allocation45_spill] sm:$0xff] %v10338_v10  ;;  %7050 = vperm.xlu1 %8854, %v11501_v18   ;;  %v4448_v35 = vsub.f32 1.0, %v10336_v5  ;;  %v4447_v38 = vsub.f32 1.0, %v10338_v10  ;;  %v11509_v18 = vld [vmem:[#allocation11_spill] sm:$0xff] }
 0x513   :  { %v11522_v10 = vld [vmem:[#allocation59_spill] sm:$0xff] }
 0x514   :  { %8334 = vmatprep.mubr.msk.f32.mxu1 %vm853_vm4, %v4447_v38 }
 0x515   :  { %v10349_v44 = vpop.permute.xlu1 %4186  ;;  %8335 = vmatmul.mubr.msk.f32.vlgmr.msra.gmra.mrb[46].mxu1 %vm853_vm4, %v4448_v35  ;;  %v11510_v35 = vld [vmem:[#allocation39_spill] sm:$0xff] }
 0x516   :  { %7054 = vperm.xlu1 %8854, %v11502_v34   ;;  %8348 = vmatprep.mubr.msk.f32.mxu1 %vm8950_vm0, %v11408_v61  ;;  %v4022_v38 = vmul.f32 %v11510_v35, %v11509_v18  ;;  %v10397_v34 = vrot.slane %v4021_v11, %v9160_v13 }
 0x519   :  { %v10355_v52 = vpop.permute.xlu1 %4190 }
 0x51a   :  { %7058 = vperm.xlu1 %8854, %v11503_v55   ;;  %v4025_v55 = vsub.f32 1.0, %v11303_v39 }
 0x51e   :  { %7066 = vperm.xlu1 %8854, %v11504_v58   ;;  %v10359_v50 = vpop.permute.xlu1 %4158 }
 0x522   :  { %7070 = vperm.xlu1 %8854, %v9976_v26   ;;  %v10377_v26 = vrot.slane %v4020_v46, %v9160_v13  ;;  %v4023_v46 = vmul.f32 %v11512_v19, %v11511_v0  ;;  %v11518_v19 = vld [vmem:[#allocation9_spill] sm:$0xff] }
 0x523   :  { %v10362_v25 = vpop.permute.xlu1 %4198 }
 0x524   :  { %v4068_v11 = vrot.slane %v4023_v46, %v9160_v13  ;;  %v11519_v46 = vld [vmem:[#allocation25_spill] sm:$0xff] }
 0x526   :  { %7078 = vperm.xlu1 %8854, %v9974_v15  }
 0x528   :  { %v10365_v40 = vpop.permute.xlu1 %4162 }
 0x52a   :  { %7082 = vperm.xlu1 %8854, %v9986_v27  }
 0x52d   :  { %v10369_v60 = vpop.permute.xlu1 %4202 }
 0x52e   :  { %7086 = vperm.xlu1 %8854, %v9968_v30   ;;  %v8902_v30 = vld [vmem:[%s11190_s1] sm:$0xff] }
 0x52f   :  { %v375_v27 = vmul.f32 -0.5, %v8902_v30 }
 0x531   :  { %v10374_v49 = vpop.permute.xlu1 %4206  ;;  %v376_v62 = vmul.f32 %v8902_v30, %v375_v27  ;;  %v10409_v30 = vrot.slane %v4022_v38, %v9160_v13  ;;  %v11515_v38 = vld [vmem:[#allocation8_spill] sm:$0xff] }
 0x532   :  { %7090 = vperm.xlu1 %8854, %v9998_v21  }
 0x536   :  { %8857 = vset.pattern.permute.xlu1 %v11403_v22  ;;  %v10381_v15 = vpop.permute.xlu1 %4174 }
 0x537   :  { %4086 = vperm.xlu1 %8857, %v10377_v26  }
 0x53b   :  { %8858 = vset.pattern.permute.xlu1 %v11449_v57  ;;  %v10388_v21 = vpop.permute.xlu1 %4214 }
 0x53c   :  { %7098 = vperm.xlu1 %8858, %v10001_v16  }
 0x53f   :  { %v379_v33 = vpop.permute.xlu1 %378 }
 0x540   :  { %7226 = vperm.xlu1 %8858, %v10069_v12   ;;  %v381_v37 = vsub.f32 %v376_v62, %v379_v33  ;;  %v11513_v62 = vld [vmem:[#allocation15_spill] sm:$0xff] }
 0x541   :  { %v4024_v63 = vmul.f32 %v11514_v28, %v11513_v62  ;;  %v4019_v62 = vmul.f32 %v11519_v46, %v11518_v19 }
 0x542   :  { %v383_v16 = vsel %vm382_vm5, %v381_v37, 0.0 }
 0x543   :  { %384 = vadd.xlane.f32.xlu0 %v383_v16  ;;  %v4075_v58 = vpop.permute.xlu1 %4074  ;;  %v10416_v37 = vrot.slane %v4024_v63, %v9160_v13  ;;  %v11516_v16 = vld [vmem:[#allocation31_spill] sm:$0xff]  ;;  %v4052_v39 = vrot.slane %v4019_v62, %v9160_v13 }
 0x544   :  { %8859 = vset.pattern.permute.xlu1 %v11403_v22  ;;  %v10404_v12 = vmul.f32 %v4075_v58, %v4025_v55  ;;  %v4018_v55 = vmul.f32 %v11516_v16, %v11515_v38  ;;  %v11517_v58 = vld [vmem:[#allocation69_spill] sm:$0xff] }
 0x545   :  { %4090 = vperm.xlu1 %8859, %v10397_v34  }
 0x546   :  { %v4048_v28 = vrot.slane %v4018_v55, %v9160_v13 }
 0x548   :  { %v6851_v27 = vpop.permute.xlu1 %6850 }
 0x549   :  { %4094 = vperm.xlu1 %8859, %v10409_v30   ;;  %v6856_v62 = vrot.slane %v6851_v27, %v9160_v13 }
 0x54c   :  { %v6859_v33 = vpop.permute.xlu1 %6858 }
 0x54d   :  { %4098 = vperm.xlu1 %8859, %v4068_v11  }
 0x550   :  { %v10419_v18 = vpop.permute.xlu1 %6866 }
 0x551   :  { %4102 = vperm.xlu1 %8859, %v10416_v37  }
 0x554   :  { %v6875_v35 = vpop.permute.xlu1 %6874 }
 0x555   :  { %8860 = vset.pattern.permute.xlu1 %v11449_v57  ;;  %v6880_v16 = vrot.slane %v6875_v35, %v9160_v13 }
 0x556   :  { %7110 = vperm.xlu1 %8860, %v10006_v51  }
 0x557   :  { %v6916_v55 = vmul.f32 %v10041_v56, %v6880_v16  ;;  %v6864_v16 = vrot.slane %v6859_v33, %v9160_v13 }
 0x559   :  { %6938 = vperm.xlu0 %8848, %v11517_v58   ;;  %v6923_v0 = vpop.permute.xlu1 %6922  ;;  %v11521_v58 = vld [vmem:[#allocation62_spill] sm:$0xff] }
 0x55a   :  { %7250 = vperm.xlu1 %8860, %v4068_v11   ;;  %v11520_v11 = vld [vmem:[#allocation58_spill] sm:$0xff] }
 0x55d   :  { %8855 = vset.pattern.permute.xlu0 %v11403_v22  ;;  %v6931_v63 = vpop.permute.xlu1 %6930 }
 0x55e   :  { %4078 = vperm.xlu0 %8855, %v4048_v28   ;;  %v6936_v27 = vrot.slane %v6931_v63, %v9160_v13 }
 0x562   :  { %4082 = vperm.xlu0 %8855, %v4052_v39   ;;  %v6883_v51 = vpop.permute.xlu1 %6882 }
 0x563   :  { %v6888_v35 = vrot.slane %v6883_v51, %v9160_v13 }
 0x566   :  { %8856 = vset.pattern.permute.xlu0 %v11449_v57  ;;  %v6891_v38 = vpop.permute.xlu1 %6890  ;;  %v6928_v57 = vrot.slane %v6923_v0, %v9160_v13 }
 0x567   :  { %7062 = vperm.xlu0 %8856, %v11520_v11   ;;  %v6913_v11 = vmul.f32 %v10041_v56, %v6856_v62 }
 0x56b   :  { %7074 = vperm.xlu0 %8856, %v11521_v58   ;;  %v6947_v19 = vpop.permute.xlu1 %6946  ;;  %v6985_v58 = vadd.f32 %v6928_v57, %v6913_v11 }
 0x56c   :  { %v6952_v22 = vrot.slane %v6947_v19, %v9160_v13  ;;  %v6917_v19 = vmul.f32 %v10041_v56, %v6888_v35 }
 0x56e   :  { %v6988_v46 = vadd.f32 %v6952_v22, %v6916_v55  ;;  %v6993_v55 = vadd.f32 1.0, %v6985_v58  ;;  %v10457_v58 = vld [vmem:[%s11195_s6] sm:$0xff] }
 0x56f   :  { %7094 = vperm.xlu0 %8856, %v11522_v10  }
 0x570   :  { %v7001_v62 = vmul.f32 7.5, %v6993_v55 }
 0x572   :  { %v6899_v29 = vpop.permute.xlu1 %6898  ;;  %v7009_v57 = vadd.f32 1.0, %v7001_v62 }
 0x573   :  { %7102 = vperm.xlu0 %8856, %v11523_v47   ;;  %v6914_v47 = vmul.f32 %v10041_v56, %v6864_v16  ;;  %v6904_v63 = vrot.slane %v6899_v29, %v9160_v13 }
 0x575   :  { %v6986_v3 = vadd.f32 %v6936_v27, %v6914_v47  ;;  %v6919_v16 = vmul.f32 %v10041_v56, %v6904_v63  ;;  %v8905_v27 = vld [vmem:[%s11195_s6 + $0x10] sm:$0xff] }
 0x577   :  { %7230 = vperm.xlu0 %8856, %v4048_v28   ;;  %v6896_v28 = vrot.slane %v6891_v38, %v9160_v13  ;;  %v6994_v51 = vadd.f32 1.0, %v6986_v3  ;;  %v10462_v3 = vld [vmem:[%s11191_s2] sm:$0xff] }
 0x578   :  { %11524 = vst [vmem:[#allocation7_spill] sm:$0xff] %v10462_v3 }
 0x579   :  { %v6955_v2 = vpop.permute.xlu1 %6954  ;;  %v6918_v11 = vmul.f32 %v10041_v56, %v6896_v28  ;;  %v11525_v28 = vld [vmem:[#allocation64_spill] sm:$0xff] }
 0x57a   :  { %v6960_v10 = vrot.slane %v6955_v2, %v9160_v13  ;;  %v7017_v2 = vsub.f32 16.0, %v7001_v62 }
 0x57b   :  { %7234 = vperm.xlu0 %8856, %v4052_v39  }
 0x57c   :  { %v6989_v22 = vadd.f32 %v6960_v10, %v6917_v19  ;;  %v7025_v29 = vmin.f32 %v7009_v57, %v7017_v2 }
 0x57f   :  { %v6907_v0 = vpop.permute.xlu1 %6906  ;;  %7238 = vperm.xlu0 %8856, %v10377_v26   ;;  %v7297_v26 = vsub.f32 %v10462_v3, %v10457_v58  ;;  %v11534_v3 = vld [vmem:[#allocation57_spill] sm:$0xff] }
 0x580   :  { %v6912_v19 = vrot.slane %v6907_v0, %v9160_v13  ;;  %v6996_v0 = vadd.f32 1.0, %v6988_v46 }
 0x581   :  { %v7313_v47 = vmul.f32 %v8905_v27, %v7297_v26  ;;  %v10484_v26 = vld [vmem:[%s11195_s6 + $0x8] sm:$0xff] }
 0x582   :  { %v6920_v57 = vmul.f32 %v10041_v56, %v6912_v19 }
 0x583   :  { %7242 = vperm.xlu0 %8856, %v10397_v34   ;;  %v7002_v34 = vmul.f32 7.5, %v6994_v51  ;;  %v7033_v51 = vmax.f32 %v7025_v29, 0.0 }
 0x584   :  { %v6963_v33 = vpop.permute.xlu1 %6962 }
 0x585   :  { %v6968_v39 = vrot.slane %v6963_v33, %v9160_v13  ;;  %v7010_v33 = vadd.f32 1.0, %v7002_v34  ;;  %v7041_v63 = vmin.f32 %v7033_v51, 1.0  ;;  %v10497_v51 = vld [vmem:[%s11195_s6 + $0x20] sm:$0xff] }
 0x586   :  { %11527 = vst [vmem:[#allocation19_spill] sm:$0xff] %v10497_v51 }
 0x587   :  { %v6990_v35 = vadd.f32 %v6968_v39, %v6918_v11  ;;  %7246 = vperm.xlu0 %8856, %v10409_v30   ;;  %v7018_v30 = vsub.f32 16.0, %v7002_v34  ;;  %v7004_v34 = vmul.f32 7.5, %v6996_v0 }
 0x588   :  { %v6971_v38 = vpop.permute.xlu1 %6970 }
 0x589   :  { %v6976_v10 = vrot.slane %v6971_v38, %v9160_v13  ;;  %v7026_v39 = vmin.f32 %v7010_v33, %v7018_v30  ;;  %v7329_v38 = vmul.f32 %v7313_v47, %v7313_v47  ;;  %v7012_v30 = vadd.f32 1.0, %v7004_v34 }
 0x58b   :  { %v10470_v55 = vadd.f32 %v6976_v10, %v6919_v16  ;;  %7106 = vperm.xlu0 %8856, %v11525_v28   ;;  %v6997_v10 = vadd.f32 1.0, %v6989_v22  ;;  %v7345_v46 = vmul.f32 -0.5, %v7329_v38  ;;  %v10490_v28 = vld [vmem:[%s11191_s2 + $0x8] sm:$0xff] }
 0x58c   :  { %v6979_v62 = vpop.permute.xlu1 %6978  ;;  %11526 = vst [vmem:[#allocation22_spill] sm:$0xff] %v10490_v28 }
 0x58d   :  { %v6984_v2 = vrot.slane %v6979_v62, %v9160_v13  ;;  %v7034_v62 = vmax.f32 %v7026_v39, 0.0  ;;  %v7361_v38 = vadd.f32 %v7345_v46, %v10497_v51 }
 0x58f   :  { %v10478_v11 = vadd.f32 %v6984_v2, %v6920_v57  ;;  %7254 = vperm.xlu0 %8856, %v10416_v37   ;;  %v7298_v37 = vsub.f32 %v10490_v28, %v10484_v26  ;;  %v7020_v57 = vsub.f32 16.0, %v7004_v34  ;;  %v7005_v2 = vmul.f32 7.5, %v6997_v10 }
 0x590   :  { %v10504_v39 = vmin.f32 %v7034_v62, 1.0  ;;  %v10520_v62 = vld [vmem:[%s11191_s2 + $0x38] sm:$0xff] }
 0x591   :  { %v7051_v16 = vpop.permute.xlu1 %7050  ;;  %11529 = vst [vmem:[#allocation49_spill] sm:$0xff] %v10520_v62  ;;  %v7028_v46 = vmin.f32 %v7012_v30, %v7020_v57 }
 0x592   :  { %v7113_v29 = vmul.f32 %v7051_v16, %v7041_v63 }
 0x593   :  { %v7036_v30 = vmax.f32 %v7028_v46, 0.0  ;;  %v6999_v46 = vadd.f32 1.0, %v10470_v55 }
 0x594   :  { %v7129_v19 = vadd.f32 %v7113_v29, %v10208_v36  ;;  %v10502_v36 = vld [vmem:[%s11195_s6 + $0x18] sm:$0xff] }
 0x595   :  { %v7055_v47 = vpop.permute.xlu1 %7054  ;;  %v7314_v53 = vmul.f32 %v7298_v37, %v10502_v36  ;;  %v6998_v37 = vadd.f32 1.0, %v6990_v35  ;;  %v7007_v55 = vmul.f32 7.5, %v6999_v46 }
 0x596   :  { %v7145_v33 = vmax.f32 %v7129_v19, 0.0  ;;  %v7114_v22 = vmul.f32 %v7055_v47, %v7041_v63  ;;  %v10512_v63 = vld [vmem:[%s11191_s2 + $0x10] sm:$0xff] }
 0x597   :  { %11528 = vst [vmem:[#allocation41_spill] sm:$0xff] %v10512_v63  ;;  %v7299_v19 = vsub.f32 %v10512_v63, %v10457_v58  ;;  %v7330_v58 = vmul.f32 %v7314_v53, %v7314_v53  ;;  %v10536_v53 = vld [vmem:[%s11195_s6 + $0x28] sm:$0xff] }
 0x598   :  { %v7161_v0 = vmin.f32 %v7145_v33, 1.0  ;;  %v7130_v16 = vadd.f32 %v7114_v22, %v10217_v24  ;;  %v7304_v24 = vsub.f32 %v10520_v62, %v10484_v26  ;;  %v7013_v33 = vadd.f32 1.0, %v7005_v2 }
 0x599   :  { %v7059_v29 = vpop.permute.xlu1 %7058  ;;  %v7021_v22 = vsub.f32 16.0, %v7005_v2  ;;  %v7006_v62 = vmul.f32 7.5, %v6998_v37  ;;  %v7346_v2 = vmul.f32 -0.5, %v7330_v58 }
 0x59a   :  { %v7377_v34 = vsub.f32 1.0, %v7161_v0  ;;  %v7115_v10 = vmul.f32 %v7059_v29, %v10504_v39  ;;  %v7146_v59 = vmax.f32 %v7130_v16, 0.0  ;;  %v7315_v0 = vmul.f32 %v8905_v27, %v7299_v19  ;;  %v10541_v27 = vld [vmem:[%s11191_s2 + $0x48] sm:$0xff] }
 0x59b   :  { %v7320_v28 = vmul.f32 %v7304_v24, %v10502_v36  ;;  %v7029_v35 = vmin.f32 %v7013_v33, %v7021_v22  ;;  %11532 = vst [vmem:[#allocation20_spill] sm:$0xff] %v10541_v27  ;;  %v7022_v24 = vsub.f32 16.0, %v7006_v62  ;;  %v7362_v33 = vadd.f32 %v7346_v2, %v10536_v53  ;;  %v4151_v22 = vpop.permute.xlu0 %4150 }
 0x59c   :  { %v7393_v47 = vmul.f32 %v7377_v34, %v7361_v38  ;;  %v7131_v29 = vadd.f32 %v7115_v10, %v10250_v41  ;;  %v7162_v57 = vmin.f32 %v7146_v59, 1.0  ;;  %v7331_v41 = vmul.f32 %v7315_v0, %v7315_v0 }
 0x59d   :  { %v10524_v14 = vpop.permute.xlu1 %7066  ;;  %v7336_v19 = vmul.f32 %v7320_v28, %v7320_v28  ;;  %v10545_v59 = vmin.f32 %v7036_v30, 1.0  ;;  %v7037_v34 = vmax.f32 %v7029_v35, 0.0  ;;  %v7014_v10 = vadd.f32 1.0, %v7006_v62 }
 0x59e   :  { %11530 = vst [vmem:[#allocation50_spill] sm:$0xff] %v10524_v14  ;;  %v7491_v63 = vsel %vm853_vm4, %v7393_v47, 0.0  ;;  %v7147_v16 = vmax.f32 %v7131_v29, 0.0  ;;  %v7378_v37 = vsub.f32 1.0, %v7162_v57  ;;  %v7347_v29 = vmul.f32 -0.5, %v7331_v41  ;;  %v11535_v41 = vld [vmem:[#allocation68_spill] sm:$0xff] }
 0x59f   :  { %7492 = vadd.xlane.f32.xlu1 %v7491_v63  ;;  %v7306_v63 = vsub.f32 %v10541_v27, %v10484_v26  ;;  %11533 = vst [vmem:[#allocation66_spill] sm:$0xff] %v10545_v59  ;;  %v7337_v27 = vmul.f32 %v11534_v3, %v11534_v3  ;;  %v7045_v35 = vmin.f32 %v7037_v34, 1.0  ;;  %v7030_v62 = vmin.f32 %v7014_v10, %v7022_v24 }
 0x5a0   :  { %v7163_v58 = vmin.f32 %v7147_v16, 1.0  ;;  %v7352_v31 = vmul.f32 -0.5, %v7336_v19  ;;  %v7394_v20 = vmul.f32 %v7378_v37, %v7362_v33  ;;  %v7363_v16 = vadd.f32 %v7347_v29, %v10497_v51 }
 0x5a1   :  { %v10531_v38 = vpop.permute.xlu1 %7070  ;;  %v7322_v28 = vmul.f32 %v7306_v63, %v10502_v36  ;;  %v7038_v34 = vmax.f32 %v7030_v62, 0.0  ;;  %v4178_v10 = vmul.f32 %v11535_v41, %v4151_v22  ;;  %v7015_v37 = vadd.f32 1.0, %v7007_v55 }
 0x5a2   :  { %11531 = vst [vmem:[#allocation51_spill] sm:$0xff] %v10531_v38  ;;  %v7379_v4 = vsub.f32 1.0, %v7163_v58  ;;  %v4155_v38 = vpop.permute.xlu0 %4154  ;;  %v7368_v19 = vadd.f32 %v7352_v31, %v10536_v53  ;;  %v7494_v46 = vsel %vm853_vm4, %v7394_v20, 0.0  ;;  %v7023_v33 = vsub.f32 16.0, %v7007_v55  ;;  %v11539_v55 = vld [vmem:[#allocation46_spill] sm:$0xff] }
 0x5a3   :  { %v7338_v3 = vmul.f32 %v7322_v28, %v7322_v28  ;;  %v10566_v62 = vmin.f32 %v7038_v34, 1.0 }
 0x5a5   :  { %v7079_v47 = vpop.permute.xlu1 %7078  ;;  %11537 = vst [vmem:[#allocation70_spill] sm:$0xff] %v10566_v62 }
 0x5a6   :  { %v7120_v0 = vmul.f32 %v7079_v47, %v10545_v59  ;;  %v4177_v47 = vmul.f32 %v11535_v41, %v10333_v6  ;;  %v7353_v59 = vmul.f32 -0.5, %v7337_v27  ;;  %v7395_v6 = vmul.f32 %v7379_v4, %v7363_v16  ;;  %v10577_v34 = vpop.permute.xlu0 %4166 }
 0x5a7   :  { %v4179_v27 = vmul.f32 %v11535_v41, %v4155_v38  ;;  %v4218_v38 = vadd.f32 %v10355_v52, %v4178_v10  ;;  %v10585_v10 = vld [vmem:[%s11191_s2 + $0x28] sm:$0xff] }
 0x5a8   :  { %v7136_v30 = vadd.f32 %v7120_v0, %v10291_v17  ;;  %v7369_v28 = vadd.f32 %v7353_v59, %v10497_v51  ;;  %v4217_v4 = vadd.f32 %v10349_v44, %v4177_v47 }
 0x5a9   :  { %v7083_v57 = vpop.permute.xlu1 %7082 }
 0x5aa   :  { %v7152_v2 = vmax.f32 %v7136_v30, 0.0  ;;  %v7121_v8 = vmul.f32 %v7083_v57, %v7045_v35  ;;  %v11330_v57 = vsub.f32 1.0, %v11539_v55 }
 0x5ac   :  { %v7168_v63 = vmin.f32 %v7152_v2, 1.0  ;;  %v7137_v17 = vadd.f32 %v7121_v8, %v10280_v1  ;;  %v7354_v8 = vmul.f32 -0.5, %v7338_v3  ;;  %v11536_v1 = vld [vmem:[#allocation63_spill] sm:$0xff]  ;;  %v7031_v2 = vmin.f32 %v7015_v37, %v7023_v33 }
 0x5ad   :  { %v7087_v24 = vpop.permute.xlu1 %7086  ;;  %v7339_v31 = vmul.f32 %v11536_v1, %v11536_v1  ;;  %v4225_v37 = vadd.f32 1.0, %v4217_v4  ;;  %v4028_v33 = vsub.f32 1.0, %v11330_v57 }
 0x5ae   :  { %v7384_v58 = vsub.f32 1.0, %v7168_v63  ;;  %v7153_v0 = vmax.f32 %v7137_v17, 0.0  ;;  %v7122_v29 = vmul.f32 %v7087_v24, %v7045_v35  ;;  %7495 = vadd.xlane.f32.xlu0 %v7494_v46  ;;  %v7497_v63 = vsel %vm853_vm4, %v7395_v6, 0.0 }
 0x5af   :  { %v7370_v17 = vadd.f32 %v7354_v8, %v10536_v53  ;;  %v7355_v52 = vmul.f32 -0.5, %v7339_v31  ;;  %v7039_v6 = vmax.f32 %v7031_v2, 0.0  ;;  %v10602_v8 = vld [vmem:[%s11191_s2 + $0x78] sm:$0xff] }
 0x5b0   :  { %v7169_v30 = vmin.f32 %v7153_v0, 1.0  ;;  %v7138_v22 = vadd.f32 %v7122_v29, %v10277_v43  ;;  %v10568_v20 = vmul.f32 %v7384_v58, %v7368_v19  ;;  %v4219_v43 = vadd.f32 %v10529_v7, %v4179_v27  ;;  %v11541_v7 = vld [vmem:[#allocation21_spill] sm:$0xff]  ;;  %v10595_v27 = vld [vmem:[%s11191_s2 + $0x18] sm:$0xff] }
 0x5b1   :  { %v7091_v35 = vpop.permute.xlu1 %7090  ;;  %v2042_v46 = vsub.f32 1.0, %v11541_v7  ;;  %v4226_v58 = vadd.f32 1.0, %v4218_v38  ;;  %v7371_v2 = vadd.f32 %v7355_v52, %v10497_v51 }
 0x5b2   :  { %11538 = vst [vmem:[#allocation53_spill] sm:$0xff] %v10568_v20  ;;  %v7385_v59 = vsub.f32 1.0, %v7169_v30  ;;  %v7154_v16 = vmax.f32 %v7138_v22, 0.0  ;;  %v7123_v3 = vmul.f32 %v7091_v35, %v10566_v62  ;;  %7498 = vadd.xlane.f32.xlu0 %v7497_v63  ;;  %v4227_v31 = vadd.f32 1.0, %v4219_v43  ;;  %v10623_v43 = vld [vmem:[%s11196_s7] sm:$0xff] }
 0x5b3   :  { %v11542_v22 = vsub.f32 1.0, %v10036_v48  ;;  %v4233_v63 = vmul.f32 7.5, %v4225_v37  ;;  %v4234_v48 = vmul.f32 7.5, %v4226_v58  ;;  %v4181_v37 = vmul.f32 %v11535_v41, %v10365_v40  ;;  %v11550_v40 = vld [vmem:[#allocation30_spill] sm:$0xff] }
 0x5b4   :  { %v7170_v19 = vmin.f32 %v7154_v16, 1.0  ;;  %v7139_v44 = vadd.f32 %v7123_v3, %v10311_v42  ;;  %v10580_v47 = vmul.f32 %v7385_v59, %v7369_v28  ;;  %v10615_v59 = vmul.f32 0.15625, %v2042_v46  ;;  %v11545_v16 = vld [vmem:[#allocation28_spill] sm:$0xff]  ;;  %v11551_v28 = vld [vmem:[#allocation17_spill] sm:$0xff] }
 0x5b5   :  { %v10610_v4 = vmul.f32 0.15625, %v11542_v22  ;;  %v2045_v3 = vsub.f32 1.0, %v11545_v16  ;;  %v10637_v22 = vsub.f32 1.0, %v2042_v46  ;;  %v2046_v24 = vsub.f32 1.0, %v11550_v40 }
 0x5b6   :  { %11540 = vst [vmem:[#allocation73_spill] sm:$0xff] %v10580_v47  ;;  %v7386_v0 = vsub.f32 1.0, %v7170_v19  ;;  %v7155_v42 = vmax.f32 %v7139_v44, 0.0  ;;  %v4087_v29 = vpop.permute.xlu1 %4086  ;;  %v4180_v19 = vmul.f32 %v11535_v41, %v10359_v50  ;;  %v4171_v44 = vpop.permute.xlu0 %4170  ;;  %v4241_v1 = vsub.f32 %v4233_v63, %v11551_v28  ;;  %v11555_v63 = vld [vmem:[#allocation34_spill] sm:$0xff] }
 0x5b7   :  { %v10606_v30 = vmul.f32 %v4087_v29, %v4028_v33  ;;  %11543 = vst [vmem:[#allocation75_spill] sm:$0xff] %v10610_v4  ;;  %v11547_v33 = vld [vmem:[#allocation61_spill] sm:$0xff]  ;;  %v4221_v57 = vadd.f32 %v10369_v60, %v4181_v37  ;;  %v4242_v46 = vsub.f32 %v4234_v48, %v11551_v28  ;;  %v10659_v40 = vsub.f32 1.0, %v2045_v3 }
 0x5b8   :  { %v7171_v38 = vmin.f32 %v7155_v42, 1.0  ;;  %v10612_v35 = vmul.f32 %v7386_v0, %v7370_v17  ;;  %v10625_v17 = vmin.f32 %v7039_v6, 1.0  ;;  %v7341_v52 = vmul.f32 %v11547_v33, %v11547_v33  ;;  %v10635_v29 = vld [vmem:[%s11196_s7 + $0x8] sm:$0xff]  ;;  %v11548_v6 = vld [vmem:[#allocation67_spill] sm:$0xff] }
 0x5b9   :  { %v4235_v0 = vmul.f32 7.5, %v4227_v31  ;;  %v4220_v42 = vadd.f32 %v10362_v25, %v4180_v19  ;;  %v10644_v19 = vmul.f32 0.15625, %v2045_v3  ;;  %v2047_v60 = vsub.f32 1.0, %v11555_v63  ;;  %v10671_v3 = vld [vmem:[%s11196_s7 + $0x10] sm:$0xff] }
 0x5ba   :  { %11544 = vst [vmem:[#allocation71_spill] sm:$0xff] %v10612_v35  ;;  %v7387_v7 = vsub.f32 1.0, %v7171_v38  ;;  %11546 = vst [vmem:[#allocation74_spill] sm:$0xff] %v10625_v17  ;;  %v4211_v37 = vpop.permute.xlu0 %4210  ;;  %v7000_v48 = vadd.f32 1.0, %v10478_v11  ;;  %v4250_v63 = vand.u32 2147483647, %v4242_v46 }
 0x5bb   :  { %v7099_v50 = vpop.permute.xlu1 %7098  ;;  %v2763_v58 = vpop.f32.mrb[22].mxu0  ;;  %v2048_v46 = vsub.f32 1.0, %v10152_v45 }
 0x5bc   :  { %v7125_v16 = vmul.f32 %v7099_v50, %v10625_v17  ;;  %v3977_v31 = vsub.f32 %v2763_v58, %v10623_v43  ;;  %v8231_v33 = vpop.f32.mrb[23].mxu0  ;;  %v10642_v25 = vmul.f32 %v7387_v7, %v7371_v2  ;;  %v7357_v50 = vmul.f32 -0.5, %v7341_v52 }
 0x5bd   :  { %v11552_v58 = vsub.f32 1.0, %v11539_v55  ;;  %v4243_v2 = vsub.f32 %v4235_v0, %v11551_v28  ;;  %v4228_v7 = vadd.f32 1.0, %v4220_v42  ;;  %v10665_v52 = vmul.f32 0.15625, %v2046_v24 }
 0x5be   :  { %11549 = vst [vmem:[#allocation76_spill] sm:$0xff] %v10642_v25  ;;  %v7141_v20 = vadd.f32 %v7125_v16, %v10325_v54  ;;  %v3985_v38 = vmul.f32 %v3977_v31, %v10635_v29  ;;  %v4249_v55 = vand.u32 2147483647, %v4241_v1  ;;  %v4229_v0 = vadd.f32 1.0, %v4221_v57 }
 0x5bf   :  { %v10654_v33 = vmul.f32 0.15625, %v11552_v58  ;;  %v10657_v25 = vpop.permute.xlu1 %7226  ;;  %v4183_v58 = vmul.f32 %v11535_v41, %v4171_v44  ;;  %v7373_v11 = vadd.f32 %v7357_v50, %v10497_v51  ;;  %v10676_v1 = vsub.f32 1.0, %v2046_v24 }
 0x5c0   :  { %11554 = vst [vmem:[#allocation72_spill] sm:$0xff] %v10657_v25  ;;  %v7157_v54 = vmax.f32 %v7141_v20, 0.0  ;;  %v3993_v16 = vmul.f32 %v3985_v38, %v3985_v38  ;;  %v10663_v31 = vpop.f32.mrb[24].mxu0  ;;  %v4251_v20 = vand.u32 2147483647, %v4243_v2  ;;  %v4236_v38 = vmul.f32 7.5, %v4228_v7 }
 0x5c1   :  { %11553 = vst [vmem:[#allocation54_spill] sm:$0xff] %v10654_v33  ;;  %v8245_v42 = vpop.f32.mrb[25].mxu0  ;;  %v4223_v47 = vadd.f32 %v4211_v37, %v4183_v58  ;;  %v10678_v44 = vmul.f32 0.15625, %v2047_v60  ;;  %v7008_v57 = vmul.f32 7.5, %v7000_v48  ;;  %v4182_v50 = vmul.f32 %v11535_v41, %v10577_v34 }
 0x5c2   :  { %v7173_v25 = vmin.f32 %v7157_v54, 1.0  ;;  %v4001_v35 = vmul.f32 -0.5, %v3993_v16  ;;  %v4257_v54 = vsub.f32 1.0, %v4249_v55  ;;  %v4237_v2 = vmul.f32 7.5, %v4229_v0 }
 0x5c3   :  { %v10674_v17 = vpop.f32.mrb[32].mxu1  ;;  %v4258_v37 = vsub.f32 1.0, %v4250_v63  ;;  %v4244_v58 = vsub.f32 %v4236_v38, %v11551_v28  ;;  %v4222_v45 = vadd.f32 %v10374_v49, %v4182_v50  ;;  %v7016_v63 = vadd.f32 1.0, %v7008_v57 }
 0x5c4   :  { %v7389_v62 = vsub.f32 1.0, %v7173_v25  ;;  %v4009_v14 = vadd.f32 %v4001_v35, %v10671_v3  ;;  %v4091_v32 = vpop.permute.xlu1 %4090  ;;  %v8238_v42 = vpop.f32.mrb[33].mxu1  ;;  %v4259_v35 = vsub.f32 1.0, %v4251_v20  ;;  %v7024_v51 = vsub.f32 16.0, %v7008_v57 }
 0x5c5   :  { %v3043_v7 = vpop.f32.mrb[26].mxu0  ;;  %v4231_v42 = vadd.f32 1.0, %v4223_v47  ;;  %v4031_v47 = vsub.f32 1.0, %v2047_v60  ;;  %v10701_v38 = vmax.f32 %v4257_v54, 0.0  ;;  %v10703_v49 = vmax.f32 %v4258_v37, 0.0 }
 0x5c6   :  { %v10685_v24 = vmul.f32 %v10404_v12, %v4009_v14  ;;  %v3981_v16 = vsub.f32 %v3043_v7, %v10623_v43  ;;  %v8259_v48 = vpop.f32.mrb[27].mxu0  ;;  %v10688_v25 = vmul.f32 %v7389_v62, %v7373_v11  ;;  %v10697_v12 = vmul.f32 0.15625, %v2048_v46 }
 0x5c7   :  { %v4245_v62 = vsub.f32 %v4237_v2, %v11551_v28  ;;  %v10707_v57 = vmax.f32 %v4259_v35, 0.0  ;;  %v10709_v48 = vmul.f32 7.5, %v4231_v42  ;;  %v4230_v60 = vadd.f32 1.0, %v4222_v45 }
 0x5c8   :  { %11556 = vst [vmem:[#allocation77_spill] sm:$0xff] %v10685_v24  ;;  %v3989_v55 = vmul.f32 %v3981_v16, %v10635_v29  ;;  %v10693_v34 = vpop.permute.xlu1 %4094  ;;  %v2973_v0 = vpop.f32.mrb[34].mxu1  ;;  %v10705_v16 = vsub.f32 1.0, %v2048_v46  ;;  %v7032_v37 = vmin.f32 %v7016_v63, %v7024_v51  ;;  %v4184_v46 = vmul.f32 %v11535_v41, %v10381_v15 }
 0x5c9   :  { %v3980_v11 = vsub.f32 %v2973_v0, %v10623_v43  ;;  %v8252_v20 = vpop.f32.mrb[35].mxu1  ;;  %v10713_v0 = vand.u32 2147483647, %v4244_v58  ;;  %v10715_v24 = vand.u32 2147483647, %v4245_v62  ;;  %v11557_v41 = vsub.f32 %v10602_v8, %v10484_v26 }
 0x5ca   :  { %v3997_v50 = vmul.f32 %v3989_v55, %v3989_v55  ;;  %v3183_v7 = vpop.f32.mrb[28].mxu0  ;;  %v4224_v63 = vadd.f32 %v10388_v21, %v4184_v46 }
 0x5cb   :  { %v3988_v14 = vmul.f32 %v3980_v11, %v10635_v29  ;;  %v3983_v2 = vsub.f32 %v3183_v7, %v10623_v43  ;;  %v8273_v4 = vpop.f32.mrb[29].mxu0  ;;  %v4109_v11 = vmul.f32 %v4091_v32, %v10659_v40 }
 0x5cc   :  { %v4005_v54 = vmul.f32 -0.5, %v3997_v50  ;;  %v4099_v20 = vpop.permute.xlu1 %4098  ;;  %v3978_v4 = vsub.f32 %v10674_v17, %v10623_v43 }
 0x5cd   :  { %v3996_v35 = vmul.f32 %v3988_v14, %v3988_v14  ;;  %v3991_v42 = vmul.f32 %v3983_v2, %v10635_v29  ;;  %v3113_v55 = vpop.f32.mrb[36].mxu1  ;;  %v7328_v14 = vmul.f32 %v11557_v41, %v10502_v36 }
 0x5ce   :  { %v4013_v58 = vadd.f32 %v4005_v54, %v10671_v3  ;;  %v3982_v45 = vsub.f32 %v3113_v55, %v10623_v43  ;;  %v8266_v50 = vpop.f32.mrb[37].mxu1  ;;  %v8287_v51 = vpop.f32.mrb[30].mxu0  ;;  %v7040_v54 = vmax.f32 %v7032_v37, 0.0 }
 0x5cf   :  { %v4004_v62 = vmul.f32 -0.5, %v3996_v35  ;;  %v3999_v7 = vmul.f32 %v3991_v42, %v3991_v42  ;;  %v4521_v15 = vpop.f32.mrb[31].mxu0  ;;  %v10734_v50 = vmul.f32 7.5, %v4230_v60  ;;  %v3979_v35 = vsub.f32 %v10663_v31, %v10623_v43 }
 0x5d0   :  { %v10730_v32 = vmul.f32 %v4109_v11, %v4013_v58  ;;  %v3990_v17 = vmul.f32 %v3982_v45, %v10635_v29  ;;  %v4103_v40 = vpop.permute.xlu1 %4102  ;;  %v8694_v2 = vpack.c.bf16 %v8287_v51, %v4521_v15  ;;  %v3986_v42 = vmul.f32 %v3978_v4, %v10635_v29  ;;  %v10748_v4 = vpop.xlane.xlu0 %384 }
 0x5d1   :  { %v4012_v21 = vadd.f32 %v4004_v62, %v10671_v3  ;;  %v4007_v46 = vmul.f32 -0.5, %v3999_v7  ;;  %v4111_v45 = vmul.f32 %v4099_v20, %v4031_v47  ;;  %v4232_v31 = vadd.f32 1.0, %v4224_v63  ;;  %11558 = vst [vmem:[#allocation78_spill] sm:$0xff] %v10748_v4 }
 0x5d2   :  { %v3998_v41 = vmul.f32 %v3990_v17, %v3990_v17  ;;  %v3253_v11 = vpop.f32.mrb[38].mxu1  ;;  %8695 = vmatpush3.bf16.msra.mxu0 %v8694_v2  ;;  %v10750_v15 = vmin.f32 %v7040_v54, 1.0  ;;  %v7344_v17 = vmul.f32 %v7328_v14, %v7328_v14  ;;  %v6872_v2 = vrot.slane %v10419_v18, %v9160_v13 }
 0x5d3   :  { %v10743_v37 = vmul.f32 %v10606_v30, %v4012_v21  ;;  %v4015_v60 = vadd.f32 %v4007_v46, %v10671_v3  ;;  %v3984_v51 = vsub.f32 %v3253_v11, %v10623_v43  ;;  %v8280_v62 = vpop.f32.mrb[39].mxu1  ;;  %8699 = vmatprep.subr.bf16.mxu0 %v11407_v9  ;;  %v3987_v46 = vmul.f32 %v3979_v35, %v10635_v29 }
 0x5d4   :  { %v4006_v7 = vmul.f32 -0.5, %v3998_v41  ;;  %v4110_v14 = vmul.f32 %v10693_v34, %v10676_v1  ;;  %v4240_v58 = vmul.f32 7.5, %v4232_v31  ;;  %v6915_v55 = vmul.f32 %v10041_v56, %v6872_v2 }
 0x5d5   :  { %v10754_v30 = vmul.f32 %v4111_v45, %v4015_v60  ;;  %v3992_v21 = vmul.f32 %v3984_v51, %v10635_v29  ;;  %v7111_v47 = vpop.permute.xlu1 %7110  ;;  %8342 = vmatmul.mubr.msk.f32.vlgmr.msra.gmra.mrb[38].mxu0 %vm853_vm4, %v10701_v38  ;;  %v8301_v20 = vpop.f32.mrb[32].mxu0  ;;  %v3994_v60 = vmul.f32 %v3986_v42, %v3986_v42  ;;  %v3995_v33 = vmul.f32 %v3987_v46, %v3987_v46 }
 0x5d6   :  { %v4014_v54 = vadd.f32 %v4006_v7, %v10671_v3  ;;  %v7128_v18 = vmul.f32 %v7111_v47, %v10750_v15  ;;  %v8294_v41 = vpop.f32.mrb[40].mxu1  ;;  %v4683_v11 = vpop.f32.mrb[33].mxu0  ;;  %8355 = vmatprep.mubr.msk.f32.mxu0 %vm8950_vm0, %v11408_v61  ;;  %v7360_v7 = vmul.f32 -0.5, %v7344_v17  ;;  %v4246_v47 = vsub.f32 %v10734_v50, %v11551_v28 }
 0x5d7   :  { %v4000_v51 = vmul.f32 %v3992_v21, %v3992_v21  ;;  %v4602_v62 = vpop.f32.mrb[41].mxu1  ;;  %v8700_v63 = vpack.c.bf16 %v8301_v20, %v4683_v11  ;;  %v4247_v50 = vsub.f32 %v10709_v48, %v11551_v28  ;;  %v4002_v31 = vmul.f32 -0.5, %v3994_v60 }
 0x5d8   :  { %v10770_v35 = vmul.f32 %v4110_v14, %v4014_v54  ;;  %v7144_v1 = vadd.f32 %v7128_v18, %v10336_v5  ;;  %v8697_v34 = vpack.c.bf16 %v8294_v41, %v4602_v62  ;;  %v6939_v42 = vpop.permute.xlu0 %6938  ;;  %v4112_v56 = vmul.f32 %v4103_v40, %v10705_v16  ;;  %v11569_v5 = vld [vmem:[#allocation66_spill] sm:$0xff] }
 0x5d9   :  { %v4008_v4 = vmul.f32 -0.5, %v4000_v51  ;;  %8701 = vmatpush3.bf16.msra.mxu0 %v8700_v63  ;;  %v6944_v20 = vrot.slane %v6939_v42, %v9160_v13  ;;  %v7376_v13 = vadd.f32 %v7360_v7, %v10536_v53  ;;  %v4260_v54 = vsub.f32 1.0, %v10713_v0 }
 0x5da   :  { %v7160_v45 = vmax.f32 %v7144_v1, 0.0  ;;  %8698 = vmatpush3.bf16.msra.mxu1 %v8697_v34  ;;  %v8315_v21 = vpop.f32.mrb[34].mxu0  ;;  %8705 = vmatprep.subr.bf16.mxu0 %v11407_v9  ;;  %v11559_v48 = vsub.f32 1.0, %v10715_v24  ;;  %v4254_v16 = vand.u32 2147483647, %v4246_v47  ;;  %v4003_v41 = vmul.f32 -0.5, %v3995_v33 }
 0x5db   :  { %v4016_v17 = vadd.f32 %v4008_v4, %v10671_v3  ;;  %v4845_v2 = vpop.f32.mrb[35].mxu0  ;;  %8702 = vmatprep.subr.bf16.mxu1 %v11407_v9  ;;  %v6987_v46 = vadd.f32 %v6944_v20, %v6915_v55  ;;  %v8308_v4 = vpop.f32.mrb[42].mxu1  ;;  %v4248_v55 = vsub.f32 %v4240_v58, %v11551_v28  ;;  %v4010_v51 = vadd.f32 %v4002_v31, %v10671_v3 }
 0x5dc   :  { %v7176_v63 = vmin.f32 %v7160_v45, 1.0  ;;  %v8706_v14 = vpack.c.bf16 %v8315_v21, %v4845_v2  ;;  %8356 = vmatmul.mubr.msk.f32.vlgmr.msra.gmra.mrb[40].mxu0 %vm853_vm4, %v10707_v57  ;;  %v10791_v18 = vmax.f32 %v11559_v48, 0.0  ;;  %v4764_v0 = vpop.f32.mrb[43].mxu1  ;;  %v4255_v28 = vand.u32 2147483647, %v4247_v50 }
 0x5dd   :  { %v10793_v40 = vmul.f32 %v4112_v56, %v4016_v17  ;;  %8349 = vmatmul.mubr.msk.f32.vlgmr.msra.gmra.mrb[48].mxu1 %vm853_vm4, %v10703_v49  ;;  %8369 = vmatprep.mubr.msk.f32.mxu0 %vm8950_vm0, %v11408_v61  ;;  %v6995_v60 = vadd.f32 1.0, %v6987_v46  ;;  %v4079_v24 = vpop.permute.xlu0 %4078  ;;  %v8703_v45 = vpack.c.bf16 %v8308_v4, %v4764_v0  ;;  %v11560_v58 = vsub.f32 1.0, %v11548_v6 }
 0x5de   :  { %v7392_v11 = vsub.f32 1.0, %v7176_v63  ;;  %8707 = vmatpush3.bf16.msra.mxu0 %v8706_v14  ;;  %8362 = vmatprep.mubr.msk.f32.mxu1 %vm8950_vm0, %v11408_v61  ;;  %v4106_v62 = vmul.f32 %v4079_v24, %v10637_v22  ;;  %v10811_v47 = vmax.f32 %v4260_v54, 0.0  ;;  %v4262_v42 = vsub.f32 1.0, %v4254_v16 }
 0x5df   :  { %8711 = vmatprep.subr.bf16.mxu0 %v11407_v9  ;;  %v7003_v33 = vmul.f32 7.5, %v6995_v60  ;;  %v4027_v34 = vsub.f32 1.0, %v11560_v58  ;;  %8704 = vmatpush3.bf16.msra.mxu1 %v8703_v45  ;;  %v11561_v20 = vsub.f32 %v10595_v27, %v10484_v26  ;;  %v4256_v31 = vand.u32 2147483647, %v4248_v55  ;;  %v10836_v55 = vld [vmem:[%s11191_s2 + $0x58] sm:$0xff] }
 0x5e0   :  { %v10809_v7 = vmul.f32 %v7392_v11, %v7376_v13  ;;  %v10813_v21 = vmul.f32 %v4106_v62, %v4010_v51  ;;  %v8322_v22 = vpop.f32.mrb[44].mxu1  ;;  %8708 = vmatprep.subr.bf16.mxu1 %v11407_v9  ;;  %v11562_v46 = vsub.f32 %v10585_v10, %v10484_v26  ;;  %v4011_v48 = vadd.f32 %v4003_v41, %v10671_v3 }
 0x5e1   :  { %8370 = vmatmul.mubr.msk.f32.vlgmr.msra.gmra.mrb[42].mxu0 %vm853_vm4, %v10791_v18  ;;  %v7316_v50 = vmul.f32 %v11561_v20, %v10502_v36  ;;  %v7011_v56 = vadd.f32 1.0, %v7003_v33  ;;  %v7019_v17 = vsub.f32 16.0, %v7003_v33  ;;  %v4926_v2 = vpop.f32.mrb[45].mxu1  ;;  %v4083_v63 = vpop.permute.xlu0 %4082  ;;  %v7308_v11 = vsub.f32 %v10836_v55, %v10484_v26 }
 0x5e2   :  { %8383 = vmatprep.mubr.msk.f32.mxu0 %vm8950_vm0, %v11408_v61  ;;  %v7318_v14 = vmul.f32 %v11562_v46, %v10502_v36  ;;  %v8709_v54 = vpack.c.bf16 %v8322_v22, %v4926_v2  ;;  %v4107_v16 = vmul.f32 %v4083_v63, %v4027_v34  ;;  %8363 = vmatmul.mubr.msk.f32.vlgmr.msra.gmra.mrb[50].mxu1 %vm853_vm4, %v10811_v47  ;;  %v4263_v51 = vsub.f32 1.0, %v4255_v28  ;;  %v10861_v28 = vld [vmem:[%s11191_s2 + $0x68] sm:$0xff] }
 0x5e3   :  { %v7027_v4 = vmin.f32 %v7011_v56, %v7019_v17  ;;  %v11563_v60 = vmov %v11560_v58  ;;  %v8329_v41 = vpop.f32.mrb[36].mxu0  ;;  %8376 = vmatprep.mubr.msk.f32.mxu1 %vm8950_vm0, %v11408_v61  ;;  %v7332_v45 = vmul.f32 %v7316_v50, %v7316_v50  ;;  %v10848_v62 = vmax.f32 %v4262_v42, 0.0  ;;  %v11564_v56 = vld [vmem:[#allocation55_spill] sm:$0xff] }
 0x5e4   :  { %v10842_v0 = vmul.f32 0.15625, %v11563_v60  ;;  %v10844_v24 = vmul.f32 %v4107_v16, %v4011_v48  ;;  %8710 = vmatpush3.bf16.msra.mxu1 %v8709_v54  ;;  %v4264_v33 = vsub.f32 1.0, %v4256_v31  ;;  %v5007_v34 = vpop.f32.mrb[37].mxu0  ;;  %v7333_v17 = vmul.f32 %v11564_v56, %v11564_v56 }
 0x5e5   :  { %v7035_v58 = vmax.f32 %v7027_v4, 0.0  ;;  %8714 = vmatprep.subr.bf16.mxu1 %v11407_v9  ;;  %v8712_v22 = vpack.c.bf16 %v8329_v41, %v5007_v34  ;;  %v7334_v2 = vmul.f32 %v7318_v14, %v7318_v14  ;;  %v7310_v42 = vsub.f32 %v10861_v28, %v10484_v26  ;;  %v11565_v14 = vld [vmem:[#allocation60_spill] sm:$0xff]  ;;  %v11566_v4 = vld [vmem:[#allocation37_spill] sm:$0xff]  ;;  %v11567_v41 = vld [vmem:[#allocation50_spill] sm:$0xff] }
 0x5e6   :  { %v4139_v6 = vsub.f32 %v10844_v24, %v10842_v0  ;;  %v7063_v20 = vpop.permute.xlu0 %7062  ;;  %v7348_v46 = vmul.f32 -0.5, %v7332_v45  ;;  %v7324_v54 = vmul.f32 %v7308_v11, %v10502_v36  ;;  %v10870_v48 = vmax.f32 %v4263_v51, 0.0 }
 0x5e7   :  { %v7043_v63 = vmin.f32 %v7035_v58, 1.0  ;;  %v7116_v50 = vmul.f32 %v7063_v20, %v10504_v39  ;;  %8377 = vmatmul.mubr.msk.f32.vlgmr.msra.gmra.mrb[52].mxu1 %vm853_vm4, %v10848_v62  ;;  %8713 = vmatpush3.bf16.msra.mxu0 %v8712_v22  ;;  %v7335_v39 = vmul.f32 %v11565_v14, %v11565_v14  ;;  %v11568_v58 = vld [vmem:[#allocation51_spill] sm:$0xff]  ;;  %v10876_v22 = vmax.f32 %v4264_v33, 0.0 }
 0x5e8   :  { %v8336_v31 = vpop.f32.mrb[46].mxu1  ;;  %8390 = vmatprep.mubr.msk.f32.mxu1 %vm8950_vm0, %v11408_v61  ;;  %8718 = vmatprep.subr.bf16.mxu0 %v11566_v4  ;;  %v7349_v56 = vmul.f32 -0.5, %v7333_v17  ;;  %v7350_v1 = vmul.f32 -0.5, %v7334_v2  ;;  %v7364_v33 = vadd.f32 %v7348_v46, %v10536_v53  ;;  %v7326_v17 = vmul.f32 %v7310_v42, %v10502_v36  ;;  %v11577_v36 = vld [vmem:[#allocation70_spill] sm:$0xff] }
 0x5e9   :  { %v7132_v16 = vadd.f32 %v7116_v50, %v10259_v23  ;;  %v5088_v60 = vpop.f32.mrb[47].mxu1  ;;  %v7117_v26 = vmul.f32 %v11567_v41, %v7043_v63  ;;  %v7118_v34 = vmul.f32 %v11568_v58, %v7043_v63  ;;  %v11570_v23 = vld [vmem:[#allocation52_spill] sm:$0xff]  ;;  %v7351_v63 = vmul.f32 -0.5, %v7335_v39  ;;  %v11574_v41 = vld [vmem:[#allocation7_spill] sm:$0xff] }
 0x5ea   :  { %v8715_v20 = vpack.c.bf16 %v8336_v31, %v5088_v60  ;;  %v7075_v45 = vpop.permute.xlu0 %7074  ;;  %8384 = vmatmul.mubr.msk.f32.vlgmr.msra.gmra.mrb[44].mxu0 %vm853_vm4, %v10870_v48  ;;  %v11571_v50 = vld [vmem:[#allocation32_spill] sm:$0xff]  ;;  %v7340_v31 = vmul.f32 %v7324_v54, %v7324_v54  ;;  %v7366_v46 = vadd.f32 %v7350_v1, %v10536_v53  ;;  %v7342_v1 = vmul.f32 %v7326_v17, %v7326_v17 }
 0x5eb   :  { %v7148_v14 = vmax.f32 %v7132_v16, 0.0  ;;  %v7119_v11 = vmul.f32 %v7075_v45, %v11569_v5  ;;  %v7133_v51 = vadd.f32 %v7117_v26, %v11570_v23  ;;  %v7134_v13 = vadd.f32 %v7118_v34, %v11571_v50  ;;  %8720 = vmatpush3.bf16.msra.mxu0 %v11566_v4  ;;  %v11572_v16 = vld [vmem:[#allocation40_spill] sm:$0xff]  ;;  %v11573_v5 = vld [vmem:[#allocation6_spill] sm:$0xff]  ;;  %8397 = vmatprep.mubr.msk.f32.mxu0 %vm853_vm4, %v11574_v41 }
 0x5ec   :  { %8716 = vmatpush3.bf16.msra.mxu1 %v8715_v20  ;;  %8726 = vmatprep.subr.bf16.mxu0 %v11573_v5  ;;  %v11575_v34 = vld [vmem:[#allocation48_spill] sm:$0xff]  ;;  %v11576_v20 = vld [vmem:[#allocation19_spill] sm:$0xff]  ;;  %v7356_v23 = vmul.f32 -0.5, %v7340_v31 }
 0x5ed   :  { %v7164_v2 = vmin.f32 %v7148_v14, 1.0  ;;  %v7135_v60 = vadd.f32 %v7119_v11, %v11572_v16  ;;  %v7149_v26 = vmax.f32 %v7133_v51, 0.0  ;;  %v7150_v58 = vmax.f32 %v7134_v13, 0.0  ;;  %8722 = vmatprep.subr.bf16.mxu1 %v11575_v34  ;;  %v11578_v14 = vld [vmem:[#allocation22_spill] sm:$0xff]  ;;  %v11579_v50 = vld [vmem:[#allocation44_spill] sm:$0xff]  ;;  %v11580_v16 = vld [vmem:[#allocation23_spill] sm:$0xff] }
 0x5ee   :  { %v7095_v4 = vpop.permute.xlu0 %7094  ;;  %v7365_v45 = vadd.f32 %v7349_v56, %v11576_v20  ;;  %8398 = vmatmul.mubr.msk.f32.vlgmr.msra.gmra.mrb[46].mxu0 %vm853_vm4, %v11578_v14  ;;  %v7367_v56 = vadd.f32 %v7351_v63, %v11576_v20  ;;  %v11584_v14 = vld [vmem:[#allocation18_spill] sm:$0xff] }
 0x5ef   :  { %v7380_v39 = vsub.f32 1.0, %v7164_v2  ;;  %v7151_v54 = vmax.f32 %v7135_v60, 0.0  ;;  %v7124_v42 = vmul.f32 %v7095_v4, %v11577_v36  ;;  %8391 = vmatmul.mubr.msk.f32.vlgmr.msra.gmra.mrb[54].mxu1 %vm853_vm4, %v10876_v22  ;;  %v7165_v11 = vmin.f32 %v7149_v26, 1.0  ;;  %8728 = vmatpush3.bf16.msra.mxu0 %v11573_v5  ;;  %v8915_v60 = vld [vmem:[%s11191_s2 + $0x20] sm:$0xff]  ;;  %v11581_v26 = vld [vmem:[#allocation47_spill] sm:$0xff]  ;;  %v11583_v4 = vld [vmem:[#allocation74_spill] sm:$0xff] }
 0x5f0   :  { %8724 = vmatpush3.bf16.msra.mxu1 %v11575_v34  ;;  %v7166_v13 = vmin.f32 %v7150_v58, 1.0  ;;  %8734 = vmatprep.subr.bf16.mxu0 %v11580_v16  ;;  %v11582_v34 = vld [vmem:[#allocation41_spill] sm:$0xff]  ;;  %v7372_v36 = vadd.f32 %v7356_v23, %v10536_v53 }
 0x5f1   :  { %v7167_v51 = vmin.f32 %v7151_v54, 1.0  ;;  %v7140_v2 = vadd.f32 %v7124_v42, %v11579_v50  ;;  %8411 = vmatprep.mubr.msk.f32.mxu0 %vm853_vm4, %v8915_v60  ;;  %v7396_v41 = vmul.f32 %v7380_v39, %v7364_v33  ;;  %v7381_v5 = vsub.f32 1.0, %v7165_v11  ;;  %8730 = vmatprep.subr.bf16.mxu1 %v11581_v26  ;;  %v11586_v50 = vld [vmem:[#allocation36_spill] sm:$0xff] }
 0x5f2   :  { %v7103_v58 = vpop.permute.xlu0 %7102  ;;  %8404 = vmatprep.mubr.msk.f32.mxu1 %vm853_vm4, %v11582_v34  ;;  %v7382_v63 = vsub.f32 1.0, %v7166_v13  ;;  %8412 = vmatmul.mubr.msk.f32.vlgmr.msra.gmra.mrb[48].mxu0 %vm853_vm4, %v10585_v10  ;;  %v11585_v13 = vld [vmem:[#allocation42_spill] sm:$0xff] }
 0x5f3   :  { %v7383_v31 = vsub.f32 1.0, %v7167_v51  ;;  %v7156_v17 = vmax.f32 %v7140_v2, 0.0  ;;  %v7126_v20 = vmul.f32 %v7103_v58, %v11583_v4  ;;  %8405 = vmatmul.mubr.msk.f32.vlgmr.msra.gmra.mrb[56].mxu1 %vm853_vm4, %v10595_v27  ;;  %v7500_v33 = vsel %vm853_vm4, %v7396_v41, 0.0  ;;  %8736 = vmatpush3.bf16.msra.mxu0 %v11580_v16  ;;  %v8916_v27 = vld [vmem:[%s11191_s2 + $0x40] sm:$0xff]  ;;  %v11588_v16 = vld [vmem:[#allocation49_spill] sm:$0xff]  ;;  %v11590_v4 = vld [vmem:[#allocation26_spill] sm:$0xff] }
 0x5f4   :  { %7501 = vadd.xlane.f32.xlu1 %v7500_v33  ;;  %v7397_v39 = vmul.f32 %v7381_v5, %v7365_v45  ;;  %v7398_v54 = vmul.f32 %v7382_v63, %v7366_v46  ;;  %8732 = vmatpush3.bf16.msra.mxu1 %v11581_v26  ;;  %v7358_v51 = vmul.f32 -0.5, %v7342_v1  ;;  %v11587_v1 = vld [vmem:[#allocation20_spill] sm:$0xff]  ;;  %v11589_v63 = vld [vmem:[#allocation73_spill] sm:$0xff] }
 0x5f5   :  { %v7172_v42 = vmin.f32 %v7156_v17, 1.0  ;;  %v7142_v11 = vadd.f32 %v7126_v20, %v11584_v14  ;;  %8742 = vmatprep.subr.bf16.mxu0 %v11585_v13  ;;  %v7399_v10 = vmul.f32 %v7383_v31, %v7367_v56  ;;  %8425 = vmatprep.mubr.msk.f32.mxu0 %vm853_vm4, %v8916_v27  ;;  %v8917_v56 = vld [vmem:[%s11191_s2 + $0x30] sm:$0xff]  ;;  %v8918_v58 = vld [vmem:[%s11191_s2 + $0x60] sm:$0xff]  ;;  %v7515_v31 = vsel %vm853_vm4, %v11589_v63, 0.0  ;;  %v11591_v20 = vld [vmem:[#allocation71_spill] sm:$0xff] }
 0x5f6   :  { %8738 = vmatprep.subr.bf16.mxu1 %v11586_v50  ;;  %v10926_v45 = vpop.permute.xlu0 %7230  ;;  %v7503_v46 = vsel %vm853_vm4, %v7397_v39, 0.0  ;;  %8418 = vmatprep.mubr.msk.f32.mxu1 %vm853_vm4, %v8917_v56  ;;  %v7506_v60 = vsel %vm853_vm4, %v7398_v54, 0.0  ;;  %v7374_v26 = vadd.f32 %v7358_v51, %v10536_v53  ;;  %v8919_v53 = vld [vmem:[%s11191_s2 + $0x50] sm:$0xff]  ;;  %v7518_v33 = vsel %vm853_vm4, %v11591_v20, 0.0  ;;  %v11595_v56 = vld [vmem:[#allocation45_spill] sm:$0xff] }
 0x5f7   :  { %v7388_v23 = vsub.f32 1.0, %v7172_v42  ;;  %v7158_v2 = vmax.f32 %v7142_v11, 0.0  ;;  %7504 = vadd.xlane.f32.xlu0 %v7503_v46  ;;  %8426 = vmatmul.mubr.msk.f32.vlgmr.msra.gmra.mrb[50].mxu0 %vm853_vm4, %v11587_v1  ;;  %v8920_v14 = vld [vmem:[%s11191_s2 + $0x70] sm:$0xff]  ;;  %v7527_v27 = vsel %vm853_vm4, %v10688_v25, 0.0 }
 0x5f8   :  { %8419 = vmatmul.mubr.msk.f32.vlgmr.msra.gmra.mrb[58].mxu1 %vm853_vm4, %v11588_v16  ;;  %8744 = vmatpush3.bf16.msra.mxu0 %v11585_v13  ;;  %v11593_v13 = vld [vmem:[#allocation76_spill] sm:$0xff] }
 0x5f9   :  { %v7174_v41 = vmin.f32 %v7158_v2, 1.0  ;;  %7507 = vadd.xlane.f32.xlu1 %v7506_v60  ;;  %v7404_v5 = vmul.f32 %v7388_v23, %v7372_v36  ;;  %8740 = vmatpush3.bf16.msra.mxu1 %v11586_v50  ;;  %v11592_v36 = vld [vmem:[#allocation53_spill] sm:$0xff] }
 0x5fa   :  { %8439 = vmatprep.mubr.msk.f32.mxu0 %vm853_vm4, %v8918_v58  ;;  %v10945_v34 = vpop.permute.xlu0 %7234  ;;  %8746 = vmatprep.subr.bf16.mxu1 %v11590_v4  ;;  %v7512_v42 = vsel %vm853_vm4, %v11592_v36, 0.0  ;;  %v11594_v50 = vld [vmem:[#allocation65_spill] sm:$0xff] }
 0x5fb   :  { %v7390_v17 = vsub.f32 1.0, %v7174_v41  ;;  %7516 = vadd.xlane.f32.xlu0 %v7515_v31  ;;  %8432 = vmatprep.mubr.msk.f32.mxu1 %vm853_vm4, %v8919_v53  ;;  %v7524_v11 = vsel %vm853_vm4, %v7404_v5, 0.0  ;;  %v7343_v46 = vmul.f32 %v11594_v50, %v11594_v50  ;;  %v8921_v5 = vld [vmem:[%s11195_s6 + $0x20] sm:$0xff] }
 0x5fc   :  { %8440 = vmatmul.mubr.msk.f32.vlgmr.msra.gmra.mrb[52].mxu0 %vm853_vm4, %v10861_v28  ;;  %8433 = vmatmul.mubr.msk.f32.vlgmr.msra.gmra.mrb[60].mxu1 %vm853_vm4, %v10836_v55  ;;  %v7509_v55 = vsel %vm853_vm4, %v7399_v10, 0.0  ;;  %v7521_v10 = vsel %vm853_vm4, %v11593_v13, 0.0 }
 0x5fd   :  { %7519 = vadd.xlane.f32.xlu1 %v7518_v33  ;;  %v7406_v39 = vmul.f32 %v7390_v17, %v7374_v26  ;;  %8748 = vmatpush3.bf16.msra.mxu1 %v11590_v4  ;;  %v7359_v16 = vmul.f32 -0.5, %v7343_v46 }
 0x5fe   :  { %v10961_v54 = vpop.permute.xlu0 %7238  ;;  %8446 = vmatprep.mubr.msk.f32.mxu1 %vm853_vm4, %v8920_v14  ;;  %8749 = vmatprep.subr.bf16.mxu0 %v11407_v9 }
 0x5ff   :  { %7513 = vadd.xlane.f32.xlu0 %v7512_v42  ;;  %8453 = vmatprep.mubr.msk.f32.mxu0 %vm8950_vm0, %v11408_v61  ;;  %v7375_v25 = vadd.f32 %v8921_v5, %v7359_v16 }
 0x600   :  { %8752 = vmatprep.subr.bf16.mxu1 %v11407_v9  ;;  %8447 = vmatmul.mubr.msk.f32.vlgmr.msra.gmra.mrb[62].mxu1 %vm853_vm4, %v10602_v8  ;;  %v7530_v8 = vsel %vm853_vm4, %v7406_v39, 0.0 }
 0x601   :  { %7510 = vadd.xlane.f32.xlu1 %v7509_v55  ;;  %8460 = vmatprep.mubr.msk.f32.mxu1 %vm8950_vm0, %v11408_v61 }
 0x602   :  { %v10976_v28 = vpop.permute.xlu0 %7242 }
 0x603   :  { %7525 = vadd.xlane.f32.xlu0 %v7524_v11 }
 0x605   :  { %7522 = vadd.xlane.f32.xlu1 %v7521_v10 }
 0x606   :  { %v10983_v51 = vpop.permute.xlu0 %7246 }
 0x607   :  { %7528 = vadd.xlane.f32.xlu0 %v7527_v27 }
 0x609   :  { %7531 = vadd.xlane.f32.xlu1 %v7530_v8 }
 0x60a   :  { %v7107_v23 = vpop.permute.xlu0 %7106 }
 0x60b   :  { %v7127_v2 = vmul.f32 %v7107_v23, %v10750_v15 }
 0x60d   :  { %v7143_v1 = vadd.f32 %v7127_v2, %v11595_v56 }
 0x60f   :  { %v7159_v60 = vmax.f32 %v7143_v1, 0.0 }
 0x611   :  { %v7175_v41 = vmin.f32 %v7159_v60, 1.0 }
 0x613   :  { %v7391_v26 = vsub.f32 1.0, %v7175_v41 }
 0x615   :  { %v7407_v58 = vmul.f32 %v7391_v26, %v7375_v25 }
 0x617   :  { %v7533_v63 = vsel %vm853_vm4, %v7407_v58, 0.0 }
 0x618   :  { %7534 = vadd.xlane.f32.xlu1 %v7533_v63 }
 0x6a8   :  { %v10996_v31 = vpop.f32.mrb[38].mxu0 }
 0x6a9   :  { %v8343_v17 = vpop.f32.mrb[39].mxu0 }
 0x6af   :  { %v10998_v4 = vpop.f32.mrb[40].mxu0 }
 0x6b0   :  { %v11000_v15 = vpop.f32.mrb[48].mxu1  ;;  %v8357_v53 = vpop.f32.mrb[41].mxu0 }
 0x6b1   :  { %v8350_v20 = vpop.f32.mrb[49].mxu1 }
 0x6b4   :  { %v11002_v33 = vpop.f32.mrb[42].mxu0 }
 0x6b5   :  { %v8371_v39 = vpop.f32.mrb[43].mxu0  ;;  %v11004_v36 = vpop.f32.mrb[50].mxu1 }
 0x6b6   :  { %v8364_v42 = vpop.f32.mrb[51].mxu1 }
 0x6ba   :  { %v11006_v14 = vpop.f32.mrb[52].mxu1 }
 0x6bb   :  { %v8378_v55 = vpop.f32.mrb[53].mxu1 }
 0x6bd   :  { %v11008_v11 = vpop.f32.mrb[44].mxu0 }
 0x6be   :  { %v8385_v13 = vpop.f32.mrb[45].mxu0 }
 0x6c1   :  { %v8399_v10 = vpop.f32.mrb[46].mxu0 }
 0x6c2   :  { %v11010_v27 = vpop.f32.mrb[54].mxu1  ;;  %v5755_v8 = vpop.f32.mrb[47].mxu0 }
 0x6c3   :  { %v8392_v50 = vpop.f32.mrb[55].mxu1  ;;  %v8750_v46 = vpack.c.bf16 %v8399_v10, %v5755_v8 }
 0x6c5   :  { %v8413_v23 = vpop.f32.mrb[48].mxu0  ;;  %8751 = vmatpush3.bf16.msra.mxu0 %v8750_v46  ;;  %v5685_v46 = vsub.f32 1.0, %v11002_v33 }
 0x6c6   :  { %v8406_v2 = vpop.f32.mrb[56].mxu1  ;;  %v5905_v56 = vpop.f32.mrb[49].mxu0  ;;  %8755 = vmatprep.subr.bf16.mxu0 %v11407_v9 }
 0x6c7   :  { %v5830_v1 = vpop.f32.mrb[57].mxu1  ;;  %v8756_v16 = vpack.c.bf16 %v8413_v23, %v5905_v56 }
 0x6c8   :  { %v8753_v60 = vpack.c.bf16 %v8406_v2, %v5830_v1  ;;  %8454 = vmatmul.mubr.msk.f32.vlgmr.msra.gmra.mrb[54].mxu0 %vm853_vm4, %v10701_v38 }
 0x6c9   :  { %8757 = vmatpush3.bf16.msra.mxu0 %v8756_v16  ;;  %8467 = vmatprep.mubr.msk.f32.mxu0 %vm8950_vm0, %v11408_v61 }
 0x6ca   :  { %8754 = vmatpush3.bf16.msra.mxu1 %v8753_v60  ;;  %v8427_v41 = vpop.f32.mrb[50].mxu0  ;;  %8761 = vmatprep.subr.bf16.mxu0 %v11407_v9 }
 0x6cb   :  { %v8420_v5 = vpop.f32.mrb[58].mxu1  ;;  %v6055_v25 = vpop.f32.mrb[51].mxu0  ;;  %8758 = vmatprep.subr.bf16.mxu1 %v11407_v9 }
 0x6cc   :  { %v5980_v26 = vpop.f32.mrb[59].mxu1  ;;  %v8762_v58 = vpack.c.bf16 %v8427_v41, %v6055_v25  ;;  %8468 = vmatmul.mubr.msk.f32.vlgmr.msra.gmra.mrb[56].mxu0 %vm853_vm4, %v10707_v57 }
 0x6cd   :  { %v8759_v63 = vpack.c.bf16 %v8420_v5, %v5980_v26  ;;  %8461 = vmatmul.mubr.msk.f32.vlgmr.msra.gmra.mrb[64].mxu1 %vm853_vm4, %v10703_v49  ;;  %8481 = vmatprep.mubr.msk.f32.mxu0 %vm8950_vm0, %v11408_v61 }
 0x6ce   :  { %8474 = vmatprep.mubr.msk.f32.mxu1 %vm8950_vm0, %v11408_v61  ;;  %8763 = vmatpush3.bf16.msra.mxu0 %v8762_v58 }
 0x6cf   :  { %v8441_v38 = vpop.f32.mrb[52].mxu0  ;;  %8760 = vmatpush3.bf16.msra.mxu1 %v8759_v63  ;;  %v8434_v17 = vpop.f32.mrb[60].mxu1  ;;  %8767 = vmatprep.subr.bf16.mxu0 %v11407_v9 }
 0x6d0   :  { %v6205_v53 = vpop.f32.mrb[53].mxu0  ;;  %8764 = vmatprep.subr.bf16.mxu1 %v11407_v9  ;;  %v6130_v57 = vpop.f32.mrb[61].mxu1 }
 0x6d1   :  { %v8768_v20 = vpack.c.bf16 %v8441_v38, %v6205_v53  ;;  %v8765_v39 = vpack.c.bf16 %v8434_v17, %v6130_v57  ;;  %8482 = vmatmul.mubr.msk.f32.vlgmr.msra.gmra.mrb[58].mxu0 %vm853_vm4, %v10791_v18  ;;  %v5681_v18 = vsub.f32 1.0, %v10996_v31  ;;  %v7221_v38 = vsub.f32 1.0, %v5685_v46 }
 0x6d2   :  { %8475 = vmatmul.mubr.msk.f32.vlgmr.msra.gmra.mrb[66].mxu1 %vm853_vm4, %v10811_v47  ;;  %8495 = vmatprep.mubr.msk.f32.mxu0 %vm8950_vm0, %v11408_v61  ;;  %v5683_v47 = vsub.f32 1.0, %v10998_v4 }
 0x6d3   :  { %8769 = vmatpush3.bf16.msra.mxu0 %v8768_v20  ;;  %v8448_v49 = vpop.f32.mrb[62].mxu1  ;;  %8766 = vmatpush3.bf16.msra.mxu1 %v8765_v39  ;;  %v7217_v8 = vsub.f32 1.0, %v5681_v18  ;;  %v7281_v16 = vmul.f32 0.15625, %v5681_v18 }
 0x6d4   :  { %8488 = vmatprep.mubr.msk.f32.mxu1 %vm8950_vm0, %v11408_v61  ;;  %v6280_v42 = vpop.f32.mrb[63].mxu1  ;;  %8770 = vmatprep.subr.bf16.mxu1 %v11407_v9  ;;  %v7219_v50 = vsub.f32 1.0, %v5683_v47  ;;  %v11061_v63 = vmul.f32 0.15625, %v5683_v47 }
 0x6d5   :  { %v8771_v55 = vpack.c.bf16 %v8448_v49, %v6280_v42 }
 0x6d6   :  { %8496 = vmatmul.mubr.msk.f32.vlgmr.msra.gmra.mrb[60].mxu0 %vm853_vm4, %v10870_v48  ;;  %8489 = vmatmul.mubr.msk.f32.vlgmr.msra.gmra.mrb[68].mxu1 %vm853_vm4, %v10848_v62  ;;  %v5682_v48 = vsub.f32 1.0, %v11000_v15  ;;  %v11596_v15 = vld [vmem:[#allocation72_spill] sm:$0xff]  ;;  %v7259_v58 = vmul.f32 %v10945_v34, %v7219_v50  ;;  %v5687_v50 = vsub.f32 1.0, %v11008_v11 }
 0x6d7   :  { %8772 = vmatpush3.bf16.msra.mxu1 %v8771_v55  ;;  %8502 = vmatprep.mubr.msk.f32.mxu1 %vm8950_vm0, %v11408_v61  ;;  %v7257_v41 = vmul.f32 %v11596_v15, %v7217_v8  ;;  %v5686_v55 = vsub.f32 1.0, %v11006_v14 }
 0x6d8   :  { %v7218_v60 = vsub.f32 1.0, %v5682_v48  ;;  %v11058_v26 = vmul.f32 0.15625, %v5682_v48 }
 0x6da   :  { %8503 = vmatmul.mubr.msk.f32.vlgmr.msra.gmra.mrb[70].mxu1 %vm853_vm4, %v10876_v22  ;;  %v5684_v22 = vsub.f32 1.0, %v11004_v36  ;;  %v7258_v42 = vmul.f32 %v10926_v45, %v7218_v60 }
 0x6dc   :  { %v7220_v17 = vsub.f32 1.0, %v5684_v22 }
 0x79b   :  { %v6355_v13 = vpop.f32.mrb[54].mxu0 }
 0x79c   :  { %v7177_v9 = vsub.f32 %v6355_v13, %v10623_v43  ;;  %v8455_v10 = vpop.f32.mrb[55].mxu0 }
 0x79e   :  { %v7185_v62 = vmul.f32 %v7177_v9, %v10635_v29  ;;  %v11070_v9 = vmul.f32 0.15625, %v5685_v46  ;;  %v11597_v46 = vld [vmem:[#allocation77_spill] sm:$0xff] }
 0x79f   :  { %v6495_v61 = vpop.f32.mrb[56].mxu0 }
 0x7a0   :  { %v6425_v23 = vpop.f32.mrb[64].mxu1  ;;  %v7193_v2 = vmul.f32 %v7185_v62, %v7185_v62  ;;  %v7179_v31 = vsub.f32 %v6495_v61, %v10623_v43  ;;  %v8469_v56 = vpop.f32.mrb[57].mxu0  ;;  %v7261_v62 = vmul.f32 %v10976_v28, %v7221_v38  ;;  %v7222_v28 = vsub.f32 1.0, %v5686_v55 }
 0x7a1   :  { %v7178_v4 = vsub.f32 %v6425_v23, %v10623_v43  ;;  %v8462_v1 = vpop.f32.mrb[65].mxu1  ;;  %v7260_v23 = vmul.f32 %v10961_v54, %v7220_v17 }
 0x7a2   :  { %v7201_v5 = vmul.f32 -0.5, %v7193_v2  ;;  %v7187_v25 = vmul.f32 %v7179_v31, %v10635_v29 }
 0x7a3   :  { %v7186_v33 = vmul.f32 %v7178_v4, %v10635_v29  ;;  %v11598_v4 = vld [vmem:[#allocation75_spill] sm:$0xff] }
 0x7a4   :  { %v7209_v53 = vadd.f32 %v7201_v5, %v10671_v3  ;;  %v7195_v20 = vmul.f32 %v7187_v25, %v7187_v25  ;;  %v6635_v39 = vpop.f32.mrb[58].mxu0  ;;  %v11599_v56 = vsub.f32 %v11597_v46, %v11598_v4 }
 0x7a5   :  { %v7194_v57 = vmul.f32 %v7186_v33, %v7186_v33  ;;  %v6565_v49 = vpop.f32.mrb[66].mxu1  ;;  %v7181_v18 = vsub.f32 %v6635_v39, %v10623_v43  ;;  %v8483_v47 = vpop.f32.mrb[59].mxu0 }
 0x7a6   :  { %v7180_v34 = vsub.f32 %v6565_v49, %v10623_v43  ;;  %v8476_v13 = vpop.f32.mrb[67].mxu1  ;;  %v7265_v10 = vmul.f32 %v7257_v41, %v7209_v53  ;;  %v7203_v48 = vmul.f32 -0.5, %v7195_v20  ;;  %v7223_v20 = vsub.f32 1.0, %v5687_v50  ;;  %v8923_v49 = vld [vmem:[%s11196_s7 + $0x8] sm:$0xff] }
 0x7a7   :  { %v7202_v8 = vmul.f32 -0.5, %v7194_v57  ;;  %v7189_v61 = vmul.f32 %v7181_v18, %v10635_v29  ;;  %v5688_v13 = vsub.f32 1.0, %v11010_v27 }
 0x7a8   :  { %v7188_v45 = vmul.f32 %v7180_v34, %v10635_v29  ;;  %v7211_v2 = vadd.f32 %v7203_v48, %v10671_v3  ;;  %v7273_v1 = vadd.f32 %v7265_v10, %v11599_v56  ;;  %v8922_v29 = vld [vmem:[%s11196_s7] sm:$0xff] }
 0x7a9   :  { %v7210_v43 = vadd.f32 %v7202_v8, %v10671_v3  ;;  %v6775_v31 = vpop.f32.mrb[60].mxu0  ;;  %v7197_v60 = vmul.f32 %v7189_v61, %v7189_v61  ;;  %v6705_v54 = vpop.f32.mrb[68].mxu1 }
 0x7aa   :  { %v7196_v15 = vmul.f32 %v7188_v45, %v7188_v45  ;;  %v7183_v41 = vsub.f32 %v6775_v31, %v8922_v29  ;;  %v8497_v5 = vpop.f32.mrb[61].mxu0  ;;  %v7267_v25 = vmul.f32 %v7259_v58, %v7211_v2  ;;  %v7182_v38 = vsub.f32 %v6705_v54, %v8922_v29  ;;  %v8490_v17 = vpop.f32.mrb[69].mxu1 }
 0x7ab   :  { %v7266_v33 = vmul.f32 %v7258_v42, %v7210_v43  ;;  %v7289_v53 = vsub.f32 %v7273_v1, %v7281_v16  ;;  %v7205_v57 = vmul.f32 -0.5, %v7197_v60  ;;  %v11600_v16 = vsub.f32 %v10813_v21, %v10615_v59  ;;  %v7251_v45 = vpop.permute.xlu1 %7250  ;;  %v8924_v60 = vld [vmem:[%s11196_s7 + $0x10] sm:$0xff]  ;;  %s8966_s7 = smov [#allocation2]  }
 0x7ac   :  { %v7204_v39 = vmul.f32 -0.5, %v7196_v15  ;;  %v7191_v18 = vmul.f32 %v8923_v49, %v7183_v41  ;;  %v7190_v34 = vmul.f32 %v8923_v49, %v7182_v38  ;;  %v7275_v58 = vadd.f32 %v7267_v25, %v4139_v6  ;;  %s7650_s0 = sshll.u32 %s8966_s7, 4  ;;  %s7651_s0 = int_to_ptr.vmem [resolvable:$true] %s7650_s0 }
 0x7ad   :  { %v7409_v47 = vsel %vm382_vm5, %v7289_v53, 0.0  ;;  %v7274_v42 = vadd.f32 %v7266_v33, %v11600_v16  ;;  %v7213_v10 = vadd.f32 %v7205_v57, %v10671_v3  ;;  %v6845_v61 = vpop.f32.mrb[70].mxu1  ;;  %v7263_v6 = vmul.f32 %v7251_v45, %v7223_v20  ;;  %v7255_v53 = vpop.permute.xlu0 %7254  ;;  %s8925_s26 = scalar_lea.vmem %s7651_s0, 128  ;;  %p8930_p1 = scmp.lt.s32.totalorder %s7651_s0, %s7651_s0 }
 0x7ae   :  { %v7212_v48 = vadd.f32 %v7204_v39, %v10671_v3  ;;  %v7199_v8 = vmul.f32 %v7191_v18, %v7191_v18  ;;  %7410 = vadd.xlane.f32.xlu0 %v7409_v47  ;;  %v7198_v2 = vmul.f32 %v7190_v34, %v7190_v34  ;;  %v7184_v43 = vsub.f32 %v6845_v61, %v8922_v29  ;;  %v8504_v31 = vpop.f32.mrb[71].mxu1  ;;  %p8926_p0 = scmp.ne.s32.totalorder %s7651_s0, %s8925_s26  ;;  %p8931_p2 = scmp.lt.s32.totalorder %s8925_s26, %s8925_s26 }
 0x7af   :  { %v7291_v0 = vsub.f32 %v7275_v58, %v11061_v63  ;;  %v7290_v24 = vsub.f32 %v7274_v42, %v11058_v26  ;;  %v7269_v59 = vmul.f32 %v7261_v62, %v7213_v10  ;;  %v7284_v1 = vmul.f32 0.15625, %v5684_v22 }
 0x7b0   :  { %v7268_v21 = vmul.f32 %v7260_v23, %v7212_v48  ;;  %v7207_v46 = vmul.f32 -0.5, %v7199_v8  ;;  %v7206_v27 = vmul.f32 -0.5, %v7198_v2  ;;  %v7192_v4 = vmul.f32 %v8923_v49, %v7184_v43  ;;  %v11602_v23 = vld [vmem:[#allocation54_spill] sm:$0xff]  ;;  %p8932_p3 = por %p8931_p2, %p8930_p1 }
 0x7b1   :  { %v7415_v56 = vsel %vm382_vm5, %v7291_v0, 0.0  ;;  %v7412_v3 = vsel %vm382_vm5, %v7290_v24, 0.0  ;;  %v11601_v26 = vsub.f32 %v10730_v32, %v10644_v19  ;;  %v11603_v15 = vsub.f32 %v10743_v37, %v11602_v23  ;;  %v7496_v16 = vpop.xlane.xlu0 %7495  ;;  %v11607_v0 = vld [vmem:[#allocation16_spill] sm:$0xff] }
 0x7b2   :  { %v7215_v63 = vadd.f32 %v8924_v60, %v7207_v46  ;;  %7416 = vadd.xlane.f32.xlu0 %v7415_v56  ;;  %7413 = vadd.xlane.f32.xlu1 %v7412_v3  ;;  %v7262_v41 = vmul.f32 %v10983_v51, %v7222_v28  ;;  %v7224_v54 = vsub.f32 1.0, %v5688_v13  ;;  %v7214_v36 = vadd.f32 %v8924_v60, %v7206_v27  ;;  %p8933_p4 = pnand %p8932_p3, %p8926_p0 }
 0x7b3   :  { %v7277_v62 = vadd.f32 %v7269_v59, %v11601_v26  ;;  %v7276_v29 = vadd.f32 %v7268_v21, %v11603_v15  ;;  %v7200_v22 = vmul.f32 %v7192_v4, %v7192_v4  ;;  %v7287_v19 = vmul.f32 0.15625, %v5687_v50  ;;  %v11608_v59 = vld [vmem:[#allocation5_spill] sm:$0xff] }
 0x7b4   :  { %v7271_v5 = vmul.f32 %v7263_v6, %v7215_v63  ;;  %v7270_v38 = vmul.f32 %v7262_v41, %v7214_v36  ;;  %v11604_v51 = vsub.f32 %v10754_v30, %v10678_v44  ;;  %v7286_v20 = vmul.f32 0.15625, %v5686_v55 }
 0x7b5   :  { %v7293_v25 = vsub.f32 %v7277_v62, %v11070_v9  ;;  %v7292_v33 = vsub.f32 %v7276_v29, %v7284_v1  ;;  %v7208_v17 = vmul.f32 -0.5, %v7200_v22  ;;  %v7264_v57 = vmul.f32 %v7255_v53, %v7224_v54 }
 0x7b6   :  { %v7279_v28 = vadd.f32 %v7271_v5, %v11604_v51  ;;  %v11605_v39 = vsub.f32 %v10770_v35, %v10665_v52  ;;  %v7288_v47 = vmul.f32 0.15625, %v5688_v13  ;;  %v11606_v30 = vsub.f32 %v10793_v40, %v10697_v12  ;;  %v7493_v35 = vpop.xlane.xlu1 %7492  ;;  %v7499_v13 = vpop.xlane.xlu0 %7498 }
 0x7b7   :  { %v7421_v32 = vsel %vm382_vm5, %v7293_v25, 0.0  ;;  %v7418_v37 = vsel %vm382_vm5, %v7292_v33, 0.0  ;;  %v7216_v9 = vadd.f32 %v8924_v60, %v7208_v17  ;;  %v7536_v58 = vsel %vm853_vm4, %v10809_v7, 0.0 }
 0x7b8   :  { %7422 = vadd.xlane.f32.xlu0 %v7421_v32  ;;  %7419 = vadd.xlane.f32.xlu1 %v7418_v37  ;;  %v7278_v11 = vadd.f32 %v7270_v38, %v11605_v39  ;;  %v7295_v50 = vsub.f32 %v7279_v28, %v7287_v19  ;;  %v7559_v7 = vadd.s32 4294967288, %v11607_v0  ;;  %v11144_v21 = vsub.s32 %v11607_v0, %v11608_v59 }
 0x7b9   :  { %v7272_v49 = vmul.f32 %v7264_v57, %v7216_v9 }
 0x7ba   :  { %v7294_v18 = vsub.f32 %v7278_v11, %v7286_v20  ;;  %v7427_v34 = vsel %vm382_vm5, %v7295_v50, 0.0  ;;  %v7502_v42 = vpop.xlane.xlu1 %7501  ;;  %v7505_v10 = vpop.xlane.xlu0 %7504  ;;  %v7562_v46 = vsub.s32 %v7559_v7, %v11608_v59  ;;  %v7569_v63 = vrot.slane %v7499_v13, %v11144_v21 }
 0x7bb   :  { %v7280_v14 = vadd.f32 %v7272_v49, %v11606_v30  ;;  %v7578_v23 = vrot.slane %v7505_v10, %v11144_v21  ;;  %v7558_v15 = vrot.slane %v7493_v35, %v11144_v21 }
 0x7bc   :  { %7428 = vadd.xlane.f32.xlu0 %v7427_v34  ;;  %v7424_v44 = vsel %vm382_vm5, %v7294_v18, 0.0  ;;  %v7573_v56 = vrot.slane %v7502_v42, %v7562_v46  ;;  %v7563_v60 = vrot.slane %v7496_v16, %v7562_v46 }
 0x7bd   :  { %7425 = vadd.xlane.f32.xlu1 %v7424_v44  ;;  %v7296_v55 = vsub.f32 %v7280_v14, %v7288_v47 }
 0x7be   :  { %v7508_v48 = vpop.xlane.xlu1 %7507  ;;  %v7517_v8 = vpop.xlane.xlu0 %7516  ;;  %v7574_v29 = vsel %vm7564_vm6, %v7573_v56, %v7569_v63  ;;  %v7565_v38 = vsel %vm7564_vm6, %v7563_v60, %v7558_v15 }
 0x7bf   :  { %v7430_v52 = vsel %vm382_vm5, %v7296_v55, 0.0  ;;  %v7582_v1 = vrot.slane %v7508_v48, %v7562_v46  ;;  %v7629_v53 = vsel %vm7473_vm7, %v7574_v29, %v7565_v38  ;;  %v7596_v9 = vrot.slane %v7517_v8, %v11144_v21 }
 0x7c0   :  { %7537 = vadd.xlane.f32.xlu0 %v7536_v58 }
 0x7c1   :  { %7431 = vadd.xlane.f32.xlu1 %v7430_v52  ;;  %v7583_v5 = vsel %vm7564_vm6, %v7582_v1, %v7578_v23 }
 0x7c2   :  { %v7520_v61 = vpop.xlane.xlu1 %7519  ;;  %v7514_v45 = vpop.xlane.xlu0 %7513  ;;  %v7630_v51 = vsel %vm7475_vm8, %v7583_v5, %v7629_v53 }
 0x7c3   :  { %v7591_v41 = vrot.slane %v7514_v45, %v7562_v46  ;;  %v7600_v19 = vrot.slane %v7520_v61, %v7562_v46 }
 0x7c5   :  { %v7601_v47 = vsel %vm7564_vm6, %v7600_v19, %v7596_v9 }
 0x7c6   :  { %v7511_v12 = vpop.xlane.xlu1 %7510  ;;  %v7526_v40 = vpop.xlane.xlu0 %7525 }
 0x7c7   :  { %v7587_v26 = vrot.slane %v7511_v12, %v11144_v21  ;;  %v7609_v11 = vrot.slane %v7526_v40, %v7562_v46 }
 0x7c9   :  { %v7592_v17 = vsel %vm7564_vm6, %v7591_v41, %v7587_v26 }
 0x7ca   :  { %v7523_v2 = vpop.xlane.xlu1 %7522  ;;  %v7529_v43 = vpop.xlane.xlu0 %7528  ;;  %v7631_v39 = vsel %vm7477_vm9, %v7592_v17, %v7630_v51 }
 0x7cb   :  { %v7605_v32 = vrot.slane %v7523_v2, %v11144_v21  ;;  %v7614_v18 = vrot.slane %v7529_v43, %v11144_v21  ;;  %v7632_v52 = vsel %vm7479_vm10, %v7601_v47, %v7631_v39 }
 0x7cd   :  { %v7610_v44 = vsel %vm7564_vm6, %v7609_v11, %v7605_v32 }
 0x7ce   :  { %v7532_v31 = vpop.xlane.xlu1 %7531  ;;  %v7633_v48 = vsel %vm7481_vm11, %v7610_v44, %v7632_v52 }
 0x7cf   :  { %v7618_v28 = vrot.slane %v7532_v31, %v7562_v46 }
 0x7d1   :  { %v7619_v14 = vsel %vm7564_vm6, %v7618_v28, %v7614_v18 }
 0x7d2   :  { %v11140_v24 = vpop.xlane.xlu1 %7534  ;;  %v7634_v45 = vsel %vm7483_vm12, %v7619_v14, %v7633_v48 }
 0x7d3   :  { %v7623_v35 = vrot.slane %v11140_v24, %v11144_v21  ;;  %v11609_v24 = vld [vmem:[#allocation78_spill] sm:$0xff] }
 0x83b   :  { %v7411_v6 = vpop.xlane.xlu0 %7410 }
 0x83c   :  { %v7444_v62 = vrot.slane %v7411_v6, %v11144_v21  ;;  %v7666_v6 = vadd.f32 -7.351508, %v11609_v24 }
 0x83f   :  { %v7417_v27 = vpop.xlane.xlu0 %7416  ;;  %v7414_v4 = vpop.xlane.xlu1 %7413 }
 0x840   :  { %v7448_v3 = vrot.slane %v7414_v4, %v11144_v21  ;;  %v7452_v25 = vrot.slane %v7417_v27, %v11144_v21 }
 0x842   :  { %v7474_v54 = vsel %vm7473_vm7, %v7448_v3, %v7444_v62 }
 0x843   :  { %v7476_v37 = vsel %vm7475_vm8, %v7452_v25, %v7474_v54 }
 0x845   :  { %v7423_v36 = vpop.xlane.xlu0 %7422  ;;  %v7420_v22 = vpop.xlane.xlu1 %7419 }
 0x846   :  { %v7456_v33 = vrot.slane %v7420_v22, %v11144_v21  ;;  %v7460_v50 = vrot.slane %v7423_v36, %v11144_v21 }
 0x848   :  { %v7478_v20 = vsel %vm7477_vm9, %v7456_v33, %v7476_v37 }
 0x849   :  { %v7429_v57 = vpop.xlane.xlu0 %7428  ;;  %v7480_v30 = vsel %vm7479_vm10, %v7460_v50, %v7478_v20 }
 0x84a   :  { %v7426_v49 = vpop.xlane.xlu1 %7425  ;;  %v7468_v16 = vrot.slane %v7429_v57, %v11144_v21 }
 0x84b   :  { %v7464_v34 = vrot.slane %v7426_v49, %v11144_v21 }
 0x84d   :  { %v7482_v55 = vsel %vm7481_vm11, %v7464_v34, %v7480_v30  ;;  %v7538_v58 = vpop.xlane.xlu0 %7537 }
 0x84e   :  { %v7627_v42 = vrot.slane %v7538_v58, %v7562_v46  ;;  %v7432_v13 = vpop.xlane.xlu1 %7431  ;;  %v7484_v8 = vsel %vm7483_vm12, %v7468_v16, %v7482_v55 }
 0x84f   :  { %v7472_v10 = vrot.slane %v7432_v13, %v11144_v21 }
 0x850   :  { %v7628_v61 = vsel %vm7564_vm6, %v7627_v42, %v7623_v35 }
 0x851   :  { %v7486_v12 = vsel %vm7485_vm13, %v7472_v10, %v7484_v8  ;;  %v7635_v40 = vsel %vm7485_vm13, %v7628_v61, %v7634_v45 }
 0x852   :  { %v7488_v2 = vsel %vm382_vm5, %v7486_v12, 0.0  ;;  %v7637_v43 = vsel %vm853_vm4, %v7635_v40, 0.0 }
 0x853   :  { %7489 = vadd.xlane.f32.xlu0 %v7488_v2  ;;  %7638 = vadd.xlane.f32.xlu1 %v7637_v43 }
 0x8e0   :  { %v7639_v31 = vpop.xlane.xlu1 %7638  ;;  %v7490_v0 = vpop.xlane.xlu0 %7489 }
 0x8e1   :  { %v7640_v7 = vadd.f32 %v7639_v31, %v7490_v0 }
 0x8e3   :  { %v7641_v59 = vadd.f32 4.6051702, %v7640_v7 }
 0x8e5   :  { %v7642_v21 = vsub.f32 %v7641_v59, %v7666_v6 }
 0x8e7   :  { %7643 = vst [vmem:[#allocation2] sm:$0xff] %v7642_v21 }
 0x8e8   :  { %8936 = shalt.err (!%p8933_p4)
}
 0x8e9   :  { %s8937_s28 = scalar_lea.hbm %s11197_s8, 128 }
 0x8ea   :  { %p8938_p5 = scmp.ne.s32.totalorder %s11197_s8, %s8937_s28  ;;  %p8941_p6 = scmp.lt.u32.totalorder %s8937_s28, %s11197_s8 }
 0x8ec   :  { %p8943_p7 = pnand %p8941_p6, %p8938_p5 }
 0x8ee   :  { %8946 = shalt.err (!%p8943_p7)
}
 0x8ef   :  { %7653 = dma.vmem_to_hbm [thread:$0]  %s7651_s0, 128, %s11197_s8, [#allocation3]  }
 0x8f0   :  { %8947 = dma.done.wait [#allocation3], 128  }
 0x8f1   :  { %8948 = vsyncadd [#allocation3], 4294967168 }
 0x8f2   :  { %7657 = vsyncpa [#allocation3], 1 }

</bundles_post_ra>
